<compile_context>
chip_gen: v7x
topology: tpu7x:2x2x1
jax: 0.10.0
libtpu: 0.0.40
codegen_flags: <defaults>
</compile_context>

<pallas_src>
import functools

import jax
import jax.numpy as jnp
from jax.experimental import pallas as pl
from jax.experimental.pallas import tpu as pltpu


def lstm_fused_kernel(x_ref, wih_ref, whh_ref, b_ref, wout_ref, bout_ref,
                      out_ref, gx_scr, hs_scr):
    """Whole sequence in one kernel invocation.

    x_ref:    (T, B, E)  time-major embedded input (resident)
    wih_ref:  (E, 4H)    W_ih^T
    whh_ref:  (H, 4H)    W_hh^T
    b_ref:    (1, 4H)    b_ih + b_hh
    wout_ref: (H, V)     W_out^T
    bout_ref: (1, V)     b_out
    out_ref:  (B, T, V)  logits, batch-major (matches PyTorch batch_first)
    gx_scr:   (T, B, 4H) precomputed input-projection gates
    hs_scr:   (T, B, H)  hidden states for the deferred output projection
    """
    T, B, E = x_ref.shape
    H = whh_ref.shape[0]
    V = wout_ref.shape[1]
    G = 4 * H

    # ---- 1) batched input projection, hoisted out of the recurrence -------------
    # One (T*B, E) @ (E, 4H) matmul instead of T tiny ones on the critical path.
    x_all = x_ref[...].reshape(T * B, E)
    gx = (jnp.dot(x_all, wih_ref[...], preferred_element_type=jnp.float32)
          + b_ref[...])                                  # bias broadcast hoisted (once)
    gx_scr[...] = gx.reshape(T, B, G)

    # ---- 2) sequential recurrence: only h @ W_hh^T inside the serial loop -------
    whh = whh_ref[...]                                   # resident (H, 4H)

    def step(t, carry):
        h, c = carry
        gates = gx_scr[t] + jnp.dot(h, whh, preferred_element_type=jnp.float32)
        # H == 128 in the demo -> each slice is a full 128-lane span (free vreg view)
        i_g = jax.nn.sigmoid(gates[:, 0 * H:1 * H])
        f_g = jax.nn.sigmoid(gates[:, 1 * H:2 * H])
        g_g = jnp.tanh(gates[:, 2 * H:3 * H])
        o_g = jax.nn.sigmoid(gates[:, 3 * H:4 * H])
        c_new = f_g * c + i_g * g_g
        h_new = o_g * jnp.tanh(c_new)
        hs_scr[t] = h_new
        return (h_new, c_new)

    init = (jnp.zeros((B, H), jnp.float32), jnp.zeros((B, H), jnp.float32))
    jax.lax.fori_loop(0, T, step, init, unroll=True)

    # ---- 3) deferred output projection: one fat matmul + lane-dense store -------
    hs = hs_scr[...].reshape(T * B, H)
    logits = (jnp.dot(hs, wout_ref[...], preferred_element_type=jnp.float32)
              + bout_ref[...])                           # (T*B, V)
    logits3 = logits.reshape(T, B, V)

    # Write batch-major (B, T, V) directly (static slices only) -> no wrapper transpose.
    for t in range(T):
        out_ref[:, t, :] = logits3[t]


@jax.jit
def lstm_model_forward(x_ids, params):
    """x_ids: (B, T) int32 token ids. Returns logits (B, T, V) like the PyTorch module."""
    emb = params["embedding"]              # (Vocab, E)
    wih_t = params["wih_t"]                # (E, 4H)
    whh_t = params["whh_t"]                # (H, 4H)
    b = params["b"]                        # (1, 4H)
    wout_t = params["wout_t"]              # (H, V)
    bout = params["bout"]                  # (1, V)

    B, T = x_ids.shape
    E = emb.shape[1]
    H = whh_t.shape[0]
    V = wout_t.shape[1]

    # Embedding gather stays in JAX glue, but indexed with transposed ids so the
    # gather materializes directly time-major (T, B, E): no HBM transpose of activations.
    x_tm = jnp.take(emb, x_ids.T, axis=0)                # (T, B, E)

    full2 = lambda i: (0, 0)                             # resident weight blocks

    out = pl.pallas_call(
        lstm_fused_kernel,
        out_shape=jax.ShapeDtypeStruct((B, T, V), jnp.float32),
        grid_spec=pltpu.PrefetchScalarGridSpec(
            num_scalar_prefetch=0,
            grid=(1,),                                   # single invocation; T loop is in-kernel
            in_specs=[
                pl.BlockSpec((T, B, E), lambda i: (0, 0, 0)),    # embedded input
                pl.BlockSpec((E, 4 * H), full2),                 # W_ih^T
                pl.BlockSpec((H, 4 * H), full2),                 # W_hh^T
                pl.BlockSpec((1, 4 * H), full2),                 # bias
                pl.BlockSpec((H, V), full2),                     # W_out^T
                pl.BlockSpec((1, V), full2),                     # b_out
            ],
            out_specs=pl.BlockSpec((B, T, V), lambda i: (0, 0, 0)),
            scratch_shapes=[
                pltpu.VMEM((T, B, 4 * H), jnp.float32),          # precomputed input gates
                pltpu.VMEM((T, B, H), jnp.float32),              # hidden states h_t
            ],
        ),
        compiler_params=pltpu.CompilerParams(
            dimension_semantics=("arbitrary",),
        ),
    )(x_tm, wih_t, whh_t, b, wout_t, bout)

    return out                                            # (B, T, V)


def reference_forward(x_ids, params):
    """Pure-JAX reference (lax.scan) mirroring torch.nn.LSTM + Linear semantics."""
    emb = params["embedding"]
    wih_t, whh_t, b = params["wih_t"], params["whh_t"], params["b"]
    wout_t, bout = params["wout_t"], params["bout"]
    H = whh_t.shape[0]

    x_emb = jnp.take(emb, x_ids, axis=0)            # (B, T, E)
    x_tm = jnp.transpose(x_emb, (1, 0, 2))          # (T, B, E)
    B = x_ids.shape[0]

    def step(carry, x_t):
        h, c = carry
        gates = x_t @ wih_t + h @ whh_t + b
        i = jax.nn.sigmoid(gates[:, 0 * H:1 * H])
        f = jax.nn.sigmoid(gates[:, 1 * H:2 * H])
        g = jnp.tanh(gates[:, 2 * H:3 * H])
        o = jax.nn.sigmoid(gates[:, 3 * H:4 * H])
        c = f * c + i * g
        h = o * jnp.tanh(c)
        return (h, c), h

    init = (jnp.zeros((B, H), jnp.float32), jnp.zeros((B, H), jnp.float32))
    _, hs = jax.lax.scan(step, init, x_tm)          # (T, B, H)
    logits = hs @ wout_t + bout                     # (T, B, V)
    return jnp.transpose(logits, (1, 0, 2))         # (B, T, V)


def init_params(key, vocab_size, embedding_dim, hidden_dim):
    """Deterministic init mimicking PyTorch defaults (uniform +-1/sqrt(H))."""
    ks = jax.random.split(key, 7)
    s = 1.0 / jnp.sqrt(jnp.float32(hidden_dim))
    u = lambda k, shp, sc: jax.random.uniform(k, shp, jnp.float32, -sc, sc)
    params = {
        "embedding": jax.random.normal(ks[0], (vocab_size, embedding_dim), jnp.float32),
        # store transposed weights so the kernel computes x @ W directly
        "wih_t": u(ks[1], (embedding_dim, 4 * hidden_dim), s),
        "whh_t": u(ks[2], (hidden_dim, 4 * hidden_dim), s),
        "b": u(ks[3], (1, 4 * hidden_dim), s) + u(ks[4], (1, 4 * hidden_dim), s),  # b_ih + b_hh
        "wout_t": u(ks[5], (hidden_dim, vocab_size), s),
        "bout": u(ks[6], (1, vocab_size), s),
    }
    return params


if __name__ == "__main__":
    # Small shapes consistent with the module; chosen lane/sublane friendly
    # (B multiple of 8, E/H/V multiples of 128 so gate slices & stores are aligned).
    VOCAB = 256
    EMBED = 128
    HIDDEN = 128
    BATCH = 8
    SEQ = 16

    key = jax.random.PRNGKey(0)
    k_param, k_data = jax.random.split(key)
    params = init_params(k_param, VOCAB, EMBED, HIDDEN)
    x_ids = jax.random.randint(k_data, (BATCH, SEQ), 0, VOCAB, dtype=jnp.int32)

    out = lstm_model_forward(x_ids, params)
    out = jax.block_until_ready(out)

    ref = jax.block_until_ready(reference_forward(x_ids, params))
    assert out.shape == (BATCH, SEQ, VOCAB), out.shape
    assert jnp.allclose(out, ref, rtol=1e-3, atol=1e-3), "mismatch vs JAX reference"

    print("KERNEL_OK")
</pallas_src>

<mosaic_0001>
module attributes {stable_mosaic.version = 11 : i64} {
  func.func @lstm_fused_kernel(%arg0: i32, %arg1: memref<16x8x128xf32, #tpu.memory_space<vmem>>, %arg2: memref<128x512xf32, #tpu.memory_space<vmem>>, %arg3: memref<128x512xf32, #tpu.memory_space<vmem>>, %arg4: memref<1x512xf32, #tpu.memory_space<vmem>>, %arg5: memref<128x256xf32, #tpu.memory_space<vmem>>, %arg6: memref<1x256xf32, #tpu.memory_space<vmem>>, %arg7: memref<8x16x256xf32, #tpu.memory_space<vmem>>, %arg8: memref<16x8x512xf32, #tpu.memory_space<vmem>>, %arg9: memref<16x8x128xf32, #tpu.memory_space<vmem>>) attributes {dimension_semantics = [#tpu.dimension_semantics<arbitrary>], iteration_bounds = array<i64: 1>, scalar_prefetch = 0 : i64, scratch_operands = 2 : i64, tpu.core_type = #tpu.core_type<tc>, window_params = [{pipeline_mode = #tpu.pipeline_mode<synchronous>, transform_indices = @transform_0, window_bounds = array<i64: 16, 8, 128>}, {pipeline_mode = #tpu.pipeline_mode<synchronous>, transform_indices = @transform_1, window_bounds = array<i64: 128, 512>}, {pipeline_mode = #tpu.pipeline_mode<synchronous>, transform_indices = @transform_2, window_bounds = array<i64: 128, 512>}, {pipeline_mode = #tpu.pipeline_mode<synchronous>, transform_indices = @transform_3, window_bounds = array<i64: 1, 512>}, {pipeline_mode = #tpu.pipeline_mode<synchronous>, transform_indices = @transform_4, window_bounds = array<i64: 128, 256>}, {pipeline_mode = #tpu.pipeline_mode<synchronous>, transform_indices = @transform_5, window_bounds = array<i64: 1, 256>}, {pipeline_mode = #tpu.pipeline_mode<synchronous>, transform_indices = @transform_6, window_bounds = array<i64: 8, 16, 256>}]} {
    %c0 = arith.constant 0 : index
    %c0_0 = arith.constant 0 : index
    %c0_1 = arith.constant 0 : index
    %0 = vector.load %arg1[%c0, %c0_0, %c0_1] : memref<16x8x128xf32, #tpu.memory_space<vmem>>, vector<16x8x128xf32>
    %1 = vector.shape_cast %0 : vector<16x8x128xf32> to vector<128x128xf32>
    %c0_2 = arith.constant 0 : index
    %c0_3 = arith.constant 0 : index
    %2 = vector.load %arg2[%c0_2, %c0_3] : memref<128x512xf32, #tpu.memory_space<vmem>>, vector<128x512xf32>
    %cst = arith.constant dense<0.000000e+00> : vector<128x512xf32>
    %3 = tpu.matmul %1, %2, %cst {dimension_numbers = #tpu.dot_dimension_numbers<[1], [0], [0], [1], [0, 0, 1, 1], [], []>} : vector<128x128xf32>, vector<128x512xf32>, vector<128x512xf32> -> vector<128x512xf32>
    %c0_4 = arith.constant 0 : index
    %c0_5 = arith.constant 0 : index
    %4 = vector.load %arg4[%c0_4, %c0_5] : memref<1x512xf32, #tpu.memory_space<vmem>>, vector<1x512xf32>
    %5 = vector.broadcast %4 : vector<1x512xf32> to vector<128x512xf32>
    %6 = arith.addf %3, %5 : vector<128x512xf32>
    %7 = vector.shape_cast %6 : vector<128x512xf32> to vector<16x8x512xf32>
    %c0_6 = arith.constant 0 : index
    %c0_7 = arith.constant 0 : index
    %c0_8 = arith.constant 0 : index
    %8 = vector.load %arg8[%c0_6, %c0_7, %c0_8] : memref<16x8x512xf32, #tpu.memory_space<vmem>>, vector<16x8x512xf32>
    tpu.vector_store %arg8[%c0_6, %c0_7, %c0_8], %7 {strides = array<i32>} : memref<16x8x512xf32, #tpu.memory_space<vmem>>, vector<16x8x512xf32>,
    %c0_9 = arith.constant 0 : index
    %c0_10 = arith.constant 0 : index
    %9 = vector.load %arg3[%c0_9, %c0_10] : memref<128x512xf32, #tpu.memory_space<vmem>>, vector<128x512xf32>
    %cst_11 = arith.constant 0.000000e+00 : f32
    %10 = vector.broadcast %cst_11 : f32 to vector<8x128xf32>
    %cst_12 = arith.constant 0.000000e+00 : f32
    %11 = vector.broadcast %cst_12 : f32 to vector<8x128xf32>
    %c0_i32 = arith.constant 0 : i32
    %12 = arith.index_cast %c0_i32 : i32 to index
    %c0_13 = arith.constant 0 : index
    %c0_14 = arith.constant 0 : index
    %13 = vector.load %arg8[%12, %c0_13, %c0_14] : memref<16x8x512xf32, #tpu.memory_space<vmem>>, vector<1x8x512xf32>
    %14 = vector.shape_cast %13 : vector<1x8x512xf32> to vector<8x512xf32>
    %cst_15 = arith.constant dense<0.000000e+00> : vector<8x512xf32>
    %15 = tpu.matmul %10, %9, %cst_15 {dimension_numbers = #tpu.dot_dimension_numbers<[1], [0], [0], [1], [0, 0, 1, 1], [], []>} : vector<8x128xf32>, vector<128x512xf32>, vector<8x512xf32> -> vector<8x512xf32>
    %16 = arith.addf %14, %15 : vector<8x512xf32>
    %17 = vector.extract_strided_slice %16 {offsets = [0, 0], sizes = [8, 128], strides = [1, 1]} : vector<8x512xf32> to vector<8x128xf32>
    %18 = arith.negf %17 : vector<8x128xf32>
    %19 = math.exp %18 : vector<8x128xf32>
    %cst_16 = arith.constant 1.000000e+00 : f32
    %20 = vector.broadcast %cst_16 : f32 to vector<8x128xf32>
    %21 = arith.addf %20, %19 : vector<8x128xf32>
    %22 = arith.divf %20, %21 : vector<8x128xf32>
    %23 = vector.extract_strided_slice %16 {offsets = [0, 128], sizes = [8, 128], strides = [1, 1]} : vector<8x512xf32> to vector<8x128xf32>
    %24 = arith.negf %23 : vector<8x128xf32>
    %25 = math.exp %24 : vector<8x128xf32>
    %cst_17 = arith.constant 1.000000e+00 : f32
    %26 = vector.broadcast %cst_17 : f32 to vector<8x128xf32>
    %27 = arith.addf %26, %25 : vector<8x128xf32>
    %28 = arith.divf %26, %27 : vector<8x128xf32>
    %29 = vector.extract_strided_slice %16 {offsets = [0, 256], sizes = [8, 128], strides = [1, 1]} : vector<8x512xf32> to vector<8x128xf32>
    %30 = math.tanh %29 : vector<8x128xf32>
    %31 = vector.extract_strided_slice %16 {offsets = [0, 384], sizes = [8, 128], strides = [1, 1]} : vector<8x512xf32> to vector<8x128xf32>
    %32 = arith.negf %31 : vector<8x128xf32>
    %33 = math.exp %32 : vector<8x128xf32>
    %cst_18 = arith.constant 1.000000e+00 : f32
    %34 = vector.broadcast %cst_18 : f32 to vector<8x128xf32>
    %35 = arith.addf %34, %33 : vector<8x128xf32>
    %36 = arith.divf %34, %35 : vector<8x128xf32>
    %37 = arith.mulf %28, %11 : vector<8x128xf32>
    %38 = arith.mulf %22, %30 : vector<8x128xf32>
    %39 = arith.addf %37, %38 : vector<8x128xf32>
    %40 = math.tanh %39 : vector<8x128xf32>
    %41 = arith.mulf %36, %40 : vector<8x128xf32>
    %42 = arith.index_cast %c0_i32 : i32 to index
    %c0_19 = arith.constant 0 : index
    %c0_20 = arith.constant 0 : index
    %43 = vector.load %arg9[%42, %c0_19, %c0_20] : memref<16x8x128xf32, #tpu.memory_space<vmem>>, vector<1x8x128xf32>
    %44 = vector.shape_cast %43 : vector<1x8x128xf32> to vector<8x128xf32>
    %45 = vector.shape_cast %41 : vector<8x128xf32> to vector<1x8x128xf32>
    tpu.vector_store %arg9[%42, %c0_19, %c0_20], %45 {strides = array<i32>} : memref<16x8x128xf32, #tpu.memory_space<vmem>>, vector<1x8x128xf32>,
    %c1_i32 = arith.constant 1 : i32
    %46 = arith.index_cast %c1_i32 : i32 to index
    %c0_21 = arith.constant 0 : index
    %c0_22 = arith.constant 0 : index
    %47 = vector.load %arg8[%46, %c0_21, %c0_22] : memref<16x8x512xf32, #tpu.memory_space<vmem>>, vector<1x8x512xf32>
    %48 = vector.shape_cast %47 : vector<1x8x512xf32> to vector<8x512xf32>
    %cst_23 = arith.constant dense<0.000000e+00> : vector<8x512xf32>
    %49 = tpu.matmul %41, %9, %cst_23 {dimension_numbers = #tpu.dot_dimension_numbers<[1], [0], [0], [1], [0, 0, 1, 1], [], []>} : vector<8x128xf32>, vector<128x512xf32>, vector<8x512xf32> -> vector<8x512xf32>
    %50 = arith.addf %48, %49 : vector<8x512xf32>
    %51 = vector.extract_strided_slice %50 {offsets = [0, 0], sizes = [8, 128], strides = [1, 1]} : vector<8x512xf32> to vector<8x128xf32>
    %52 = arith.negf %51 : vector<8x128xf32>
    %53 = math.exp %52 : vector<8x128xf32>
    %cst_24 = arith.constant 1.000000e+00 : f32
    %54 = vector.broadcast %cst_24 : f32 to vector<8x128xf32>
    %55 = arith.addf %54, %53 : vector<8x128xf32>
    %56 = arith.divf %54, %55 : vector<8x128xf32>
    %57 = vector.extract_strided_slice %50 {offsets = [0, 128], sizes = [8, 128], strides = [1, 1]} : vector<8x512xf32> to vector<8x128xf32>
    %58 = arith.negf %57 : vector<8x128xf32>
    %59 = math.exp %58 : vector<8x128xf32>
    %cst_25 = arith.constant 1.000000e+00 : f32
    %60 = vector.broadcast %cst_25 : f32 to vector<8x128xf32>
    %61 = arith.addf %60, %59 : vector<8x128xf32>
    %62 = arith.divf %60, %61 : vector<8x128xf32>
    %63 = vector.extract_strided_slice %50 {offsets = [0, 256], sizes = [8, 128], strides = [1, 1]} : vector<8x512xf32> to vector<8x128xf32>
    %64 = math.tanh %63 : vector<8x128xf32>
    %65 = vector.extract_strided_slice %50 {offsets = [0, 384], sizes = [8, 128], strides = [1, 1]} : vector<8x512xf32> to vector<8x128xf32>
    %66 = arith.negf %65 : vector<8x128xf32>
    %67 = math.exp %66 : vector<8x128xf32>
    %cst_26 = arith.constant 1.000000e+00 : f32
    %68 = vector.broadcast %cst_26 : f32 to vector<8x128xf32>
    %69 = arith.addf %68, %67 : vector<8x128xf32>
    %70 = arith.divf %68, %69 : vector<8x128xf32>
    %71 = arith.mulf %62, %39 : vector<8x128xf32>
    %72 = arith.mulf %56, %64 : vector<8x128xf32>
    %73 = arith.addf %71, %72 : vector<8x128xf32>
    %74 = math.tanh %73 : vector<8x128xf32>
    %75 = arith.mulf %70, %74 : vector<8x128xf32>
    %76 = arith.index_cast %c1_i32 : i32 to index
    %c0_27 = arith.constant 0 : index
    %c0_28 = arith.constant 0 : index
    %77 = vector.load %arg9[%76, %c0_27, %c0_28] : memref<16x8x128xf32, #tpu.memory_space<vmem>>, vector<1x8x128xf32>
    %78 = vector.shape_cast %77 : vector<1x8x128xf32> to vector<8x128xf32>
    %79 = vector.shape_cast %75 : vector<8x128xf32> to vector<1x8x128xf32>
    tpu.vector_store %arg9[%76, %c0_27, %c0_28], %79 {strides = array<i32>} : memref<16x8x128xf32, #tpu.memory_space<vmem>>, vector<1x8x128xf32>,
    %c2_i32 = arith.constant 2 : i32
    %80 = arith.index_cast %c2_i32 : i32 to index
    %c0_29 = arith.constant 0 : index
    %c0_30 = arith.constant 0 : index
    %81 = vector.load %arg8[%80, %c0_29, %c0_30] : memref<16x8x512xf32, #tpu.memory_space<vmem>>, vector<1x8x512xf32>
    %82 = vector.shape_cast %81 : vector<1x8x512xf32> to vector<8x512xf32>
    %cst_31 = arith.constant dense<0.000000e+00> : vector<8x512xf32>
    %83 = tpu.matmul %75, %9, %cst_31 {dimension_numbers = #tpu.dot_dimension_numbers<[1], [0], [0], [1], [0, 0, 1, 1], [], []>} : vector<8x128xf32>, vector<128x512xf32>, vector<8x512xf32> -> vector<8x512xf32>
    %84 = arith.addf %82, %83 : vector<8x512xf32>
    %85 = vector.extract_strided_slice %84 {offsets = [0, 0], sizes = [8, 128], strides = [1, 1]} : vector<8x512xf32> to vector<8x128xf32>
    %86 = arith.negf %85 : vector<8x128xf32>
    %87 = math.exp %86 : vector<8x128xf32>
    %cst_32 = arith.constant 1.000000e+00 : f32
    %88 = vector.broadcast %cst_32 : f32 to vector<8x128xf32>
    %89 = arith.addf %88, %87 : vector<8x128xf32>
    %90 = arith.divf %88, %89 : vector<8x128xf32>
    %91 = vector.extract_strided_slice %84 {offsets = [0, 128], sizes = [8, 128], strides = [1, 1]} : vector<8x512xf32> to vector<8x128xf32>
    %92 = arith.negf %91 : vector<8x128xf32>
    %93 = math.exp %92 : vector<8x128xf32>
    %cst_33 = arith.constant 1.000000e+00 : f32
    %94 = vector.broadcast %cst_33 : f32 to vector<8x128xf32>
    %95 = arith.addf %94, %93 : vector<8x128xf32>
    %96 = arith.divf %94, %95 : vector<8x128xf32>
    %97 = vector.extract_strided_slice %84 {offsets = [0, 256], sizes = [8, 128], strides = [1, 1]} : vector<8x512xf32> to vector<8x128xf32>
    %98 = math.tanh %97 : vector<8x128xf32>
    %99 = vector.extract_strided_slice %84 {offsets = [0, 384], sizes = [8, 128], strides = [1, 1]} : vector<8x512xf32> to vector<8x128xf32>
    %100 = arith.negf %99 : vector<8x128xf32>
    %101 = math.exp %100 : vector<8x128xf32>
    %cst_34 = arith.constant 1.000000e+00 : f32
    %102 = vector.broadcast %cst_34 : f32 to vector<8x128xf32>
    %103 = arith.addf %102, %101 : vector<8x128xf32>
    %104 = arith.divf %102, %103 : vector<8x128xf32>
    %105 = arith.mulf %96, %73 : vector<8x128xf32>
    %106 = arith.mulf %90, %98 : vector<8x128xf32>
    %107 = arith.addf %105, %106 : vector<8x128xf32>
    %108 = math.tanh %107 : vector<8x128xf32>
    %109 = arith.mulf %104, %108 : vector<8x128xf32>
    %110 = arith.index_cast %c2_i32 : i32 to index
    %c0_35 = arith.constant 0 : index
    %c0_36 = arith.constant 0 : index
    %111 = vector.load %arg9[%110, %c0_35, %c0_36] : memref<16x8x128xf32, #tpu.memory_space<vmem>>, vector<1x8x128xf32>
    %112 = vector.shape_cast %111 : vector<1x8x128xf32> to vector<8x128xf32>
    %113 = vector.shape_cast %109 : vector<8x128xf32> to vector<1x8x128xf32>
    tpu.vector_store %arg9[%110, %c0_35, %c0_36], %113 {strides = array<i32>} : memref<16x8x128xf32, #tpu.memory_space<vmem>>, vector<1x8x128xf32>,
    %c3_i32 = arith.constant 3 : i32
    %114 = arith.index_cast %c3_i32 : i32 to index
    %c0_37 = arith.constant 0 : index
    %c0_38 = arith.constant 0 : index
    %115 = vector.load %arg8[%114, %c0_37, %c0_38] : memref<16x8x512xf32, #tpu.memory_space<vmem>>, vector<1x8x512xf32>
    %116 = vector.shape_cast %115 : vector<1x8x512xf32> to vector<8x512xf32>
    %cst_39 = arith.constant dense<0.000000e+00> : vector<8x512xf32>
    %117 = tpu.matmul %109, %9, %cst_39 {dimension_numbers = #tpu.dot_dimension_numbers<[1], [0], [0], [1], [0, 0, 1, 1], [], []>} : vector<8x128xf32>, vector<128x512xf32>, vector<8x512xf32> -> vector<8x512xf32>
    %118 = arith.addf %116, %117 : vector<8x512xf32>
    %119 = vector.extract_strided_slice %118 {offsets = [0, 0], sizes = [8, 128], strides = [1, 1]} : vector<8x512xf32> to vector<8x128xf32>
    %120 = arith.negf %119 : vector<8x128xf32>
    %121 = math.exp %120 : vector<8x128xf32>
    %cst_40 = arith.constant 1.000000e+00 : f32
    %122 = vector.broadcast %cst_40 : f32 to vector<8x128xf32>
    %123 = arith.addf %122, %121 : vector<8x128xf32>
    %124 = arith.divf %122, %123 : vector<8x128xf32>
    %125 = vector.extract_strided_slice %118 {offsets = [0, 128], sizes = [8, 128], strides = [1, 1]} : vector<8x512xf32> to vector<8x128xf32>
    %126 = arith.negf %125 : vector<8x128xf32>
    %127 = math.exp %126 : vector<8x128xf32>
    %cst_41 = arith.constant 1.000000e+00 : f32
    %128 = vector.broadcast %cst_41 : f32 to vector<8x128xf32>
    %129 = arith.addf %128, %127 : vector<8x128xf32>
    %130 = arith.divf %128, %129 : vector<8x128xf32>
    %131 = vector.extract_strided_slice %118 {offsets = [0, 256], sizes = [8, 128], strides = [1, 1]} : vector<8x512xf32> to vector<8x128xf32>
    %132 = math.tanh %131 : vector<8x128xf32>
    %133 = vector.extract_strided_slice %118 {offsets = [0, 384], sizes = [8, 128], strides = [1, 1]} : vector<8x512xf32> to vector<8x128xf32>
    %134 = arith.negf %133 : vector<8x128xf32>
    %135 = math.exp %134 : vector<8x128xf32>
    %cst_42 = arith.constant 1.000000e+00 : f32
    %136 = vector.broadcast %cst_42 : f32 to vector<8x128xf32>
    %137 = arith.addf %136, %135 : vector<8x128xf32>
    %138 = arith.divf %136, %137 : vector<8x128xf32>
    %139 = arith.mulf %130, %107 : vector<8x128xf32>
    %140 = arith.mulf %124, %132 : vector<8x128xf32>
    %141 = arith.addf %139, %140 : vector<8x128xf32>
    %142 = math.tanh %141 : vector<8x128xf32>
    %143 = arith.mulf %138, %142 : vector<8x128xf32>
    %144 = arith.index_cast %c3_i32 : i32 to index
    %c0_43 = arith.constant 0 : index
    %c0_44 = arith.constant 0 : index
    %145 = vector.load %arg9[%144, %c0_43, %c0_44] : memref<16x8x128xf32, #tpu.memory_space<vmem>>, vector<1x8x128xf32>
    %146 = vector.shape_cast %145 : vector<1x8x128xf32> to vector<8x128xf32>
    %147 = vector.shape_cast %143 : vector<8x128xf32> to vector<1x8x128xf32>
    tpu.vector_store %arg9[%144, %c0_43, %c0_44], %147 {strides = array<i32>} : memref<16x8x128xf32, #tpu.memory_space<vmem>>, vector<1x8x128xf32>,
    %c4_i32 = arith.constant 4 : i32
    %148 = arith.index_cast %c4_i32 : i32 to index
    %c0_45 = arith.constant 0 : index
    %c0_46 = arith.constant 0 : index
    %149 = vector.load %arg8[%148, %c0_45, %c0_46] : memref<16x8x512xf32, #tpu.memory_space<vmem>>, vector<1x8x512xf32>
    %150 = vector.shape_cast %149 : vector<1x8x512xf32> to vector<8x512xf32>
    %cst_47 = arith.constant dense<0.000000e+00> : vector<8x512xf32>
    %151 = tpu.matmul %143, %9, %cst_47 {dimension_numbers = #tpu.dot_dimension_numbers<[1], [0], [0], [1], [0, 0, 1, 1], [], []>} : vector<8x128xf32>, vector<128x512xf32>, vector<8x512xf32> -> vector<8x512xf32>
    %152 = arith.addf %150, %151 : vector<8x512xf32>
    %153 = vector.extract_strided_slice %152 {offsets = [0, 0], sizes = [8, 128], strides = [1, 1]} : vector<8x512xf32> to vector<8x128xf32>
    %154 = arith.negf %153 : vector<8x128xf32>
    %155 = math.exp %154 : vector<8x128xf32>
    %cst_48 = arith.constant 1.000000e+00 : f32
    %156 = vector.broadcast %cst_48 : f32 to vector<8x128xf32>
    %157 = arith.addf %156, %155 : vector<8x128xf32>
    %158 = arith.divf %156, %157 : vector<8x128xf32>
    %159 = vector.extract_strided_slice %152 {offsets = [0, 128], sizes = [8, 128], strides = [1, 1]} : vector<8x512xf32> to vector<8x128xf32>
    %160 = arith.negf %159 : vector<8x128xf32>
    %161 = math.exp %160 : vector<8x128xf32>
    %cst_49 = arith.constant 1.000000e+00 : f32
    %162 = vector.broadcast %cst_49 : f32 to vector<8x128xf32>
    %163 = arith.addf %162, %161 : vector<8x128xf32>
    %164 = arith.divf %162, %163 : vector<8x128xf32>
    %165 = vector.extract_strided_slice %152 {offsets = [0, 256], sizes = [8, 128], strides = [1, 1]} : vector<8x512xf32> to vector<8x128xf32>
    %166 = math.tanh %165 : vector<8x128xf32>
    %167 = vector.extract_strided_slice %152 {offsets = [0, 384], sizes = [8, 128], strides = [1, 1]} : vector<8x512xf32> to vector<8x128xf32>
    %168 = arith.negf %167 : vector<8x128xf32>
    %169 = math.exp %168 : vector<8x128xf32>
    %cst_50 = arith.constant 1.000000e+00 : f32
    %170 = vector.broadcast %cst_50 : f32 to vector<8x128xf32>
    %171 = arith.addf %170, %169 : vector<8x128xf32>
    %172 = arith.divf %170, %171 : vector<8x128xf32>
    %173 = arith.mulf %164, %141 : vector<8x128xf32>
    %174 = arith.mulf %158, %166 : vector<8x128xf32>
    %175 = arith.addf %173, %174 : vector<8x128xf32>
    %176 = math.tanh %175 : vector<8x128xf32>
    %177 = arith.mulf %172, %176 : vector<8x128xf32>
    %178 = arith.index_cast %c4_i32 : i32 to index
    %c0_51 = arith.constant 0 : index
    %c0_52 = arith.constant 0 : index
    %179 = vector.load %arg9[%178, %c0_51, %c0_52] : memref<16x8x128xf32, #tpu.memory_space<vmem>>, vector<1x8x128xf32>
    %180 = vector.shape_cast %179 : vector<1x8x128xf32> to vector<8x128xf32>
    %181 = vector.shape_cast %177 : vector<8x128xf32> to vector<1x8x128xf32>
    tpu.vector_store %arg9[%178, %c0_51, %c0_52], %181 {strides = array<i32>} : memref<16x8x128xf32, #tpu.memory_space<vmem>>, vector<1x8x128xf32>,
    %c5_i32 = arith.constant 5 : i32
    %182 = arith.index_cast %c5_i32 : i32 to index
    %c0_53 = arith.constant 0 : index
    %c0_54 = arith.constant 0 : index
    %183 = vector.load %arg8[%182, %c0_53, %c0_54] : memref<16x8x512xf32, #tpu.memory_space<vmem>>, vector<1x8x512xf32>
    %184 = vector.shape_cast %183 : vector<1x8x512xf32> to vector<8x512xf32>
    %cst_55 = arith.constant dense<0.000000e+00> : vector<8x512xf32>
    %185 = tpu.matmul %177, %9, %cst_55 {dimension_numbers = #tpu.dot_dimension_numbers<[1], [0], [0], [1], [0, 0, 1, 1], [], []>} : vector<8x128xf32>, vector<128x512xf32>, vector<8x512xf32> -> vector<8x512xf32>
    %186 = arith.addf %184, %185 : vector<8x512xf32>
    %187 = vector.extract_strided_slice %186 {offsets = [0, 0], sizes = [8, 128], strides = [1, 1]} : vector<8x512xf32> to vector<8x128xf32>
    %188 = arith.negf %187 : vector<8x128xf32>
    %189 = math.exp %188 : vector<8x128xf32>
    %cst_56 = arith.constant 1.000000e+00 : f32
    %190 = vector.broadcast %cst_56 : f32 to vector<8x128xf32>
    %191 = arith.addf %190, %189 : vector<8x128xf32>
    %192 = arith.divf %190, %191 : vector<8x128xf32>
    %193 = vector.extract_strided_slice %186 {offsets = [0, 128], sizes = [8, 128], strides = [1, 1]} : vector<8x512xf32> to vector<8x128xf32>
    %194 = arith.negf %193 : vector<8x128xf32>
    %195 = math.exp %194 : vector<8x128xf32>
    %cst_57 = arith.constant 1.000000e+00 : f32
    %196 = vector.broadcast %cst_57 : f32 to vector<8x128xf32>
    %197 = arith.addf %196, %195 : vector<8x128xf32>
    %198 = arith.divf %196, %197 : vector<8x128xf32>
    %199 = vector.extract_strided_slice %186 {offsets = [0, 256], sizes = [8, 128], strides = [1, 1]} : vector<8x512xf32> to vector<8x128xf32>
    %200 = math.tanh %199 : vector<8x128xf32>
    %201 = vector.extract_strided_slice %186 {offsets = [0, 384], sizes = [8, 128], strides = [1, 1]} : vector<8x512xf32> to vector<8x128xf32>
    %202 = arith.negf %201 : vector<8x128xf32>
    %203 = math.exp %202 : vector<8x128xf32>
    %cst_58 = arith.constant 1.000000e+00 : f32
    %204 = vector.broadcast %cst_58 : f32 to vector<8x128xf32>
    %205 = arith.addf %204, %203 : vector<8x128xf32>
    %206 = arith.divf %204, %205 : vector<8x128xf32>
    %207 = arith.mulf %198, %175 : vector<8x128xf32>
    %208 = arith.mulf %192, %200 : vector<8x128xf32>
    %209 = arith.addf %207, %208 : vector<8x128xf32>
    %210 = math.tanh %209 : vector<8x128xf32>
    %211 = arith.mulf %206, %210 : vector<8x128xf32>
    %212 = arith.index_cast %c5_i32 : i32 to index
    %c0_59 = arith.constant 0 : index
    %c0_60 = arith.constant 0 : index
    %213 = vector.load %arg9[%212, %c0_59, %c0_60] : memref<16x8x128xf32, #tpu.memory_space<vmem>>, vector<1x8x128xf32>
    %214 = vector.shape_cast %213 : vector<1x8x128xf32> to vector<8x128xf32>
    %215 = vector.shape_cast %211 : vector<8x128xf32> to vector<1x8x128xf32>
    tpu.vector_store %arg9[%212, %c0_59, %c0_60], %215 {strides = array<i32>} : memref<16x8x128xf32, #tpu.memory_space<vmem>>, vector<1x8x128xf32>,
    %c6_i32 = arith.constant 6 : i32
    %216 = arith.index_cast %c6_i32 : i32 to index
    %c0_61 = arith.constant 0 : index
    %c0_62 = arith.constant 0 : index
    %217 = vector.load %arg8[%216, %c0_61, %c0_62] : memref<16x8x512xf32, #tpu.memory_space<vmem>>, vector<1x8x512xf32>
    %218 = vector.shape_cast %217 : vector<1x8x512xf32> to vector<8x512xf32>
    %cst_63 = arith.constant dense<0.000000e+00> : vector<8x512xf32>
    %219 = tpu.matmul %211, %9, %cst_63 {dimension_numbers = #tpu.dot_dimension_numbers<[1], [0], [0], [1], [0, 0, 1, 1], [], []>} : vector<8x128xf32>, vector<128x512xf32>, vector<8x512xf32> -> vector<8x512xf32>
    %220 = arith.addf %218, %219 : vector<8x512xf32>
    %221 = vector.extract_strided_slice %220 {offsets = [0, 0], sizes = [8, 128], strides = [1, 1]} : vector<8x512xf32> to vector<8x128xf32>
    %222 = arith.negf %221 : vector<8x128xf32>
    %223 = math.exp %222 : vector<8x128xf32>
    %cst_64 = arith.constant 1.000000e+00 : f32
    %224 = vector.broadcast %cst_64 : f32 to vector<8x128xf32>
    %225 = arith.addf %224, %223 : vector<8x128xf32>
    %226 = arith.divf %224, %225 : vector<8x128xf32>
    %227 = vector.extract_strided_slice %220 {offsets = [0, 128], sizes = [8, 128], strides = [1, 1]} : vector<8x512xf32> to vector<8x128xf32>
    %228 = arith.negf %227 : vector<8x128xf32>
    %229 = math.exp %228 : vector<8x128xf32>
    %cst_65 = arith.constant 1.000000e+00 : f32
    %230 = vector.broadcast %cst_65 : f32 to vector<8x128xf32>
    %231 = arith.addf %230, %229 : vector<8x128xf32>
    %232 = arith.divf %230, %231 : vector<8x128xf32>
    %233 = vector.extract_strided_slice %220 {offsets = [0, 256], sizes = [8, 128], strides = [1, 1]} : vector<8x512xf32> to vector<8x128xf32>
    %234 = math.tanh %233 : vector<8x128xf32>
    %235 = vector.extract_strided_slice %220 {offsets = [0, 384], sizes = [8, 128], strides = [1, 1]} : vector<8x512xf32> to vector<8x128xf32>
    %236 = arith.negf %235 : vector<8x128xf32>
    %237 = math.exp %236 : vector<8x128xf32>
    %cst_66 = arith.constant 1.000000e+00 : f32
    %238 = vector.broadcast %cst_66 : f32 to vector<8x128xf32>
    %239 = arith.addf %238, %237 : vector<8x128xf32>
    %240 = arith.divf %238, %239 : vector<8x128xf32>
    %241 = arith.mulf %232, %209 : vector<8x128xf32>
    %242 = arith.mulf %226, %234 : vector<8x128xf32>
    %243 = arith.addf %241, %242 : vector<8x128xf32>
    %244 = math.tanh %243 : vector<8x128xf32>
    %245 = arith.mulf %240, %244 : vector<8x128xf32>
    %246 = arith.index_cast %c6_i32 : i32 to index
    %c0_67 = arith.constant 0 : index
    %c0_68 = arith.constant 0 : index
    %247 = vector.load %arg9[%246, %c0_67, %c0_68] : memref<16x8x128xf32, #tpu.memory_space<vmem>>, vector<1x8x128xf32>
    %248 = vector.shape_cast %247 : vector<1x8x128xf32> to vector<8x128xf32>
    %249 = vector.shape_cast %245 : vector<8x128xf32> to vector<1x8x128xf32>
    tpu.vector_store %arg9[%246, %c0_67, %c0_68], %249 {strides = array<i32>} : memref<16x8x128xf32, #tpu.memory_space<vmem>>, vector<1x8x128xf32>,
    %c7_i32 = arith.constant 7 : i32
    %250 = arith.index_cast %c7_i32 : i32 to index
    %c0_69 = arith.constant 0 : index
    %c0_70 = arith.constant 0 : index
    %251 = vector.load %arg8[%250, %c0_69, %c0_70] : memref<16x8x512xf32, #tpu.memory_space<vmem>>, vector<1x8x512xf32>
    %252 = vector.shape_cast %251 : vector<1x8x512xf32> to vector<8x512xf32>
    %cst_71 = arith.constant dense<0.000000e+00> : vector<8x512xf32>
    %253 = tpu.matmul %245, %9, %cst_71 {dimension_numbers = #tpu.dot_dimension_numbers<[1], [0], [0], [1], [0, 0, 1, 1], [], []>} : vector<8x128xf32>, vector<128x512xf32>, vector<8x512xf32> -> vector<8x512xf32>
    %254 = arith.addf %252, %253 : vector<8x512xf32>
    %255 = vector.extract_strided_slice %254 {offsets = [0, 0], sizes = [8, 128], strides = [1, 1]} : vector<8x512xf32> to vector<8x128xf32>
    %256 = arith.negf %255 : vector<8x128xf32>
    %257 = math.exp %256 : vector<8x128xf32>
    %cst_72 = arith.constant 1.000000e+00 : f32
    %258 = vector.broadcast %cst_72 : f32 to vector<8x128xf32>
    %259 = arith.addf %258, %257 : vector<8x128xf32>
    %260 = arith.divf %258, %259 : vector<8x128xf32>
    %261 = vector.extract_strided_slice %254 {offsets = [0, 128], sizes = [8, 128], strides = [1, 1]} : vector<8x512xf32> to vector<8x128xf32>
    %262 = arith.negf %261 : vector<8x128xf32>
    %263 = math.exp %262 : vector<8x128xf32>
    %cst_73 = arith.constant 1.000000e+00 : f32
    %264 = vector.broadcast %cst_73 : f32 to vector<8x128xf32>
    %265 = arith.addf %264, %263 : vector<8x128xf32>
    %266 = arith.divf %264, %265 : vector<8x128xf32>
    %267 = vector.extract_strided_slice %254 {offsets = [0, 256], sizes = [8, 128], strides = [1, 1]} : vector<8x512xf32> to vector<8x128xf32>
    %268 = math.tanh %267 : vector<8x128xf32>
    %269 = vector.extract_strided_slice %254 {offsets = [0, 384], sizes = [8, 128], strides = [1, 1]} : vector<8x512xf32> to vector<8x128xf32>
    %270 = arith.negf %269 : vector<8x128xf32>
    %271 = math.exp %270 : vector<8x128xf32>
    %cst_74 = arith.constant 1.000000e+00 : f32
    %272 = vector.broadcast %cst_74 : f32 to vector<8x128xf32>
    %273 = arith.addf %272, %271 : vector<8x128xf32>
    %274 = arith.divf %272, %273 : vector<8x128xf32>
    %275 = arith.mulf %266, %243 : vector<8x128xf32>
    %276 = arith.mulf %260, %268 : vector<8x128xf32>
    %277 = arith.addf %275, %276 : vector<8x128xf32>
    %278 = math.tanh %277 : vector<8x128xf32>
    %279 = arith.mulf %274, %278 : vector<8x128xf32>
    %280 = arith.index_cast %c7_i32 : i32 to index
    %c0_75 = arith.constant 0 : index
    %c0_76 = arith.constant 0 : index
    %281 = vector.load %arg9[%280, %c0_75, %c0_76] : memref<16x8x128xf32, #tpu.memory_space<vmem>>, vector<1x8x128xf32>
    %282 = vector.shape_cast %281 : vector<1x8x128xf32> to vector<8x128xf32>
    %283 = vector.shape_cast %279 : vector<8x128xf32> to vector<1x8x128xf32>
    tpu.vector_store %arg9[%280, %c0_75, %c0_76], %283 {strides = array<i32>} : memref<16x8x128xf32, #tpu.memory_space<vmem>>, vector<1x8x128xf32>,
    %c8_i32 = arith.constant 8 : i32
    %284 = arith.index_cast %c8_i32 : i32 to index
    %c0_77 = arith.constant 0 : index
    %c0_78 = arith.constant 0 : index
    %285 = vector.load %arg8[%284, %c0_77, %c0_78] : memref<16x8x512xf32, #tpu.memory_space<vmem>>, vector<1x8x512xf32>
    %286 = vector.shape_cast %285 : vector<1x8x512xf32> to vector<8x512xf32>
    %cst_79 = arith.constant dense<0.000000e+00> : vector<8x512xf32>
    %287 = tpu.matmul %279, %9, %cst_79 {dimension_numbers = #tpu.dot_dimension_numbers<[1], [0], [0], [1], [0, 0, 1, 1], [], []>} : vector<8x128xf32>, vector<128x512xf32>, vector<8x512xf32> -> vector<8x512xf32>
    %288 = arith.addf %286, %287 : vector<8x512xf32>
    %289 = vector.extract_strided_slice %288 {offsets = [0, 0], sizes = [8, 128], strides = [1, 1]} : vector<8x512xf32> to vector<8x128xf32>
    %290 = arith.negf %289 : vector<8x128xf32>
    %291 = math.exp %290 : vector<8x128xf32>
    %cst_80 = arith.constant 1.000000e+00 : f32
    %292 = vector.broadcast %cst_80 : f32 to vector<8x128xf32>
    %293 = arith.addf %292, %291 : vector<8x128xf32>
    %294 = arith.divf %292, %293 : vector<8x128xf32>
    %295 = vector.extract_strided_slice %288 {offsets = [0, 128], sizes = [8, 128], strides = [1, 1]} : vector<8x512xf32> to vector<8x128xf32>
    %296 = arith.negf %295 : vector<8x128xf32>
    %297 = math.exp %296 : vector<8x128xf32>
    %cst_81 = arith.constant 1.000000e+00 : f32
    %298 = vector.broadcast %cst_81 : f32 to vector<8x128xf32>
    %299 = arith.addf %298, %297 : vector<8x128xf32>
    %300 = arith.divf %298, %299 : vector<8x128xf32>
    %301 = vector.extract_strided_slice %288 {offsets = [0, 256], sizes = [8, 128], strides = [1, 1]} : vector<8x512xf32> to vector<8x128xf32>
    %302 = math.tanh %301 : vector<8x128xf32>
    %303 = vector.extract_strided_slice %288 {offsets = [0, 384], sizes = [8, 128], strides = [1, 1]} : vector<8x512xf32> to vector<8x128xf32>
    %304 = arith.negf %303 : vector<8x128xf32>
    %305 = math.exp %304 : vector<8x128xf32>
    %cst_82 = arith.constant 1.000000e+00 : f32
    %306 = vector.broadcast %cst_82 : f32 to vector<8x128xf32>
    %307 = arith.addf %306, %305 : vector<8x128xf32>
    %308 = arith.divf %306, %307 : vector<8x128xf32>
    %309 = arith.mulf %300, %277 : vector<8x128xf32>
    %310 = arith.mulf %294, %302 : vector<8x128xf32>
    %311 = arith.addf %309, %310 : vector<8x128xf32>
    %312 = math.tanh %311 : vector<8x128xf32>
    %313 = arith.mulf %308, %312 : vector<8x128xf32>
    %314 = arith.index_cast %c8_i32 : i32 to index
    %c0_83 = arith.constant 0 : index
    %c0_84 = arith.constant 0 : index
    %315 = vector.load %arg9[%314, %c0_83, %c0_84] : memref<16x8x128xf32, #tpu.memory_space<vmem>>, vector<1x8x128xf32>
    %316 = vector.shape_cast %315 : vector<1x8x128xf32> to vector<8x128xf32>
    %317 = vector.shape_cast %313 : vector<8x128xf32> to vector<1x8x128xf32>
    tpu.vector_store %arg9[%314, %c0_83, %c0_84], %317 {strides = array<i32>} : memref<16x8x128xf32, #tpu.memory_space<vmem>>, vector<1x8x128xf32>,
    %c9_i32 = arith.constant 9 : i32
    %318 = arith.index_cast %c9_i32 : i32 to index
    %c0_85 = arith.constant 0 : index
    %c0_86 = arith.constant 0 : index
    %319 = vector.load %arg8[%318, %c0_85, %c0_86] : memref<16x8x512xf32, #tpu.memory_space<vmem>>, vector<1x8x512xf32>
    %320 = vector.shape_cast %319 : vector<1x8x512xf32> to vector<8x512xf32>
    %cst_87 = arith.constant dense<0.000000e+00> : vector<8x512xf32>
    %321 = tpu.matmul %313, %9, %cst_87 {dimension_numbers = #tpu.dot_dimension_numbers<[1], [0], [0], [1], [0, 0, 1, 1], [], []>} : vector<8x128xf32>, vector<128x512xf32>, vector<8x512xf32> -> vector<8x512xf32>
    %322 = arith.addf %320, %321 : vector<8x512xf32>
    %323 = vector.extract_strided_slice %322 {offsets = [0, 0], sizes = [8, 128], strides = [1, 1]} : vector<8x512xf32> to vector<8x128xf32>
    %324 = arith.negf %323 : vector<8x128xf32>
    %325 = math.exp %324 : vector<8x128xf32>
    %cst_88 = arith.constant 1.000000e+00 : f32
    %326 = vector.broadcast %cst_88 : f32 to vector<8x128xf32>
    %327 = arith.addf %326, %325 : vector<8x128xf32>
    %328 = arith.divf %326, %327 : vector<8x128xf32>
    %329 = vector.extract_strided_slice %322 {offsets = [0, 128], sizes = [8, 128], strides = [1, 1]} : vector<8x512xf32> to vector<8x128xf32>
    %330 = arith.negf %329 : vector<8x128xf32>
    %331 = math.exp %330 : vector<8x128xf32>
    %cst_89 = arith.constant 1.000000e+00 : f32
    %332 = vector.broadcast %cst_89 : f32 to vector<8x128xf32>
    %333 = arith.addf %332, %331 : vector<8x128xf32>
    %334 = arith.divf %332, %333 : vector<8x128xf32>
    %335 = vector.extract_strided_slice %322 {offsets = [0, 256], sizes = [8, 128], strides = [1, 1]} : vector<8x512xf32> to vector<8x128xf32>
    %336 = math.tanh %335 : vector<8x128xf32>
    %337 = vector.extract_strided_slice %322 {offsets = [0, 384], sizes = [8, 128], strides = [1, 1]} : vector<8x512xf32> to vector<8x128xf32>
    %338 = arith.negf %337 : vector<8x128xf32>
    %339 = math.exp %338 : vector<8x128xf32>
    %cst_90 = arith.constant 1.000000e+00 : f32
    %340 = vector.broadcast %cst_90 : f32 to vector<8x128xf32>
    %341 = arith.addf %340, %339 : vector<8x128xf32>
    %342 = arith.divf %340, %341 : vector<8x128xf32>
    %343 = arith.mulf %334, %311 : vector<8x128xf32>
    %344 = arith.mulf %328, %336 : vector<8x128xf32>
    %345 = arith.addf %343, %344 : vector<8x128xf32>
    %346 = math.tanh %345 : vector<8x128xf32>
    %347 = arith.mulf %342, %346 : vector<8x128xf32>
    %348 = arith.index_cast %c9_i32 : i32 to index
    %c0_91 = arith.constant 0 : index
    %c0_92 = arith.constant 0 : index
    %349 = vector.load %arg9[%348, %c0_91, %c0_92] : memref<16x8x128xf32, #tpu.memory_space<vmem>>, vector<1x8x128xf32>
    %350 = vector.shape_cast %349 : vector<1x8x128xf32> to vector<8x128xf32>
    %351 = vector.shape_cast %347 : vector<8x128xf32> to vector<1x8x128xf32>
    tpu.vector_store %arg9[%348, %c0_91, %c0_92], %351 {strides = array<i32>} : memref<16x8x128xf32, #tpu.memory_space<vmem>>, vector<1x8x128xf32>,
    %c10_i32 = arith.constant 10 : i32
    %352 = arith.index_cast %c10_i32 : i32 to index
    %c0_93 = arith.constant 0 : index
    %c0_94 = arith.constant 0 : index
    %353 = vector.load %arg8[%352, %c0_93, %c0_94] : memref<16x8x512xf32, #tpu.memory_space<vmem>>, vector<1x8x512xf32>
    %354 = vector.shape_cast %353 : vector<1x8x512xf32> to vector<8x512xf32>
    %cst_95 = arith.constant dense<0.000000e+00> : vector<8x512xf32>
    %355 = tpu.matmul %347, %9, %cst_95 {dimension_numbers = #tpu.dot_dimension_numbers<[1], [0], [0], [1], [0, 0, 1, 1], [], []>} : vector<8x128xf32>, vector<128x512xf32>, vector<8x512xf32> -> vector<8x512xf32>
    %356 = arith.addf %354, %355 : vector<8x512xf32>
    %357 = vector.extract_strided_slice %356 {offsets = [0, 0], sizes = [8, 128], strides = [1, 1]} : vector<8x512xf32> to vector<8x128xf32>
    %358 = arith.negf %357 : vector<8x128xf32>
    %359 = math.exp %358 : vector<8x128xf32>
    %cst_96 = arith.constant 1.000000e+00 : f32
    %360 = vector.broadcast %cst_96 : f32 to vector<8x128xf32>
    %361 = arith.addf %360, %359 : vector<8x128xf32>
    %362 = arith.divf %360, %361 : vector<8x128xf32>
    %363 = vector.extract_strided_slice %356 {offsets = [0, 128], sizes = [8, 128], strides = [1, 1]} : vector<8x512xf32> to vector<8x128xf32>
    %364 = arith.negf %363 : vector<8x128xf32>
    %365 = math.exp %364 : vector<8x128xf32>
    %cst_97 = arith.constant 1.000000e+00 : f32
    %366 = vector.broadcast %cst_97 : f32 to vector<8x128xf32>
    %367 = arith.addf %366, %365 : vector<8x128xf32>
    %368 = arith.divf %366, %367 : vector<8x128xf32>
    %369 = vector.extract_strided_slice %356 {offsets = [0, 256], sizes = [8, 128], strides = [1, 1]} : vector<8x512xf32> to vector<8x128xf32>
    %370 = math.tanh %369 : vector<8x128xf32>
    %371 = vector.extract_strided_slice %356 {offsets = [0, 384], sizes = [8, 128], strides = [1, 1]} : vector<8x512xf32> to vector<8x128xf32>
    %372 = arith.negf %371 : vector<8x128xf32>
    %373 = math.exp %372 : vector<8x128xf32>
    %cst_98 = arith.constant 1.000000e+00 : f32
    %374 = vector.broadcast %cst_98 : f32 to vector<8x128xf32>
    %375 = arith.addf %374, %373 : vector<8x128xf32>
    %376 = arith.divf %374, %375 : vector<8x128xf32>
    %377 = arith.mulf %368, %345 : vector<8x128xf32>
    %378 = arith.mulf %362, %370 : vector<8x128xf32>
    %379 = arith.addf %377, %378 : vector<8x128xf32>
    %380 = math.tanh %379 : vector<8x128xf32>
    %381 = arith.mulf %376, %380 : vector<8x128xf32>
    %382 = arith.index_cast %c10_i32 : i32 to index
    %c0_99 = arith.constant 0 : index
    %c0_100 = arith.constant 0 : index
    %383 = vector.load %arg9[%382, %c0_99, %c0_100] : memref<16x8x128xf32, #tpu.memory_space<vmem>>, vector<1x8x128xf32>
    %384 = vector.shape_cast %383 : vector<1x8x128xf32> to vector<8x128xf32>
    %385 = vector.shape_cast %381 : vector<8x128xf32> to vector<1x8x128xf32>
    tpu.vector_store %arg9[%382, %c0_99, %c0_100], %385 {strides = array<i32>} : memref<16x8x128xf32, #tpu.memory_space<vmem>>, vector<1x8x128xf32>,
    %c11_i32 = arith.constant 11 : i32
    %386 = arith.index_cast %c11_i32 : i32 to index
    %c0_101 = arith.constant 0 : index
    %c0_102 = arith.constant 0 : index
    %387 = vector.load %arg8[%386, %c0_101, %c0_102] : memref<16x8x512xf32, #tpu.memory_space<vmem>>, vector<1x8x512xf32>
    %388 = vector.shape_cast %387 : vector<1x8x512xf32> to vector<8x512xf32>
    %cst_103 = arith.constant dense<0.000000e+00> : vector<8x512xf32>
    %389 = tpu.matmul %381, %9, %cst_103 {dimension_numbers = #tpu.dot_dimension_numbers<[1], [0], [0], [1], [0, 0, 1, 1], [], []>} : vector<8x128xf32>, vector<128x512xf32>, vector<8x512xf32> -> vector<8x512xf32>
    %390 = arith.addf %388, %389 : vector<8x512xf32>
    %391 = vector.extract_strided_slice %390 {offsets = [0, 0], sizes = [8, 128], strides = [1, 1]} : vector<8x512xf32> to vector<8x128xf32>
    %392 = arith.negf %391 : vector<8x128xf32>
    %393 = math.exp %392 : vector<8x128xf32>
    %cst_104 = arith.constant 1.000000e+00 : f32
    %394 = vector.broadcast %cst_104 : f32 to vector<8x128xf32>
    %395 = arith.addf %394, %393 : vector<8x128xf32>
    %396 = arith.divf %394, %395 : vector<8x128xf32>
    %397 = vector.extract_strided_slice %390 {offsets = [0, 128], sizes = [8, 128], strides = [1, 1]} : vector<8x512xf32> to vector<8x128xf32>
    %398 = arith.negf %397 : vector<8x128xf32>
    %399 = math.exp %398 : vector<8x128xf32>
    %cst_105 = arith.constant 1.000000e+00 : f32
    %400 = vector.broadcast %cst_105 : f32 to vector<8x128xf32>
    %401 = arith.addf %400, %399 : vector<8x128xf32>
    %402 = arith.divf %400, %401 : vector<8x128xf32>
    %403 = vector.extract_strided_slice %390 {offsets = [0, 256], sizes = [8, 128], strides = [1, 1]} : vector<8x512xf32> to vector<8x128xf32>
    %404 = math.tanh %403 : vector<8x128xf32>
    %405 = vector.extract_strided_slice %390 {offsets = [0, 384], sizes = [8, 128], strides = [1, 1]} : vector<8x512xf32> to vector<8x128xf32>
    %406 = arith.negf %405 : vector<8x128xf32>
    %407 = math.exp %406 : vector<8x128xf32>
    %cst_106 = arith.constant 1.000000e+00 : f32
    %408 = vector.broadcast %cst_106 : f32 to vector<8x128xf32>
    %409 = arith.addf %408, %407 : vector<8x128xf32>
    %410 = arith.divf %408, %409 : vector<8x128xf32>
    %411 = arith.mulf %402, %379 : vector<8x128xf32>
    %412 = arith.mulf %396, %404 : vector<8x128xf32>
    %413 = arith.addf %411, %412 : vector<8x128xf32>
    %414 = math.tanh %413 : vector<8x128xf32>
    %415 = arith.mulf %410, %414 : vector<8x128xf32>
    %416 = arith.index_cast %c11_i32 : i32 to index
    %c0_107 = arith.constant 0 : index
    %c0_108 = arith.constant 0 : index
    %417 = vector.load %arg9[%416, %c0_107, %c0_108] : memref<16x8x128xf32, #tpu.memory_space<vmem>>, vector<1x8x128xf32>
    %418 = vector.shape_cast %417 : vector<1x8x128xf32> to vector<8x128xf32>
    %419 = vector.shape_cast %415 : vector<8x128xf32> to vector<1x8x128xf32>
    tpu.vector_store %arg9[%416, %c0_107, %c0_108], %419 {strides = array<i32>} : memref<16x8x128xf32, #tpu.memory_space<vmem>>, vector<1x8x128xf32>,
    %c12_i32 = arith.constant 12 : i32
    %420 = arith.index_cast %c12_i32 : i32 to index
    %c0_109 = arith.constant 0 : index
    %c0_110 = arith.constant 0 : index
    %421 = vector.load %arg8[%420, %c0_109, %c0_110] : memref<16x8x512xf32, #tpu.memory_space<vmem>>, vector<1x8x512xf32>
    %422 = vector.shape_cast %421 : vector<1x8x512xf32> to vector<8x512xf32>
    %cst_111 = arith.constant dense<0.000000e+00> : vector<8x512xf32>
    %423 = tpu.matmul %415, %9, %cst_111 {dimension_numbers = #tpu.dot_dimension_numbers<[1], [0], [0], [1], [0, 0, 1, 1], [], []>} : vector<8x128xf32>, vector<128x512xf32>, vector<8x512xf32> -> vector<8x512xf32>
    %424 = arith.addf %422, %423 : vector<8x512xf32>
    %425 = vector.extract_strided_slice %424 {offsets = [0, 0], sizes = [8, 128], strides = [1, 1]} : vector<8x512xf32> to vector<8x128xf32>
    %426 = arith.negf %425 : vector<8x128xf32>
    %427 = math.exp %426 : vector<8x128xf32>
    %cst_112 = arith.constant 1.000000e+00 : f32
    %428 = vector.broadcast %cst_112 : f32 to vector<8x128xf32>
    %429 = arith.addf %428, %427 : vector<8x128xf32>
    %430 = arith.divf %428, %429 : vector<8x128xf32>
    %431 = vector.extract_strided_slice %424 {offsets = [0, 128], sizes = [8, 128], strides = [1, 1]} : vector<8x512xf32> to vector<8x128xf32>
    %432 = arith.negf %431 : vector<8x128xf32>
    %433 = math.exp %432 : vector<8x128xf32>
    %cst_113 = arith.constant 1.000000e+00 : f32
    %434 = vector.broadcast %cst_113 : f32 to vector<8x128xf32>
    %435 = arith.addf %434, %433 : vector<8x128xf32>
    %436 = arith.divf %434, %435 : vector<8x128xf32>
    %437 = vector.extract_strided_slice %424 {offsets = [0, 256], sizes = [8, 128], strides = [1, 1]} : vector<8x512xf32> to vector<8x128xf32>
    %438 = math.tanh %437 : vector<8x128xf32>
    %439 = vector.extract_strided_slice %424 {offsets = [0, 384], sizes = [8, 128], strides = [1, 1]} : vector<8x512xf32> to vector<8x128xf32>
    %440 = arith.negf %439 : vector<8x128xf32>
    %441 = math.exp %440 : vector<8x128xf32>
    %cst_114 = arith.constant 1.000000e+00 : f32
    %442 = vector.broadcast %cst_114 : f32 to vector<8x128xf32>
    %443 = arith.addf %442, %441 : vector<8x128xf32>
    %444 = arith.divf %442, %443 : vector<8x128xf32>
    %445 = arith.mulf %436, %413 : vector<8x128xf32>
    %446 = arith.mulf %430, %438 : vector<8x128xf32>
    %447 = arith.addf %445, %446 : vector<8x128xf32>
    %448 = math.tanh %447 : vector<8x128xf32>
    %449 = arith.mulf %444, %448 : vector<8x128xf32>
    %450 = arith.index_cast %c12_i32 : i32 to index
    %c0_115 = arith.constant 0 : index
    %c0_116 = arith.constant 0 : index
    %451 = vector.load %arg9[%450, %c0_115, %c0_116] : memref<16x8x128xf32, #tpu.memory_space<vmem>>, vector<1x8x128xf32>
    %452 = vector.shape_cast %451 : vector<1x8x128xf32> to vector<8x128xf32>
    %453 = vector.shape_cast %449 : vector<8x128xf32> to vector<1x8x128xf32>
    tpu.vector_store %arg9[%450, %c0_115, %c0_116], %453 {strides = array<i32>} : memref<16x8x128xf32, #tpu.memory_space<vmem>>, vector<1x8x128xf32>,
    %c13_i32 = arith.constant 13 : i32
    %454 = arith.index_cast %c13_i32 : i32 to index
    %c0_117 = arith.constant 0 : index
    %c0_118 = arith.constant 0 : index
    %455 = vector.load %arg8[%454, %c0_117, %c0_118] : memref<16x8x512xf32, #tpu.memory_space<vmem>>, vector<1x8x512xf32>
    %456 = vector.shape_cast %455 : vector<1x8x512xf32> to vector<8x512xf32>
    %cst_119 = arith.constant dense<0.000000e+00> : vector<8x512xf32>
    %457 = tpu.matmul %449, %9, %cst_119 {dimension_numbers = #tpu.dot_dimension_numbers<[1], [0], [0], [1], [0, 0, 1, 1], [], []>} : vector<8x128xf32>, vector<128x512xf32>, vector<8x512xf32> -> vector<8x512xf32>
    %458 = arith.addf %456, %457 : vector<8x512xf32>
    %459 = vector.extract_strided_slice %458 {offsets = [0, 0], sizes = [8, 128], strides = [1, 1]} : vector<8x512xf32> to vector<8x128xf32>
    %460 = arith.negf %459 : vector<8x128xf32>
    %461 = math.exp %460 : vector<8x128xf32>
    %cst_120 = arith.constant 1.000000e+00 : f32
    %462 = vector.broadcast %cst_120 : f32 to vector<8x128xf32>
    %463 = arith.addf %462, %461 : vector<8x128xf32>
    %464 = arith.divf %462, %463 : vector<8x128xf32>
    %465 = vector.extract_strided_slice %458 {offsets = [0, 128], sizes = [8, 128], strides = [1, 1]} : vector<8x512xf32> to vector<8x128xf32>
    %466 = arith.negf %465 : vector<8x128xf32>
    %467 = math.exp %466 : vector<8x128xf32>
    %cst_121 = arith.constant 1.000000e+00 : f32
    %468 = vector.broadcast %cst_121 : f32 to vector<8x128xf32>
    %469 = arith.addf %468, %467 : vector<8x128xf32>
    %470 = arith.divf %468, %469 : vector<8x128xf32>
    %471 = vector.extract_strided_slice %458 {offsets = [0, 256], sizes = [8, 128], strides = [1, 1]} : vector<8x512xf32> to vector<8x128xf32>
    %472 = math.tanh %471 : vector<8x128xf32>
    %473 = vector.extract_strided_slice %458 {offsets = [0, 384], sizes = [8, 128], strides = [1, 1]} : vector<8x512xf32> to vector<8x128xf32>
    %474 = arith.negf %473 : vector<8x128xf32>
    %475 = math.exp %474 : vector<8x128xf32>
    %cst_122 = arith.constant 1.000000e+00 : f32
    %476 = vector.broadcast %cst_122 : f32 to vector<8x128xf32>
    %477 = arith.addf %476, %475 : vector<8x128xf32>
    %478 = arith.divf %476, %477 : vector<8x128xf32>
    %479 = arith.mulf %470, %447 : vector<8x128xf32>
    %480 = arith.mulf %464, %472 : vector<8x128xf32>
    %481 = arith.addf %479, %480 : vector<8x128xf32>
    %482 = math.tanh %481 : vector<8x128xf32>
    %483 = arith.mulf %478, %482 : vector<8x128xf32>
    %484 = arith.index_cast %c13_i32 : i32 to index
    %c0_123 = arith.constant 0 : index
    %c0_124 = arith.constant 0 : index
    %485 = vector.load %arg9[%484, %c0_123, %c0_124] : memref<16x8x128xf32, #tpu.memory_space<vmem>>, vector<1x8x128xf32>
    %486 = vector.shape_cast %485 : vector<1x8x128xf32> to vector<8x128xf32>
    %487 = vector.shape_cast %483 : vector<8x128xf32> to vector<1x8x128xf32>
    tpu.vector_store %arg9[%484, %c0_123, %c0_124], %487 {strides = array<i32>} : memref<16x8x128xf32, #tpu.memory_space<vmem>>, vector<1x8x128xf32>,
    %c14_i32 = arith.constant 14 : i32
    %488 = arith.index_cast %c14_i32 : i32 to index
    %c0_125 = arith.constant 0 : index
    %c0_126 = arith.constant 0 : index
    %489 = vector.load %arg8[%488, %c0_125, %c0_126] : memref<16x8x512xf32, #tpu.memory_space<vmem>>, vector<1x8x512xf32>
    %490 = vector.shape_cast %489 : vector<1x8x512xf32> to vector<8x512xf32>
    %cst_127 = arith.constant dense<0.000000e+00> : vector<8x512xf32>
    %491 = tpu.matmul %483, %9, %cst_127 {dimension_numbers = #tpu.dot_dimension_numbers<[1], [0], [0], [1], [0, 0, 1, 1], [], []>} : vector<8x128xf32>, vector<128x512xf32>, vector<8x512xf32> -> vector<8x512xf32>
    %492 = arith.addf %490, %491 : vector<8x512xf32>
    %493 = vector.extract_strided_slice %492 {offsets = [0, 0], sizes = [8, 128], strides = [1, 1]} : vector<8x512xf32> to vector<8x128xf32>
    %494 = arith.negf %493 : vector<8x128xf32>
    %495 = math.exp %494 : vector<8x128xf32>
    %cst_128 = arith.constant 1.000000e+00 : f32
    %496 = vector.broadcast %cst_128 : f32 to vector<8x128xf32>
    %497 = arith.addf %496, %495 : vector<8x128xf32>
    %498 = arith.divf %496, %497 : vector<8x128xf32>
    %499 = vector.extract_strided_slice %492 {offsets = [0, 128], sizes = [8, 128], strides = [1, 1]} : vector<8x512xf32> to vector<8x128xf32>
    %500 = arith.negf %499 : vector<8x128xf32>
    %501 = math.exp %500 : vector<8x128xf32>
    %cst_129 = arith.constant 1.000000e+00 : f32
    %502 = vector.broadcast %cst_129 : f32 to vector<8x128xf32>
    %503 = arith.addf %502, %501 : vector<8x128xf32>
    %504 = arith.divf %502, %503 : vector<8x128xf32>
    %505 = vector.extract_strided_slice %492 {offsets = [0, 256], sizes = [8, 128], strides = [1, 1]} : vector<8x512xf32> to vector<8x128xf32>
    %506 = math.tanh %505 : vector<8x128xf32>
    %507 = vector.extract_strided_slice %492 {offsets = [0, 384], sizes = [8, 128], strides = [1, 1]} : vector<8x512xf32> to vector<8x128xf32>
    %508 = arith.negf %507 : vector<8x128xf32>
    %509 = math.exp %508 : vector<8x128xf32>
    %cst_130 = arith.constant 1.000000e+00 : f32
    %510 = vector.broadcast %cst_130 : f32 to vector<8x128xf32>
    %511 = arith.addf %510, %509 : vector<8x128xf32>
    %512 = arith.divf %510, %511 : vector<8x128xf32>
    %513 = arith.mulf %504, %481 : vector<8x128xf32>
    %514 = arith.mulf %498, %506 : vector<8x128xf32>
    %515 = arith.addf %513, %514 : vector<8x128xf32>
    %516 = math.tanh %515 : vector<8x128xf32>
    %517 = arith.mulf %512, %516 : vector<8x128xf32>
    %518 = arith.index_cast %c14_i32 : i32 to index
    %c0_131 = arith.constant 0 : index
    %c0_132 = arith.constant 0 : index
    %519 = vector.load %arg9[%518, %c0_131, %c0_132] : memref<16x8x128xf32, #tpu.memory_space<vmem>>, vector<1x8x128xf32>
    %520 = vector.shape_cast %519 : vector<1x8x128xf32> to vector<8x128xf32>
    %521 = vector.shape_cast %517 : vector<8x128xf32> to vector<1x8x128xf32>
    tpu.vector_store %arg9[%518, %c0_131, %c0_132], %521 {strides = array<i32>} : memref<16x8x128xf32, #tpu.memory_space<vmem>>, vector<1x8x128xf32>,
    %c15_i32 = arith.constant 15 : i32
    %522 = arith.index_cast %c15_i32 : i32 to index
    %c0_133 = arith.constant 0 : index
    %c0_134 = arith.constant 0 : index
    %523 = vector.load %arg8[%522, %c0_133, %c0_134] : memref<16x8x512xf32, #tpu.memory_space<vmem>>, vector<1x8x512xf32>
    %524 = vector.shape_cast %523 : vector<1x8x512xf32> to vector<8x512xf32>
    %cst_135 = arith.constant dense<0.000000e+00> : vector<8x512xf32>
    %525 = tpu.matmul %517, %9, %cst_135 {dimension_numbers = #tpu.dot_dimension_numbers<[1], [0], [0], [1], [0, 0, 1, 1], [], []>} : vector<8x128xf32>, vector<128x512xf32>, vector<8x512xf32> -> vector<8x512xf32>
    %526 = arith.addf %524, %525 : vector<8x512xf32>
    %527 = vector.extract_strided_slice %526 {offsets = [0, 0], sizes = [8, 128], strides = [1, 1]} : vector<8x512xf32> to vector<8x128xf32>
    %528 = arith.negf %527 : vector<8x128xf32>
    %529 = math.exp %528 : vector<8x128xf32>
    %cst_136 = arith.constant 1.000000e+00 : f32
    %530 = vector.broadcast %cst_136 : f32 to vector<8x128xf32>
    %531 = arith.addf %530, %529 : vector<8x128xf32>
    %532 = arith.divf %530, %531 : vector<8x128xf32>
    %533 = vector.extract_strided_slice %526 {offsets = [0, 128], sizes = [8, 128], strides = [1, 1]} : vector<8x512xf32> to vector<8x128xf32>
    %534 = arith.negf %533 : vector<8x128xf32>
    %535 = math.exp %534 : vector<8x128xf32>
    %cst_137 = arith.constant 1.000000e+00 : f32
    %536 = vector.broadcast %cst_137 : f32 to vector<8x128xf32>
    %537 = arith.addf %536, %535 : vector<8x128xf32>
    %538 = arith.divf %536, %537 : vector<8x128xf32>
    %539 = vector.extract_strided_slice %526 {offsets = [0, 256], sizes = [8, 128], strides = [1, 1]} : vector<8x512xf32> to vector<8x128xf32>
    %540 = math.tanh %539 : vector<8x128xf32>
    %541 = vector.extract_strided_slice %526 {offsets = [0, 384], sizes = [8, 128], strides = [1, 1]} : vector<8x512xf32> to vector<8x128xf32>
    %542 = arith.negf %541 : vector<8x128xf32>
    %543 = math.exp %542 : vector<8x128xf32>
    %cst_138 = arith.constant 1.000000e+00 : f32
    %544 = vector.broadcast %cst_138 : f32 to vector<8x128xf32>
    %545 = arith.addf %544, %543 : vector<8x128xf32>
    %546 = arith.divf %544, %545 : vector<8x128xf32>
    %547 = arith.mulf %538, %515 : vector<8x128xf32>
    %548 = arith.mulf %532, %540 : vector<8x128xf32>
    %549 = arith.addf %547, %548 : vector<8x128xf32>
    %550 = math.tanh %549 : vector<8x128xf32>
    %551 = arith.mulf %546, %550 : vector<8x128xf32>
    %552 = arith.index_cast %c15_i32 : i32 to index
    %c0_139 = arith.constant 0 : index
    %c0_140 = arith.constant 0 : index
    %553 = vector.load %arg9[%552, %c0_139, %c0_140] : memref<16x8x128xf32, #tpu.memory_space<vmem>>, vector<1x8x128xf32>
    %554 = vector.shape_cast %553 : vector<1x8x128xf32> to vector<8x128xf32>
    %555 = vector.shape_cast %551 : vector<8x128xf32> to vector<1x8x128xf32>
    tpu.vector_store %arg9[%552, %c0_139, %c0_140], %555 {strides = array<i32>} : memref<16x8x128xf32, #tpu.memory_space<vmem>>, vector<1x8x128xf32>,
    %c16_i32 = arith.constant 16 : i32
    %c0_141 = arith.constant 0 : index
    %c0_142 = arith.constant 0 : index
    %c0_143 = arith.constant 0 : index
    %556 = vector.load %arg9[%c0_141, %c0_142, %c0_143] : memref<16x8x128xf32, #tpu.memory_space<vmem>>, vector<16x8x128xf32>
    %557 = vector.shape_cast %556 : vector<16x8x128xf32> to vector<128x128xf32>
    %c0_144 = arith.constant 0 : index
    %c0_145 = arith.constant 0 : index
    %558 = vector.load %arg5[%c0_144, %c0_145] : memref<128x256xf32, #tpu.memory_space<vmem>>, vector<128x256xf32>
    %cst_146 = arith.constant dense<0.000000e+00> : vector<128x256xf32>
    %559 = tpu.matmul %557, %558, %cst_146 {dimension_numbers = #tpu.dot_dimension_numbers<[1], [0], [0], [1], [0, 0, 1, 1], [], []>} : vector<128x128xf32>, vector<128x256xf32>, vector<128x256xf32> -> vector<128x256xf32>
    %c0_147 = arith.constant 0 : index
    %c0_148 = arith.constant 0 : index
    %560 = vector.load %arg6[%c0_147, %c0_148] : memref<1x256xf32, #tpu.memory_space<vmem>>, vector<1x256xf32>
    %561 = vector.broadcast %560 : vector<1x256xf32> to vector<128x256xf32>
    %562 = arith.addf %559, %561 : vector<128x256xf32>
    %563 = vector.shape_cast %562 : vector<128x256xf32> to vector<16x8x256xf32>
    %564 = vector.extract_strided_slice %563 {offsets = [0, 0, 0], sizes = [1, 8, 256], strides = [1, 1, 1]} : vector<16x8x256xf32> to vector<1x8x256xf32>
    %565 = vector.shape_cast %564 : vector<1x8x256xf32> to vector<8x256xf32>
    %c0_149 = arith.constant 0 : index
    %c0_150 = arith.constant 0 : index
    %c0_151 = arith.constant 0 : index
    %566 = vector.load %arg7[%c0_149, %c0_150, %c0_151] : memref<8x16x256xf32, #tpu.memory_space<vmem>>, vector<8x1x256xf32>
    %567 = vector.shape_cast %566 : vector<8x1x256xf32> to vector<8x256xf32>
    %568 = vector.shape_cast %565 : vector<8x256xf32> to vector<8x1x256xf32>
    tpu.vector_store %arg7[%c0_149, %c0_150, %c0_151], %568 {strides = array<i32>} : memref<8x16x256xf32, #tpu.memory_space<vmem>>, vector<8x1x256xf32>,
    %569 = vector.extract_strided_slice %563 {offsets = [1, 0, 0], sizes = [1, 8, 256], strides = [1, 1, 1]} : vector<16x8x256xf32> to vector<1x8x256xf32>
    %570 = vector.shape_cast %569 : vector<1x8x256xf32> to vector<8x256xf32>
    %c0_152 = arith.constant 0 : index
    %c1 = arith.constant 1 : index
    %c0_153 = arith.constant 0 : index
    %571 = vector.load %arg7[%c0_152, %c1, %c0_153] : memref<8x16x256xf32, #tpu.memory_space<vmem>>, vector<8x1x256xf32>
    %572 = vector.shape_cast %571 : vector<8x1x256xf32> to vector<8x256xf32>
    %573 = vector.shape_cast %570 : vector<8x256xf32> to vector<8x1x256xf32>
    tpu.vector_store %arg7[%c0_152, %c1, %c0_153], %573 {strides = array<i32>} : memref<8x16x256xf32, #tpu.memory_space<vmem>>, vector<8x1x256xf32>,
    %574 = vector.extract_strided_slice %563 {offsets = [2, 0, 0], sizes = [1, 8, 256], strides = [1, 1, 1]} : vector<16x8x256xf32> to vector<1x8x256xf32>
    %575 = vector.shape_cast %574 : vector<1x8x256xf32> to vector<8x256xf32>
    %c0_154 = arith.constant 0 : index
    %c2 = arith.constant 2 : index
    %c0_155 = arith.constant 0 : index
    %576 = vector.load %arg7[%c0_154, %c2, %c0_155] : memref<8x16x256xf32, #tpu.memory_space<vmem>>, vector<8x1x256xf32>
    %577 = vector.shape_cast %576 : vector<8x1x256xf32> to vector<8x256xf32>
    %578 = vector.shape_cast %575 : vector<8x256xf32> to vector<8x1x256xf32>
    tpu.vector_store %arg7[%c0_154, %c2, %c0_155], %578 {strides = array<i32>} : memref<8x16x256xf32, #tpu.memory_space<vmem>>, vector<8x1x256xf32>,
    %579 = vector.extract_strided_slice %563 {offsets = [3, 0, 0], sizes = [1, 8, 256], strides = [1, 1, 1]} : vector<16x8x256xf32> to vector<1x8x256xf32>
    %580 = vector.shape_cast %579 : vector<1x8x256xf32> to vector<8x256xf32>
    %c0_156 = arith.constant 0 : index
    %c3 = arith.constant 3 : index
    %c0_157 = arith.constant 0 : index
    %581 = vector.load %arg7[%c0_156, %c3, %c0_157] : memref<8x16x256xf32, #tpu.memory_space<vmem>>, vector<8x1x256xf32>
    %582 = vector.shape_cast %581 : vector<8x1x256xf32> to vector<8x256xf32>
    %583 = vector.shape_cast %580 : vector<8x256xf32> to vector<8x1x256xf32>
    tpu.vector_store %arg7[%c0_156, %c3, %c0_157], %583 {strides = array<i32>} : memref<8x16x256xf32, #tpu.memory_space<vmem>>, vector<8x1x256xf32>,
    %584 = vector.extract_strided_slice %563 {offsets = [4, 0, 0], sizes = [1, 8, 256], strides = [1, 1, 1]} : vector<16x8x256xf32> to vector<1x8x256xf32>
    %585 = vector.shape_cast %584 : vector<1x8x256xf32> to vector<8x256xf32>
    %c0_158 = arith.constant 0 : index
    %c4 = arith.constant 4 : index
    %c0_159 = arith.constant 0 : index
    %586 = vector.load %arg7[%c0_158, %c4, %c0_159] : memref<8x16x256xf32, #tpu.memory_space<vmem>>, vector<8x1x256xf32>
    %587 = vector.shape_cast %586 : vector<8x1x256xf32> to vector<8x256xf32>
    %588 = vector.shape_cast %585 : vector<8x256xf32> to vector<8x1x256xf32>
    tpu.vector_store %arg7[%c0_158, %c4, %c0_159], %588 {strides = array<i32>} : memref<8x16x256xf32, #tpu.memory_space<vmem>>, vector<8x1x256xf32>,
    %589 = vector.extract_strided_slice %563 {offsets = [5, 0, 0], sizes = [1, 8, 256], strides = [1, 1, 1]} : vector<16x8x256xf32> to vector<1x8x256xf32>
    %590 = vector.shape_cast %589 : vector<1x8x256xf32> to vector<8x256xf32>
    %c0_160 = arith.constant 0 : index
    %c5 = arith.constant 5 : index
    %c0_161 = arith.constant 0 : index
    %591 = vector.load %arg7[%c0_160, %c5, %c0_161] : memref<8x16x256xf32, #tpu.memory_space<vmem>>, vector<8x1x256xf32>
    %592 = vector.shape_cast %591 : vector<8x1x256xf32> to vector<8x256xf32>
    %593 = vector.shape_cast %590 : vector<8x256xf32> to vector<8x1x256xf32>
    tpu.vector_store %arg7[%c0_160, %c5, %c0_161], %593 {strides = array<i32>} : memref<8x16x256xf32, #tpu.memory_space<vmem>>, vector<8x1x256xf32>,
    %594 = vector.extract_strided_slice %563 {offsets = [6, 0, 0], sizes = [1, 8, 256], strides = [1, 1, 1]} : vector<16x8x256xf32> to vector<1x8x256xf32>
    %595 = vector.shape_cast %594 : vector<1x8x256xf32> to vector<8x256xf32>
    %c0_162 = arith.constant 0 : index
    %c6 = arith.constant 6 : index
    %c0_163 = arith.constant 0 : index
    %596 = vector.load %arg7[%c0_162, %c6, %c0_163] : memref<8x16x256xf32, #tpu.memory_space<vmem>>, vector<8x1x256xf32>
    %597 = vector.shape_cast %596 : vector<8x1x256xf32> to vector<8x256xf32>
    %598 = vector.shape_cast %595 : vector<8x256xf32> to vector<8x1x256xf32>
    tpu.vector_store %arg7[%c0_162, %c6, %c0_163], %598 {strides = array<i32>} : memref<8x16x256xf32, #tpu.memory_space<vmem>>, vector<8x1x256xf32>,
    %599 = vector.extract_strided_slice %563 {offsets = [7, 0, 0], sizes = [1, 8, 256], strides = [1, 1, 1]} : vector<16x8x256xf32> to vector<1x8x256xf32>
    %600 = vector.shape_cast %599 : vector<1x8x256xf32> to vector<8x256xf32>
    %c0_164 = arith.constant 0 : index
    %c7 = arith.constant 7 : index
    %c0_165 = arith.constant 0 : index
    %601 = vector.load %arg7[%c0_164, %c7, %c0_165] : memref<8x16x256xf32, #tpu.memory_space<vmem>>, vector<8x1x256xf32>
    %602 = vector.shape_cast %601 : vector<8x1x256xf32> to vector<8x256xf32>
    %603 = vector.shape_cast %600 : vector<8x256xf32> to vector<8x1x256xf32>
    tpu.vector_store %arg7[%c0_164, %c7, %c0_165], %603 {strides = array<i32>} : memref<8x16x256xf32, #tpu.memory_space<vmem>>, vector<8x1x256xf32>,
    %604 = vector.extract_strided_slice %563 {offsets = [8, 0, 0], sizes = [1, 8, 256], strides = [1, 1, 1]} : vector<16x8x256xf32> to vector<1x8x256xf32>
    %605 = vector.shape_cast %604 : vector<1x8x256xf32> to vector<8x256xf32>
    %c0_166 = arith.constant 0 : index
    %c8 = arith.constant 8 : index
    %c0_167 = arith.constant 0 : index
    %606 = vector.load %arg7[%c0_166, %c8, %c0_167] : memref<8x16x256xf32, #tpu.memory_space<vmem>>, vector<8x1x256xf32>
    %607 = vector.shape_cast %606 : vector<8x1x256xf32> to vector<8x256xf32>
    %608 = vector.shape_cast %605 : vector<8x256xf32> to vector<8x1x256xf32>
    tpu.vector_store %arg7[%c0_166, %c8, %c0_167], %608 {strides = array<i32>} : memref<8x16x256xf32, #tpu.memory_space<vmem>>, vector<8x1x256xf32>,
    %609 = vector.extract_strided_slice %563 {offsets = [9, 0, 0], sizes = [1, 8, 256], strides = [1, 1, 1]} : vector<16x8x256xf32> to vector<1x8x256xf32>
    %610 = vector.shape_cast %609 : vector<1x8x256xf32> to vector<8x256xf32>
    %c0_168 = arith.constant 0 : index
    %c9 = arith.constant 9 : index
    %c0_169 = arith.constant 0 : index
    %611 = vector.load %arg7[%c0_168, %c9, %c0_169] : memref<8x16x256xf32, #tpu.memory_space<vmem>>, vector<8x1x256xf32>
    %612 = vector.shape_cast %611 : vector<8x1x256xf32> to vector<8x256xf32>
    %613 = vector.shape_cast %610 : vector<8x256xf32> to vector<8x1x256xf32>
    tpu.vector_store %arg7[%c0_168, %c9, %c0_169], %613 {strides = array<i32>} : memref<8x16x256xf32, #tpu.memory_space<vmem>>, vector<8x1x256xf32>,
    %614 = vector.extract_strided_slice %563 {offsets = [10, 0, 0], sizes = [1, 8, 256], strides = [1, 1, 1]} : vector<16x8x256xf32> to vector<1x8x256xf32>
    %615 = vector.shape_cast %614 : vector<1x8x256xf32> to vector<8x256xf32>
    %c0_170 = arith.constant 0 : index
    %c10 = arith.constant 10 : index
    %c0_171 = arith.constant 0 : index
    %616 = vector.load %arg7[%c0_170, %c10, %c0_171] : memref<8x16x256xf32, #tpu.memory_space<vmem>>, vector<8x1x256xf32>
    %617 = vector.shape_cast %616 : vector<8x1x256xf32> to vector<8x256xf32>
    %618 = vector.shape_cast %615 : vector<8x256xf32> to vector<8x1x256xf32>
    tpu.vector_store %arg7[%c0_170, %c10, %c0_171], %618 {strides = array<i32>} : memref<8x16x256xf32, #tpu.memory_space<vmem>>, vector<8x1x256xf32>,
    %619 = vector.extract_strided_slice %563 {offsets = [11, 0, 0], sizes = [1, 8, 256], strides = [1, 1, 1]} : vector<16x8x256xf32> to vector<1x8x256xf32>
    %620 = vector.shape_cast %619 : vector<1x8x256xf32> to vector<8x256xf32>
    %c0_172 = arith.constant 0 : index
    %c11 = arith.constant 11 : index
    %c0_173 = arith.constant 0 : index
    %621 = vector.load %arg7[%c0_172, %c11, %c0_173] : memref<8x16x256xf32, #tpu.memory_space<vmem>>, vector<8x1x256xf32>
    %622 = vector.shape_cast %621 : vector<8x1x256xf32> to vector<8x256xf32>
    %623 = vector.shape_cast %620 : vector<8x256xf32> to vector<8x1x256xf32>
    tpu.vector_store %arg7[%c0_172, %c11, %c0_173], %623 {strides = array<i32>} : memref<8x16x256xf32, #tpu.memory_space<vmem>>, vector<8x1x256xf32>,
    %624 = vector.extract_strided_slice %563 {offsets = [12, 0, 0], sizes = [1, 8, 256], strides = [1, 1, 1]} : vector<16x8x256xf32> to vector<1x8x256xf32>
    %625 = vector.shape_cast %624 : vector<1x8x256xf32> to vector<8x256xf32>
    %c0_174 = arith.constant 0 : index
    %c12 = arith.constant 12 : index
    %c0_175 = arith.constant 0 : index
    %626 = vector.load %arg7[%c0_174, %c12, %c0_175] : memref<8x16x256xf32, #tpu.memory_space<vmem>>, vector<8x1x256xf32>
    %627 = vector.shape_cast %626 : vector<8x1x256xf32> to vector<8x256xf32>
    %628 = vector.shape_cast %625 : vector<8x256xf32> to vector<8x1x256xf32>
    tpu.vector_store %arg7[%c0_174, %c12, %c0_175], %628 {strides = array<i32>} : memref<8x16x256xf32, #tpu.memory_space<vmem>>, vector<8x1x256xf32>,
    %629 = vector.extract_strided_slice %563 {offsets = [13, 0, 0], sizes = [1, 8, 256], strides = [1, 1, 1]} : vector<16x8x256xf32> to vector<1x8x256xf32>
    %630 = vector.shape_cast %629 : vector<1x8x256xf32> to vector<8x256xf32>
    %c0_176 = arith.constant 0 : index
    %c13 = arith.constant 13 : index
    %c0_177 = arith.constant 0 : index
    %631 = vector.load %arg7[%c0_176, %c13, %c0_177] : memref<8x16x256xf32, #tpu.memory_space<vmem>>, vector<8x1x256xf32>
    %632 = vector.shape_cast %631 : vector<8x1x256xf32> to vector<8x256xf32>
    %633 = vector.shape_cast %630 : vector<8x256xf32> to vector<8x1x256xf32>
    tpu.vector_store %arg7[%c0_176, %c13, %c0_177], %633 {strides = array<i32>} : memref<8x16x256xf32, #tpu.memory_space<vmem>>, vector<8x1x256xf32>,
    %634 = vector.extract_strided_slice %563 {offsets = [14, 0, 0], sizes = [1, 8, 256], strides = [1, 1, 1]} : vector<16x8x256xf32> to vector<1x8x256xf32>
    %635 = vector.shape_cast %634 : vector<1x8x256xf32> to vector<8x256xf32>
    %c0_178 = arith.constant 0 : index
    %c14 = arith.constant 14 : index
    %c0_179 = arith.constant 0 : index
    %636 = vector.load %arg7[%c0_178, %c14, %c0_179] : memref<8x16x256xf32, #tpu.memory_space<vmem>>, vector<8x1x256xf32>
    %637 = vector.shape_cast %636 : vector<8x1x256xf32> to vector<8x256xf32>
    %638 = vector.shape_cast %635 : vector<8x256xf32> to vector<8x1x256xf32>
    tpu.vector_store %arg7[%c0_178, %c14, %c0_179], %638 {strides = array<i32>} : memref<8x16x256xf32, #tpu.memory_space<vmem>>, vector<8x1x256xf32>,
    %639 = vector.extract_strided_slice %563 {offsets = [15, 0, 0], sizes = [1, 8, 256], strides = [1, 1, 1]} : vector<16x8x256xf32> to vector<1x8x256xf32>
    %640 = vector.shape_cast %639 : vector<1x8x256xf32> to vector<8x256xf32>
    %c0_180 = arith.constant 0 : index
    %c15 = arith.constant 15 : index
    %c0_181 = arith.constant 0 : index
    %641 = vector.load %arg7[%c0_180, %c15, %c0_181] : memref<8x16x256xf32, #tpu.memory_space<vmem>>, vector<8x1x256xf32>
    %642 = vector.shape_cast %641 : vector<8x1x256xf32> to vector<8x256xf32>
    %643 = vector.shape_cast %640 : vector<8x256xf32> to vector<8x1x256xf32>
    tpu.vector_store %arg7[%c0_180, %c15, %c0_181], %643 {strides = array<i32>} : memref<8x16x256xf32, #tpu.memory_space<vmem>>, vector<8x1x256xf32>,
    return
  }
  func.func @transform_0(%arg0: i32) -> (i32, i32, i32) {
    %c0_i32 = arith.constant 0 : i32
    %c0_i32_0 = arith.constant 0 : i32
    %c0_i32_1 = arith.constant 0 : i32
    %c0_i32_2 = arith.constant 0 : i32
    return %c0_i32, %c0_i32_0, %c0_i32_1 : i32, i32, i32
  }
  func.func @transform_1(%arg0: i32) -> (i32, i32) {
    %c0_i32 = arith.constant 0 : i32
    %c0_i32_0 = arith.constant 0 : i32
    %c0_i32_1 = arith.constant 0 : i32
    return %c0_i32, %c0_i32_0 : i32, i32
  }
  func.func @transform_2(%arg0: i32) -> (i32, i32) {
    %c0_i32 = arith.constant 0 : i32
    %c0_i32_0 = arith.constant 0 : i32
    %c0_i32_1 = arith.constant 0 : i32
    return %c0_i32, %c0_i32_0 : i32, i32
  }
  func.func @transform_3(%arg0: i32) -> (i32, i32) {
    %c0_i32 = arith.constant 0 : i32
    %c0_i32_0 = arith.constant 0 : i32
    %c0_i32_1 = arith.constant 0 : i32
    return %c0_i32, %c0_i32_0 : i32, i32
  }
  func.func @transform_4(%arg0: i32) -> (i32, i32) {
    %c0_i32 = arith.constant 0 : i32
    %c0_i32_0 = arith.constant 0 : i32
    %c0_i32_1 = arith.constant 0 : i32
    return %c0_i32, %c0_i32_0 : i32, i32
  }
  func.func @transform_5(%arg0: i32) -> (i32, i32) {
    %c0_i32 = arith.constant 0 : i32
    %c0_i32_0 = arith.constant 0 : i32
    %c0_i32_1 = arith.constant 0 : i32
    return %c0_i32, %c0_i32_0 : i32, i32
  }
  func.func @transform_6(%arg0: i32) -> (i32, i32, i32) {
    %c0_i32 = arith.constant 0 : i32
    %c0_i32_0 = arith.constant 0 : i32
    %c0_i32_1 = arith.constant 0 : i32
    %c0_i32_2 = arith.constant 0 : i32
    return %c0_i32, %c0_i32_0, %c0_i32_1 : i32, i32, i32
  }
}

</mosaic_0001>

<bundles_post_ra>
// kernel: lstm_model_forward.1
= control target key start
LH: loop header
LB: loop body
LE: loop exit
PB: predicated region body
PF: predicated region fallthrough
CT: control target
= control target key end

     0   :  { %v8569_v7 = vmov 0.0   ;;  %s8561_s0 = inlined_call_operand.vmem [shape: f32[16,8,128], index: 0, kind: input, shape index: {}]   ;;  %s8562_s1 = inlined_call_operand.vmem [shape: f32[128,512], index: 1, kind: input, shape index: {}]   ;;  %s8563_s2 = inlined_call_operand.vmem [shape: f32[128,512], index: 2, kind: input, shape index: {}]   ;;  %s8564_s3 = inlined_call_operand.vmem [shape: f32[1,512], index: 3, kind: input, shape index: {}]   ;;  %s8565_s4 = inlined_call_operand.vmem [shape: f32[128,256], index: 4, kind: input, shape index: {}]   ;;  %s8566_s5 = inlined_call_operand.vmem [shape: f32[1,256], index: 5, kind: input, shape index: {}]   ;;  %s8567_s6 = inlined_call_operand.hbm [shape: f32[8,16,256], index: 6, kind: output, shape index: {}]  }
   0x1   :  { %v41_v0 = vld [vmem:[%s8562_s1 + $0x8] sm:$0xff]  ;;  %v40_v2 = vld [vmem:[%s8562_s1] sm:$0xff]  ;;  %238 = vmatprep.mubr.f32.mxu1 %v8569_v7  ;;  %190 = vmatprep.mubr.f32.mxu0 %v8569_v7  ;;  %v43_v48 = vld [vmem:[%s8562_s1 + $0x18] sm:$0xff] }
   0x2   :  { %v45_v1 = vld [vmem:[%s8562_s1 + $0x28] sm:$0xff]  ;;  %v44_v4 = vld [vmem:[%s8562_s1 + $0x20] sm:$0xff]  ;;  %v47_v49 = vld [vmem:[%s8562_s1 + $0x38] sm:$0xff] }
   0x3   :  { %v5038_v3 = vpack.c.bf16 %v45_v1, %v41_v0  ;;  %v49_v5 = vld [vmem:[%s8562_s1 + $0x48] sm:$0xff]  ;;  %v5040_v8 = vpack.c.bf16 %v44_v4, %v40_v2  ;;  %v48_v10 = vld [vmem:[%s8562_s1 + $0x40] sm:$0xff]  ;;  %v5070_v53 = vpack.c.bf16 %v47_v49, %v43_v48  ;;  %v42_v54 = vld [vmem:[%s8562_s1 + $0x10] sm:$0xff] }
   0x4   :  { %v53_v6 = vld [vmem:[%s8562_s1 + $0x68] sm:$0xff]  ;;  %v52_v11 = vld [vmem:[%s8562_s1 + $0x60] sm:$0xff]  ;;  %v46_v55 = vld [vmem:[%s8562_s1 + $0x30] sm:$0xff] }
   0x5   :  { %v5042_v9 = vpack.c.bf16 %v53_v6, %v49_v5  ;;  %v57_v12 = vld [vmem:[%s8562_s1 + $0x88] sm:$0xff]  ;;  %6158 = vmatprep.subr.bf16.mxu1 %v5038_v3  ;;  %5039 = vmatprep.subr.bf16.mxu0 %v5038_v3  ;;  %v5044_v14 = vpack.c.bf16 %v52_v11, %v48_v10  ;;  %v56_v16 = vld [vmem:[%s8562_s1 + $0x80] sm:$0xff]  ;;  %v51_v56 = vld [vmem:[%s8562_s1 + $0x58] sm:$0xff]  ;;  %v5072_v0 = vpack.c.bf16 %v46_v55, %v42_v54 }
   0x6   :  { %v61_v13 = vld [vmem:[%s8562_s1 + $0xa8] sm:$0xff]  ;;  %6166 = vmatpush1.bf16.msra.mxu1 %v5040_v8  ;;  %5041 = vmatpush1.bf16.msra.mxu0 %v5040_v8  ;;  %v60_v17 = vld [vmem:[%s8562_s1 + $0xa0] sm:$0xff]  ;;  %v55_v58 = vld [vmem:[%s8562_s1 + $0x78] sm:$0xff] }
   0x7   :  { %6159 = vmatprep.subr.bf16.mxu1 %v5042_v9  ;;  %v5046_v15 = vpack.c.bf16 %v61_v13, %v57_v12  ;;  %5043 = vmatprep.subr.bf16.mxu0 %v5042_v9  ;;  %v65_v18 = vld [vmem:[%s8562_s1 + $0xc8] sm:$0xff]  ;;  %v5048_v20 = vpack.c.bf16 %v60_v17, %v56_v16  ;;  %v64_v22 = vld [vmem:[%s8562_s1 + $0xc0] sm:$0xff]  ;;  %v5074_v2 = vpack.c.bf16 %v55_v58, %v51_v56  ;;  %v50_v3 = vld [vmem:[%s8562_s1 + $0x50] sm:$0xff] }
   0x8   :  { %v69_v19 = vld [vmem:[%s8562_s1 + $0xe8] sm:$0xff]  ;;  %v68_v23 = vld [vmem:[%s8562_s1 + $0xe0] sm:$0xff]  ;;  %v54_v4 = vld [vmem:[%s8562_s1 + $0x70] sm:$0xff] }
   0x9   :  { %v5050_v21 = vpack.c.bf16 %v69_v19, %v65_v18  ;;  %v73_v24 = vld [vmem:[%s8562_s1 + $0x108] sm:$0xff]  ;;  %v5052_v26 = vpack.c.bf16 %v68_v23, %v64_v22  ;;  %v72_v28 = vld [vmem:[%s8562_s1 + $0x100] sm:$0xff]  ;;  %v59_v5 = vld [vmem:[%s8562_s1 + $0x98] sm:$0xff] }
   0xa   :  { %6167 = vmatpush1.bf16.msra.mxu1 %v5044_v14  ;;  %5045 = vmatpush1.bf16.msra.mxu0 %v5044_v14  ;;  %v77_v25 = vld [vmem:[%s8562_s1 + $0x128] sm:$0xff]  ;;  %v76_v29 = vld [vmem:[%s8562_s1 + $0x120] sm:$0xff]  ;;  %v63_v8 = vld [vmem:[%s8562_s1 + $0xb8] sm:$0xff] }
   0xb   :  { %6160 = vmatprep.subr.bf16.mxu1 %v5046_v15  ;;  %5047 = vmatprep.subr.bf16.mxu0 %v5046_v15  ;;  %v5054_v27 = vpack.c.bf16 %v77_v25, %v73_v24  ;;  %v81_v30 = vld [vmem:[%s8562_s1 + $0x148] sm:$0xff]  ;;  %v5056_v32 = vpack.c.bf16 %v76_v29, %v72_v28  ;;  %v80_v34 = vld [vmem:[%s8562_s1 + $0x140] sm:$0xff]  ;;  %v5076_v15 = vpack.c.bf16 %v54_v4, %v50_v3  ;;  %v58_v18 = vld [vmem:[%s8562_s1 + $0x90] sm:$0xff] }
   0xc   :  { %v85_v31 = vld [vmem:[%s8562_s1 + $0x168] sm:$0xff]  ;;  %v84_v35 = vld [vmem:[%s8562_s1 + $0x160] sm:$0xff]  ;;  %v5078_v17 = vpack.c.bf16 %v63_v8, %v59_v5  ;;  %v62_v19 = vld [vmem:[%s8562_s1 + $0xb0] sm:$0xff] }
   0xd   :  { %v5058_v33 = vpack.c.bf16 %v85_v31, %v81_v30  ;;  %v89_v36 = vld [vmem:[%s8562_s1 + $0x188] sm:$0xff]  ;;  %v5060_v38 = vpack.c.bf16 %v84_v35, %v80_v34  ;;  %v88_v40 = vld [vmem:[%s8562_s1 + $0x180] sm:$0xff]  ;;  %v71_v22 = vld [vmem:[%s8562_s1 + $0xf8] sm:$0xff]  ;;  %v5080_v29 = vpack.c.bf16 %v62_v19, %v58_v18 }
   0xe   :  { %6168 = vmatpush1.bf16.msra.mxu1 %v5048_v20  ;;  %5049 = vmatpush1.bf16.msra.mxu0 %v5048_v20  ;;  %v93_v37 = vld [vmem:[%s8562_s1 + $0x1a8] sm:$0xff]  ;;  %v92_v41 = vld [vmem:[%s8562_s1 + $0x1a0] sm:$0xff]  ;;  %v67_v20 = vld [vmem:[%s8562_s1 + $0xd8] sm:$0xff] }
   0xf   :  { %6161 = vmatprep.subr.bf16.mxu1 %v5050_v21  ;;  %5051 = vmatprep.subr.bf16.mxu0 %v5050_v21  ;;  %v5062_v39 = vpack.c.bf16 %v93_v37, %v89_v36  ;;  %v97_v42 = vld [vmem:[%s8562_s1 + $0x1c8] sm:$0xff]  ;;  %v5064_v44 = vpack.c.bf16 %v92_v41, %v88_v40  ;;  %v96_v46 = vld [vmem:[%s8562_s1 + $0x1c0] sm:$0xff]  ;;  %v6852_v28 = vld [vmem:[%s8561_s0 + $0x50] sm:$0xff]  ;;  %v5082_v31 = vpack.c.bf16 %v71_v22, %v67_v20 }
  0x10   :  { %v101_v43 = vld [vmem:[%s8562_s1 + $0x1e8] sm:$0xff]  ;;  %v100_v47 = vld [vmem:[%s8562_s1 + $0x1e0] sm:$0xff]  ;;  %v6857_v30 = vld [vmem:[%s8561_s0 + $0x10] sm:$0xff] }
  0x11   :  { %v5066_v45 = vpack.c.bf16 %v101_v43, %v97_v42  ;;  %v513_v50 = vld [vmem:[%s8563_s2 + $0x8] sm:$0xff]  ;;  %v5068_v52 = vpack.c.bf16 %v100_v47, %v96_v46  ;;  %v512_v59 = vld [vmem:[%s8563_s2] sm:$0xff]  ;;  %v75_v34 = vld [vmem:[%s8562_s1 + $0x118] sm:$0xff] }
  0x12   :  { %6169 = vmatpush1.bf16.msra.mxu1 %v5052_v26  ;;  %5053 = vmatpush1.bf16.msra.mxu0 %v5052_v26  ;;  %v517_v51 = vld [vmem:[%s8563_s2 + $0x28] sm:$0xff]  ;;  %v516_v60 = vld [vmem:[%s8563_s2 + $0x20] sm:$0xff]  ;;  %v79_v36 = vld [vmem:[%s8562_s1 + $0x138] sm:$0xff] }
  0x13   :  { %6162 = vmatprep.subr.bf16.mxu1 %v5054_v27  ;;  %5055 = vmatprep.subr.bf16.mxu0 %v5054_v27  ;;  %v6746_v57 = vpack.c.bf16 %v517_v51, %v513_v50  ;;  %v521_v61 = vld [vmem:[%s8563_s2 + $0x48] sm:$0xff]  ;;  %v6766_v63 = vld [vmem:[%s8561_s0 + $0x40] sm:$0xff]  ;;  %v6783_v6 = vpack.c.bf16 %v516_v60, %v512_v59  ;;  %v6896_v42 = vld [vmem:[%s8561_s0 + $0x58] sm:$0xff] }
  0x14   :  { %v525_v62 = vld [vmem:[%s8563_s2 + $0x68] sm:$0xff]  ;;  %v6771_v1 = vld [vmem:[%s8561_s0] sm:$0xff]  ;;  %v74_v46 = vld [vmem:[%s8562_s1 + $0x110] sm:$0xff] }
  0x15   :  { %v6788_v9 = vpack.c.bf16 %v525_v62, %v521_v61  ;;  %v520_v10 = vld [vmem:[%s8563_s2 + $0x40] sm:$0xff]  ;;  %v529_v12 = vld [vmem:[%s8563_s2 + $0x88] sm:$0xff]  ;;  %v78_v47 = vld [vmem:[%s8562_s1 + $0x130] sm:$0xff] }
  0x16   :  { %6170 = vmatpush1.bf16.msra.mxu1 %v5056_v32  ;;  %5057 = vmatpush1.bf16.msra.mxu0 %v5056_v32  ;;  %v524_v11 = vld [vmem:[%s8563_s2 + $0x60] sm:$0xff]  ;;  %v533_v13 = vld [vmem:[%s8563_s2 + $0xa8] sm:$0xff]  ;;  %v66_v32 = vld [vmem:[%s8562_s1 + $0xd0] sm:$0xff]  ;;  %v5088_v58 = vpack.c.bf16 %v78_v47, %v74_v46 }
  0x17   :  { %6163 = vmatprep.subr.bf16.mxu1 %v5058_v33  ;;  %5059 = vmatprep.subr.bf16.mxu0 %v5058_v33  ;;  %v6808_v14 = vld [vmem:[%s8561_s0 + $0x48] sm:$0xff]  ;;  %v6825_v21 = vpack.c.bf16 %v524_v11, %v520_v10  ;;  %v6832_v23 = vpack.c.bf16 %v533_v13, %v529_v12  ;;  %v528_v24 = vld [vmem:[%s8563_s2 + $0x80] sm:$0xff]  ;;  %v70_v33 = vld [vmem:[%s8562_s1 + $0xf0] sm:$0xff] }
  0x18   :  { %v6813_v16 = vld [vmem:[%s8561_s0 + $0x8] sm:$0xff]  ;;  %v532_v25 = vld [vmem:[%s8563_s2 + $0xa0] sm:$0xff]  ;;  %v5084_v43 = vpack.c.bf16 %v70_v33, %v66_v32  ;;  %v83_v48 = vld [vmem:[%s8562_s1 + $0x158] sm:$0xff] }
  0x19   :  { %v537_v26 = vld [vmem:[%s8563_s2 + $0xc8] sm:$0xff]  ;;  %v6869_v35 = vpack.c.bf16 %v532_v25, %v528_v24  ;;  %v87_v50 = vld [vmem:[%s8562_s1 + $0x178] sm:$0xff]  ;;  %v6940_v56 = vld [vmem:[%s8561_s0 + $0x60] sm:$0xff] }
  0x1a   :  { %6171 = vmatpush1.bf16.msra.mxu1 %v5060_v38  ;;  %5061 = vmatpush1.bf16.msra.mxu0 %v5060_v38  ;;  %v541_v27 = vld [vmem:[%s8563_s2 + $0xe8] sm:$0xff]  ;;  %v536_v38 = vld [vmem:[%s8563_s2 + $0xc0] sm:$0xff] }
  0x1b   :  { %6164 = vmatprep.subr.bf16.mxu1 %v5062_v39  ;;  %5063 = vmatprep.subr.bf16.mxu0 %v5062_v39  ;;  %v6876_v37 = vpack.c.bf16 %v541_v27, %v537_v26  ;;  %v540_v39 = vld [vmem:[%s8563_s2 + $0xe0] sm:$0xff]  ;;  %v545_v40 = vld [vmem:[%s8563_s2 + $0x108] sm:$0xff] }
  0x1c   :  { %v549_v41 = vld [vmem:[%s8563_s2 + $0x128] sm:$0xff]  ;;  %v6913_v49 = vpack.c.bf16 %v540_v39, %v536_v38  ;;  %v6945_v59 = vld [vmem:[%s8561_s0 + $0x20] sm:$0xff] }
  0x1d   :  { %v6920_v51 = vpack.c.bf16 %v549_v41, %v545_v40  ;;  %v553_v54 = vld [vmem:[%s8563_s2 + $0x148] sm:$0xff] }
  0x1e   :  { %6172 = vmatpush1.bf16.msra.mxu1 %v5064_v44  ;;  %5065 = vmatpush1.bf16.msra.mxu0 %v5064_v44  ;;  %v6901_v44 = vld [vmem:[%s8561_s0 + $0x18] sm:$0xff]  ;;  %v557_v55 = vld [vmem:[%s8563_s2 + $0x168] sm:$0xff] }
  0x1f   :  { %6165 = vmatprep.subr.bf16.mxu1 %v5066_v45  ;;  %5067 = vmatprep.subr.bf16.mxu0 %v5066_v45  ;;  %v5086_v45 = vpack.c.bf16 %v79_v36, %v75_v34 }
  0x22   :  { %6173 = vmatpush1.bf16.msra.mxu1 %v5068_v52  ;;  %5069 = vmatpush1.bf16.msra.mxu0 %v5068_v52  ;;  %v544_v52 = vld [vmem:[%s8563_s2 + $0x100] sm:$0xff] }
  0x23   :  { %5071 = vmatprep.subr.bf16.mxu1 %v5070_v53  ;;  %5103 = vmatprep.subr.bf16.mxu0 %v6746_v57  ;;  %v548_v53 = vld [vmem:[%s8563_s2 + $0x120] sm:$0xff] }
  0x25   :  { %239 = vmatmul.mubr.f32.vlgmr.msra.gmra.mrb[0].mxu1 %v6766_v63  ;;  %191 = vmatmul.mubr.f32.vlgmr.msra.gmra.mrb[0].mxu0 %v6771_v1 }
  0x26   :  { %5073 = vmatpush1.bf16.msra.mxu1 %v5072_v0  ;;  %244 = vmatprep.mubr.f32.mxu1 %v8569_v7 }
  0x27   :  { %5075 = vmatprep.subr.bf16.mxu1 %v5074_v2  ;;  %5105 = vmatpush1.bf16.msra.mxu0 %v6783_v6 }
  0x28   :  { %196 = vmatprep.mubr.f32.mxu0 %v8569_v7  ;;  %5107 = vmatprep.subr.bf16.mxu0 %v6788_v9 }
  0x29   :  { %245 = vmatmul.mubr.f32.gmra.mrb[2].mxu1 %v6808_v14  ;;  %197 = vmatmul.mubr.f32.gmra.mrb[2].mxu0 %v6813_v16 }
  0x2a   :  { %5077 = vmatpush1.bf16.msra.mxu1 %v5076_v15  ;;  %250 = vmatprep.mubr.f32.mxu1 %v8569_v7 }
  0x2b   :  { %5079 = vmatprep.subr.bf16.mxu1 %v5078_v17  ;;  %5109 = vmatpush1.bf16.msra.mxu0 %v6825_v21 }
  0x2c   :  { %202 = vmatprep.mubr.f32.mxu0 %v8569_v7  ;;  %5111 = vmatprep.subr.bf16.mxu0 %v6832_v23 }
  0x2d   :  { %251 = vmatmul.mubr.f32.gmra.mrb[4].mxu1 %v6852_v28  ;;  %203 = vmatmul.mubr.f32.gmra.mrb[4].mxu0 %v6857_v30 }
  0x2e   :  { %5081 = vmatpush1.bf16.msra.mxu1 %v5080_v29  ;;  %256 = vmatprep.mubr.f32.mxu1 %v8569_v7 }
  0x2f   :  { %5083 = vmatprep.subr.bf16.mxu1 %v5082_v31  ;;  %5113 = vmatpush1.bf16.msra.mxu0 %v6869_v35 }
  0x30   :  { %208 = vmatprep.mubr.f32.mxu0 %v8569_v7  ;;  %5115 = vmatprep.subr.bf16.mxu0 %v6876_v37 }
  0x31   :  { %257 = vmatmul.mubr.f32.gmra.mrb[6].mxu1 %v6896_v42  ;;  %209 = vmatmul.mubr.f32.gmra.mrb[6].mxu0 %v6901_v44 }
  0x32   :  { %5085 = vmatpush1.bf16.msra.mxu1 %v5084_v43  ;;  %262 = vmatprep.mubr.f32.mxu1 %v8569_v7 }
  0x33   :  { %11 = vsyncpa [#allocation5], 0  ;;  %5087 = vmatprep.subr.bf16.mxu1 %v5086_v45  ;;  %v5090_v60 = vpack.c.bf16 %v87_v50, %v83_v48  ;;  %v82_v61 = vld [vmem:[%s8562_s1 + $0x150] sm:$0xff]  ;;  %v91_v0 = vld [vmem:[%s8562_s1 + $0x198] sm:$0xff]  ;;  %5117 = vmatpush1.bf16.msra.mxu0 %v6913_v49  ;;  %v6957_v2 = vpack.c.bf16 %v548_v53, %v544_v52  ;;  %v6964_v4 = vpack.c.bf16 %v557_v55, %v553_v54 }
  0x34   :  { %v86_v62 = vld [vmem:[%s8562_s1 + $0x170] sm:$0xff]  ;;  %v95_v3 = vld [vmem:[%s8562_s1 + $0x1b8] sm:$0xff]  ;;  %214 = vmatprep.mubr.f32.mxu0 %v8569_v7  ;;  %5119 = vmatprep.subr.bf16.mxu0 %v6920_v51  ;;  %v552_v5 = vld [vmem:[%s8563_s2 + $0x140] sm:$0xff] }
  0x35   :  { %v556_v8 = vld [vmem:[%s8563_s2 + $0x160] sm:$0xff]  ;;  %263 = vmatmul.mubr.f32.gmra.mrb[8].mxu1 %v6940_v56  ;;  %215 = vmatmul.mubr.f32.gmra.mrb[8].mxu0 %v6945_v59  ;;  %v561_v10 = vld [vmem:[%s8563_s2 + $0x188] sm:$0xff]  ;;  %v5092_v13 = vpack.c.bf16 %v86_v62, %v82_v61  ;;  %v5094_v17 = vpack.c.bf16 %v95_v3, %v91_v0  ;;  %v90_v18 = vld [vmem:[%s8562_s1 + $0x190] sm:$0xff] }
  0x36   :  { %v565_v11 = vld [vmem:[%s8563_s2 + $0x1a8] sm:$0xff]  ;;  %5089 = vmatpush1.bf16.msra.mxu1 %v5088_v58  ;;  %268 = vmatprep.mubr.f32.mxu1 %v8569_v7  ;;  %v94_v19 = vld [vmem:[%s8562_s1 + $0x1b0] sm:$0xff]  ;;  %v99_v20 = vld [vmem:[%s8562_s1 + $0x1d8] sm:$0xff]  ;;  %v7001_v22 = vpack.c.bf16 %v556_v8, %v552_v5 }
  0x37   :  { %v6984_v12 = vld [vmem:[%s8561_s0 + $0x68] sm:$0xff]  ;;  %5091 = vmatprep.subr.bf16.mxu1 %v5090_v60  ;;  %5121 = vmatpush1.bf16.msra.mxu0 %v6957_v2  ;;  %v103_v24 = vld [vmem:[%s8562_s1 + $0x1f8] sm:$0xff]  ;;  %v7008_v25 = vpack.c.bf16 %v565_v11, %v561_v10  ;;  %v560_v26 = vld [vmem:[%s8563_s2 + $0x180] sm:$0xff]  ;;  %v5096_v33 = vpack.c.bf16 %v94_v19, %v90_v18 }
  0x38   :  { %v6989_v15 = vld [vmem:[%s8561_s0 + $0x28] sm:$0xff]  ;;  %220 = vmatprep.mubr.f32.mxu0 %v8569_v7  ;;  %5123 = vmatprep.subr.bf16.mxu0 %v6964_v4  ;;  %v564_v27 = vld [vmem:[%s8563_s2 + $0x1a0] sm:$0xff]  ;;  %v7028_v32 = vld [vmem:[%s8561_s0 + $0x70] sm:$0xff]  ;;  %v5098_v36 = vpack.c.bf16 %v103_v24, %v99_v20 }
  0x39   :  { %269 = vmatmul.mubr.f32.gmra.mrb[10].mxu1 %v6984_v12  ;;  %221 = vmatmul.mubr.f32.gmra.mrb[10].mxu0 %v6989_v15  ;;  %v569_v29 = vld [vmem:[%s8563_s2 + $0x1c8] sm:$0xff]  ;;  %v7033_v34 = vld [vmem:[%s8561_s0 + $0x30] sm:$0xff]  ;;  %v515_v40 = vld [vmem:[%s8563_s2 + $0x18] sm:$0xff]  ;;  %v7045_v41 = vpack.c.bf16 %v564_v27, %v560_v26 }
  0x3a   :  { %v573_v31 = vld [vmem:[%s8563_s2 + $0x1e8] sm:$0xff]  ;;  %5093 = vmatpush1.bf16.msra.mxu1 %v5092_v13  ;;  %274 = vmatprep.mubr.f32.mxu1 %v8569_v7  ;;  %v98_v38 = vld [vmem:[%s8562_s1 + $0x1d0] sm:$0xff]  ;;  %v519_v43 = vld [vmem:[%s8563_s2 + $0x38] sm:$0xff] }
  0x3b   :  { %5095 = vmatprep.subr.bf16.mxu1 %v5094_v17  ;;  %v102_v39 = vld [vmem:[%s8562_s1 + $0x1f0] sm:$0xff]  ;;  %5125 = vmatpush1.bf16.msra.mxu0 %v7001_v22  ;;  %v7052_v45 = vpack.c.bf16 %v573_v31, %v569_v29  ;;  %v568_v46 = vld [vmem:[%s8563_s2 + $0x1c0] sm:$0xff]  ;;  %v7066_v48 = vld [vmem:[%s8561_s0 + $0x78] sm:$0xff]  ;;  %v7073_v53 = vpack.c.bf16 %v519_v43, %v515_v40 }
  0x3c   :  { %226 = vmatprep.mubr.f32.mxu0 %v8569_v7  ;;  %5127 = vmatprep.subr.bf16.mxu0 %v7008_v25  ;;  %v572_v47 = vld [vmem:[%s8563_s2 + $0x1e0] sm:$0xff]  ;;  %v5100_v50 = vpack.c.bf16 %v102_v39, %v98_v38  ;;  %v7071_v52 = vld [vmem:[%s8561_s0 + $0x38] sm:$0xff]  ;;  %v514_v54 = vld [vmem:[%s8563_s2 + $0x10] sm:$0xff] }
  0x3d   :  { %275 = vmatmul.mubr.f32.gmra.mrb[12].mxu1 %v7028_v32  ;;  %227 = vmatmul.mubr.f32.gmra.mrb[12].mxu0 %v7033_v34  ;;  %v518_v55 = vld [vmem:[%s8563_s2 + $0x30] sm:$0xff]  ;;  %v7082_v58 = vpack.c.bf16 %v572_v47, %v568_v46  ;;  %v523_v60 = vld [vmem:[%s8563_s2 + $0x58] sm:$0xff] }
  0x3e   :  { %5097 = vmatpush1.bf16.msra.mxu1 %v5096_v33  ;;  %280 = vmatprep.mubr.f32.mxu1 %v8569_v7  ;;  %v527_v61 = vld [vmem:[%s8563_s2 + $0x78] sm:$0xff]  ;;  %v7095_v62 = vpack.c.bf16 %v518_v55, %v514_v54  ;;  %v522_v3 = vld [vmem:[%s8563_s2 + $0x50] sm:$0xff] }
  0x3f   :  { %5099 = vmatprep.subr.bf16.mxu1 %v5098_v36  ;;  %5129 = vmatpush1.bf16.msra.mxu0 %v7045_v41  ;;  %v7098_v0 = vpack.c.bf16 %v527_v61, %v523_v60  ;;  %v526_v5 = vld [vmem:[%s8563_s2 + $0x70] sm:$0xff]  ;;  %v531_v8 = vld [vmem:[%s8563_s2 + $0x98] sm:$0xff] }
  0x40   :  { %232 = vmatprep.mubr.f32.mxu0 %v8569_v7  ;;  %5131 = vmatprep.subr.bf16.mxu0 %v7052_v45  ;;  %v535_v10 = vld [vmem:[%s8563_s2 + $0xb8] sm:$0xff]  ;;  %v7118_v11 = vpack.c.bf16 %v526_v5, %v522_v3  ;;  %v530_v17 = vld [vmem:[%s8563_s2 + $0x90] sm:$0xff] }
  0x41   :  { %281 = vmatmul.mubr.f32.gmra.mrb[14].mxu1 %v7066_v48  ;;  %233 = vmatmul.mubr.f32.gmra.mrb[14].mxu0 %v7071_v52  ;;  %v7121_v13 = vpack.c.bf16 %v535_v10, %v531_v8  ;;  %v539_v18 = vld [vmem:[%s8563_s2 + $0xd8] sm:$0xff]  ;;  %v538_v26 = vld [vmem:[%s8563_s2 + $0xd0] sm:$0xff] }
  0x42   :  { %5101 = vmatpush1.bf16.msra.mxu1 %v5100_v50  ;;  %351 = vmatprep.mubr.f32.mxu1 %v8569_v7  ;;  %v543_v19 = vld [vmem:[%s8563_s2 + $0xf8] sm:$0xff]  ;;  %v546_v36 = vld [vmem:[%s8563_s2 + $0x110] sm:$0xff] }
  0x43   :  { %5135 = vmatprep.subr.bf16.mxu1 %v7073_v53  ;;  %5133 = vmatpush1.bf16.msra.mxu0 %v7082_v58  ;;  %v7145_v24 = vpack.c.bf16 %v543_v19, %v539_v18  ;;  %v547_v27 = vld [vmem:[%s8563_s2 + $0x118] sm:$0xff]  ;;  %v554_v46 = vld [vmem:[%s8563_s2 + $0x150] sm:$0xff] }
  0x44   :  { %644 = vmatprep.mubr.f32.mxu0 %v8569_v7  ;;  %5167 = vmatprep.subr.bf16.mxu0 %v6746_v57  ;;  %v551_v29 = vld [vmem:[%s8563_s2 + $0x138] sm:$0xff]  ;;  %v562_v60 = vld [vmem:[%s8563_s2 + $0x190] sm:$0xff] }
  0x45   :  { %352 = vmatmul.mubr.f32.vlgmr.msra.gmra.mrb[16].mxu1 %v6771_v1  ;;  %v534_v1 = vld [vmem:[%s8563_s2 + $0xb0] sm:$0xff]  ;;  %v7167_v33 = vpack.c.bf16 %v551_v29, %v547_v27  ;;  %v555_v38 = vld [vmem:[%s8563_s2 + $0x158] sm:$0xff] }
  0x46   :  { %5137 = vmatpush1.bf16.msra.mxu1 %v7095_v62  ;;  %357 = vmatprep.mubr.f32.mxu1 %v8569_v7  ;;  %v7142_v20 = vpack.c.bf16 %v534_v1, %v530_v17  ;;  %v559_v39 = vld [vmem:[%s8563_s2 + $0x178] sm:$0xff]  ;;  %v570_v10 = vld [vmem:[%s8563_s2 + $0x1d0] sm:$0xff] }
  0x47   :  { %5139 = vmatprep.subr.bf16.mxu1 %v7098_v0  ;;  %645 = vmatmul.mubr.f32.vlgmr.msra.gmra.mrb[0].mxu0 %v8569_v7  ;;  %v7189_v43 = vpack.c.bf16 %v559_v39, %v555_v38  ;;  %v563_v47 = vld [vmem:[%s8563_s2 + $0x198] sm:$0xff] }
  0x48   :  { %5169 = vmatpush1.bf16.msra.mxu0 %v6783_v6  ;;  %820 = vmatprep.mubr.f32.mxu0 %v8569_v7  ;;  %v567_v50 = vld [vmem:[%s8563_s2 + $0x1b8] sm:$0xff] }
  0x49   :  { %358 = vmatmul.mubr.f32.gmra.mrb[18].mxu1 %v6813_v16  ;;  %5171 = vmatprep.subr.bf16.mxu0 %v6788_v9  ;;  %v542_v16 = vld [vmem:[%s8563_s2 + $0xf0] sm:$0xff]  ;;  %v7211_v55 = vpack.c.bf16 %v567_v50, %v563_v47  ;;  %v571_v61 = vld [vmem:[%s8563_s2 + $0x1d8] sm:$0xff] }
  0x4a   :  { %363 = vmatprep.mubr.f32.mxu1 %v8569_v7  ;;  %5141 = vmatpush1.bf16.msra.mxu1 %v7118_v11  ;;  %v7164_v31 = vpack.c.bf16 %v542_v16, %v538_v26  ;;  %v575_v3 = vld [vmem:[%s8563_s2 + $0x1f8] sm:$0xff] }
  0x4b   :  { %5143 = vmatprep.subr.bf16.mxu1 %v7121_v13  ;;  %v7233_v8 = vpack.c.bf16 %v575_v3, %v571_v61 }
  0x4c   :  { %5173 = vmatpush1.bf16.msra.mxu0 %v6825_v21 }
  0x4d   :  { %364 = vmatmul.mubr.f32.gmra.mrb[20].mxu1 %v6857_v30  ;;  %5175 = vmatprep.subr.bf16.mxu0 %v6832_v23  ;;  %v550_v30 = vld [vmem:[%s8563_s2 + $0x130] sm:$0xff] }
  0x4e   :  { %369 = vmatprep.mubr.f32.mxu1 %v8569_v7  ;;  %5145 = vmatpush1.bf16.msra.mxu1 %v7142_v20  ;;  %v7186_v40 = vpack.c.bf16 %v550_v30, %v546_v36  ;;  %v8568_v30 = vlaneseq }
  0x4f   :  { %5147 = vmatprep.subr.bf16.mxu1 %v7145_v24 }
  0x50   :  { %5177 = vmatpush1.bf16.msra.mxu0 %v6869_v35  ;;  %v7324_v38 = vshrl.u32 %v8568_v30, 7 }
  0x51   :  { %370 = vmatmul.mubr.f32.gmra.mrb[22].mxu1 %v6901_v44  ;;  %5179 = vmatprep.subr.bf16.mxu0 %v6876_v37  ;;  %v558_v44 = vld [vmem:[%s8563_s2 + $0x170] sm:$0xff] }
  0x52   :  { %375 = vmatprep.mubr.f32.mxu1 %v8569_v7  ;;  %5149 = vmatpush1.bf16.msra.mxu1 %v7164_v31  ;;  %v7208_v54 = vpack.c.bf16 %v558_v44, %v554_v46  ;;  %8588 = vst [vmem:[#allocation13_spill] sm:$0xff] %v7324_v38  ;;  %v8571_v39 = vsub.s32 1, %v7324_v38  ;;  %v104_v46 = vld [vmem:[%s8564_s3] sm:$0xf]  ;;  %v8572_v44 = vsub.s32 0, %v7324_v38  ;;  %v120_v30 = vsub.s32 3, %v7324_v38 }
  0x53   :  { %5151 = vmatprep.subr.bf16.mxu1 %v7167_v33 }
  0x54   :  { %5181 = vmatpush1.bf16.msra.mxu0 %v6913_v49  ;;  %v7333_v47 = vrot.slane %v104_v46, %v8571_v39  ;;  %v7337_v50 = vrot.slane %v104_v46, %v8572_v44  ;;  %v7345_v44 = vrot.slane %v104_v46, %v120_v30 }
  0x55   :  { %376 = vmatmul.mubr.f32.gmra.mrb[24].mxu1 %v6945_v59  ;;  %5183 = vmatprep.subr.bf16.mxu0 %v6920_v51  ;;  %v566_v59 = vld [vmem:[%s8563_s2 + $0x1b0] sm:$0xff] }
  0x56   :  { %381 = vmatprep.mubr.f32.mxu1 %v8569_v7  ;;  %5153 = vmatpush1.bf16.msra.mxu1 %v7186_v40  ;;  %v7230_v5 = vpack.c.bf16 %v566_v59, %v562_v60 }
  0x57   :  { %5155 = vmatprep.subr.bf16.mxu1 %v7189_v43 }
  0x58   :  { %5185 = vmatpush1.bf16.msra.mxu0 %v6957_v2 }
  0x59   :  { %382 = vmatmul.mubr.f32.gmra.mrb[26].mxu1 %v6989_v15  ;;  %5187 = vmatprep.subr.bf16.mxu0 %v6964_v4  ;;  %v574_v15 = vld [vmem:[%s8563_s2 + $0x1f0] sm:$0xff] }
  0x5a   :  { %387 = vmatprep.mubr.f32.mxu1 %v8569_v7  ;;  %5157 = vmatpush1.bf16.msra.mxu1 %v7208_v54  ;;  %v7246_v17 = vpack.c.bf16 %v574_v15, %v570_v10  ;;  %v116_v10 = vsub.s32 2, %v7324_v38 }
  0x5b   :  { %5159 = vmatprep.subr.bf16.mxu1 %v7211_v55 }
  0x5c   :  { %5189 = vmatpush1.bf16.msra.mxu0 %v7001_v22 }
  0x5d   :  { %388 = vmatmul.mubr.f32.gmra.mrb[28].mxu1 %v7033_v34  ;;  %5191 = vmatprep.subr.bf16.mxu0 %v7008_v25 }
  0x5e   :  { %393 = vmatprep.mubr.f32.mxu1 %v8569_v7  ;;  %5161 = vmatpush1.bf16.msra.mxu1 %v7230_v5 }
  0x5f   :  { %5163 = vmatprep.subr.bf16.mxu1 %v7233_v8 }
  0x60   :  { %5193 = vmatpush1.bf16.msra.mxu0 %v7045_v41 }
  0x61   :  { %394 = vmatmul.mubr.f32.gmra.mrb[30].mxu1 %v7071_v52  ;;  %5195 = vmatprep.subr.bf16.mxu0 %v7052_v45 }
  0x62   :  { %399 = vmatprep.mubr.f32.mxu1 %v8569_v7  ;;  %5165 = vmatpush1.bf16.msra.mxu1 %v7246_v17 }
  0x63   :  { %5199 = vmatprep.subr.bf16.mxu1 %v7073_v53 }
  0x64   :  { %5197 = vmatpush1.bf16.msra.mxu0 %v7082_v58 }
  0x65   :  { %400 = vmatmul.mubr.f32.gmra.mrb[32].mxu1 %v6766_v63  ;;  %5231 = vmatprep.subr.bf16.mxu0 %v6746_v57 }
  0x66   :  { %405 = vmatprep.mubr.f32.mxu1 %v8569_v7 }
  0x69   :  { %406 = vmatmul.mubr.f32.gmra.mrb[34].mxu1 %v6808_v14 }
  0x6a   :  { %411 = vmatprep.mubr.f32.mxu1 %v8569_v7 }
  0x6d   :  { %412 = vmatmul.mubr.f32.gmra.mrb[36].mxu1 %v6852_v28 }
  0x6e   :  { %417 = vmatprep.mubr.f32.mxu1 %v8569_v7 }
  0x71   :  { %418 = vmatmul.mubr.f32.gmra.mrb[38].mxu1 %v6896_v42 }
  0x72   :  { %423 = vmatprep.mubr.f32.mxu1 %v8569_v7 }
  0x75   :  { %424 = vmatmul.mubr.f32.gmra.mrb[40].mxu1 %v6940_v56 }
  0x76   :  { %429 = vmatprep.mubr.f32.mxu1 %v8569_v7 }
  0x79   :  { %430 = vmatmul.mubr.f32.gmra.mrb[42].mxu1 %v6984_v12 }
  0x7a   :  { %435 = vmatprep.mubr.f32.mxu1 %v8569_v7 }
  0x7d   :  { %436 = vmatmul.mubr.f32.gmra.mrb[44].mxu1 %v7028_v32 }
  0x7e   :  { %441 = vmatprep.mubr.f32.mxu1 %v8569_v7 }
  0x81   :  { %442 = vmatmul.mubr.f32.gmra.mrb[46].mxu1 %v7066_v48 }
  0x82   :  { %715 = vmatprep.mubr.f32.mxu1 %v8569_v7 }
  0x85   :  { %716 = vmatmul.mubr.f32.vlgmr.msra.gmra.mrb[16].mxu1 %v8569_v7 }
  0x86   :  { %5201 = vmatpush1.bf16.msra.mxu1 %v7095_v62  ;;  %891 = vmatprep.mubr.f32.mxu1 %v8569_v7 }
  0x87   :  { %5203 = vmatprep.subr.bf16.mxu1 %v7098_v0 }
  0x8a   :  { %5205 = vmatpush1.bf16.msra.mxu1 %v7118_v11 }
  0x8b   :  { %5207 = vmatprep.subr.bf16.mxu1 %v7121_v13 }
  0x8e   :  { %5209 = vmatpush1.bf16.msra.mxu1 %v7142_v20 }
  0x8f   :  { %5211 = vmatprep.subr.bf16.mxu1 %v7145_v24 }
  0x92   :  { %5213 = vmatpush1.bf16.msra.mxu1 %v7164_v31 }
  0x93   :  { %5215 = vmatprep.subr.bf16.mxu1 %v7167_v33 }
  0x96   :  { %5217 = vmatpush1.bf16.msra.mxu1 %v7186_v40 }
  0x97   :  { %5219 = vmatprep.subr.bf16.mxu1 %v7189_v43 }
  0x9a   :  { %5221 = vmatpush1.bf16.msra.mxu1 %v7208_v54 }
  0x9b   :  { %5223 = vmatprep.subr.bf16.mxu1 %v7211_v55 }
  0x9e   :  { %5225 = vmatpush1.bf16.msra.mxu1 %v7230_v5 }
  0x9f   :  { %5227 = vmatprep.subr.bf16.mxu1 %v7233_v8 }
  0xa2   :  { %5229 = vmatpush1.bf16.msra.mxu1 %v7246_v17 }
  0xa3   :  { %5263 = vmatprep.subr.bf16.mxu1 %v7073_v53 }
  0xf8   :  { %v7291_v63 = vpop.f32.mrb[0].mxu1 }
  0xf9   :  { %v7293_v14 = vpop.f32.mrb[1].mxu1 }
  0xfc   :  { %v7295_v28 = vpop.f32.mrb[2].mxu1 }
  0xfd   :  { %v7297_v42 = vpop.f32.mrb[3].mxu1 }
 0x100   :  { %v7299_v56 = vpop.f32.mrb[4].mxu1 }
 0x101   :  { %v7301_v12 = vpop.f32.mrb[5].mxu1 }
 0x104   :  { %v7303_v32 = vpop.f32.mrb[6].mxu1 }
 0x105   :  { %v7305_v34 = vpop.f32.mrb[7].mxu1 }
 0x108   :  { %v7307_v48 = vpop.f32.mrb[8].mxu1 }
 0x109   :  { %v7309_v52 = vpop.f32.mrb[9].mxu1 }
 0x10c   :  { %v7311_v1 = vpop.f32.mrb[10].mxu1 }
 0x10d   :  { %8582 = vst [vmem:[#allocation7_spill] sm:$0xff] %v7311_v1  ;;  %v7313_v18 = vpop.f32.mrb[11].mxu1 }
 0x10e   :  { %8583 = vst [vmem:[#allocation8_spill] sm:$0xff] %v7313_v18 }
 0x110   :  { %v7315_v19 = vpop.f32.mrb[12].mxu1 }
 0x111   :  { %8584 = vst [vmem:[#allocation9_spill] sm:$0xff] %v7315_v19  ;;  %v7317_v26 = vpop.f32.mrb[13].mxu1 }
 0x112   :  { %8585 = vst [vmem:[#allocation10_spill] sm:$0xff] %v7317_v26 }
 0x114   :  { %v7319_v16 = vpop.f32.mrb[14].mxu1 }
 0x115   :  { %8586 = vst [vmem:[#allocation11_spill] sm:$0xff] %v7319_v16  ;;  %v7321_v27 = vpop.f32.mrb[15].mxu1 }
 0x116   :  { %8587 = vst [vmem:[#allocation12_spill] sm:$0xff] %v7321_v27  ;;  %v7343_v27 = vrot.slane %v104_v46, %v116_v10 }
 0x11a   :  { %v646_v29 = vpop.f32.mrb[0].mxu0 }
 0x11b   :  { %v648_v36 = vpop.f32.mrb[1].mxu0  ;;  %v6174_v59 = vadd.f32 %v646_v29, %v7337_v50 }
 0x11c   :  { %v6175_v60 = vadd.f32 %v648_v36, %v7333_v47 }
 0x11d   :  { %v4990_v3 = vmul.f32 -1.442695, %v6174_v59 }
 0x11e   :  { %v4991_v61 = vmul.f32 -1.442695, %v6175_v60 }
 0x120   :  { %6307 = vpow2.f32 %v4991_v61 }
 0x121   :  { %6309 = vpow2.f32 %v4990_v3 }
 0x12a   :  { %v6308_v15 = vpop.eup %6307 }
 0x12b   :  { %v6310_v7 = vpop.eup %6309  ;;  %v735_v39 = vadd.f32 1.0, %v6308_v15 }
 0x12c   :  { %v729_v16 = vadd.f32 1.0, %v6310_v7 }
 0x12d   :  { %6311 = vrcp.f32 %v735_v39 }
 0x12e   :  { %6313 = vrcp.f32 %v729_v16 }
 0x137   :  { %v6312_v61 = vpop.eup %6311 }
 0x138   :  { %v6314_v3 = vpop.eup %6313  ;;  %v745_v15 = vmul.f32 0.0, %v6312_v61 }
 0x158   :  { %v717_v26 = vpop.f32.mrb[16].mxu1 }
 0x159   :  { %v6222_v29 = vadd.f32 %v717_v26, %v7343_v27  ;;  %v719_v36 = vpop.f32.mrb[17].mxu1 }
 0x15a   :  { %v6223_v60 = vadd.f32 %v719_v36, %v7345_v44 }
 0x15b   :  { %6315 = vtanh.f32 %v6222_v29 }
 0x15c   :  { %v4992_v59 = vmul.f32 -1.442695, %v6223_v60 }
 0x15e   :  { %6317 = vpow2.f32 %v4992_v59 }
 0x165   :  { %v6316_v38 = vpop.eup %6315 }
 0x166   :  { %v746_v10 = vmul.f32 %v6316_v38, %v6314_v3 }
 0x168   :  { %v6318_v19 = vpop.eup %6317  ;;  %v7349_v7 = vadd.f32 %v746_v10, %v745_v15 }
 0x169   :  { %v742_v30 = vadd.f32 1.0, %v6318_v19  ;;  %v8590_v19 = vmov 0.0  }
 0x16a   :  { %6319 = vtanh.f32 %v7349_v7 }
 0x16b   :  { %6321 = vrcp.f32 %v742_v30 }
 0x174   :  { %v6320_v26 = vpop.eup %6319 }
 0x175   :  { %v6322_v39 = vpop.eup %6321 }
 0x176   :  { %v7352_v16 = vmul.f32 %v6322_v39, %v6320_v26 }
 0x178   :  { %8589 = vst [vmem:[#allocation14_spill] sm:$0xff] %v7352_v16  ;;  %821 = vmatmul.mubr.f32.vlgmr.msra.gmra.mrb[2].mxu0 %v7352_v16  ;;  %892 = vmatmul.mubr.f32.vlgmr.msra.gmra.mrb[18].mxu1 %v7352_v16 }
 0x179   :  { %5233 = vmatpush1.bf16.msra.mxu0 %v6783_v6  ;;  %5265 = vmatpush1.bf16.msra.mxu1 %v7095_v62 }
 0x17a   :  { %5235 = vmatprep.subr.bf16.mxu0 %v6788_v9  ;;  %5267 = vmatprep.subr.bf16.mxu1 %v7098_v0 }
 0x17b   :  { %997 = vmatprep.mubr.f32.mxu0 %v8590_v19  ;;  %1068 = vmatprep.mubr.f32.mxu1 %v8590_v19 }
 0x17d   :  { %5237 = vmatpush1.bf16.msra.mxu0 %v6825_v21  ;;  %5269 = vmatpush1.bf16.msra.mxu1 %v7118_v11 }
 0x17e   :  { %5239 = vmatprep.subr.bf16.mxu0 %v6832_v23  ;;  %5271 = vmatprep.subr.bf16.mxu1 %v7121_v13 }
 0x181   :  { %5241 = vmatpush1.bf16.msra.mxu0 %v6869_v35  ;;  %5273 = vmatpush1.bf16.msra.mxu1 %v7142_v20 }
 0x182   :  { %5243 = vmatprep.subr.bf16.mxu0 %v6876_v37  ;;  %5275 = vmatprep.subr.bf16.mxu1 %v7145_v24 }
 0x185   :  { %5245 = vmatpush1.bf16.msra.mxu0 %v6913_v49  ;;  %5277 = vmatpush1.bf16.msra.mxu1 %v7164_v31 }
 0x186   :  { %5247 = vmatprep.subr.bf16.mxu0 %v6920_v51  ;;  %5279 = vmatprep.subr.bf16.mxu1 %v7167_v33 }
 0x189   :  { %5249 = vmatpush1.bf16.msra.mxu0 %v6957_v2  ;;  %5281 = vmatpush1.bf16.msra.mxu1 %v7186_v40 }
 0x18a   :  { %5251 = vmatprep.subr.bf16.mxu0 %v6964_v4  ;;  %5283 = vmatprep.subr.bf16.mxu1 %v7189_v43 }
 0x18d   :  { %5253 = vmatpush1.bf16.msra.mxu0 %v7001_v22  ;;  %5285 = vmatpush1.bf16.msra.mxu1 %v7208_v54 }
 0x18e   :  { %5255 = vmatprep.subr.bf16.mxu0 %v7008_v25  ;;  %5287 = vmatprep.subr.bf16.mxu1 %v7211_v55 }
 0x191   :  { %5257 = vmatpush1.bf16.msra.mxu0 %v7045_v41  ;;  %5289 = vmatpush1.bf16.msra.mxu1 %v7230_v5 }
 0x192   :  { %5259 = vmatprep.subr.bf16.mxu0 %v7052_v45  ;;  %5291 = vmatprep.subr.bf16.mxu1 %v7233_v8 }
 0x195   :  { %5261 = vmatpush1.bf16.msra.mxu0 %v7082_v58  ;;  %5293 = vmatpush1.bf16.msra.mxu1 %v7246_v17 }
 0x196   :  { %5295 = vmatprep.subr.bf16.mxu0 %v6746_v57  ;;  %5327 = vmatprep.subr.bf16.mxu1 %v7073_v53 }
 0x24b   :  { %v822_v38 = vpop.f32.mrb[2].mxu0  ;;  %v893_v46 = vpop.f32.mrb[18].mxu1 }
 0x24c   :  { %v6176_v29 = vadd.f32 %v822_v38, %v7337_v50  ;;  %v824_v36 = vpop.f32.mrb[3].mxu0  ;;  %v895_v60 = vpop.f32.mrb[19].mxu1  ;;  %v6224_v30 = vadd.f32 %v893_v46, %v7343_v27 }
 0x24d   :  { %v6177_v59 = vadd.f32 %v824_v36, %v7333_v47  ;;  %v6225_v15 = vadd.f32 %v895_v60, %v7345_v44 }
 0x24e   :  { %v4993_v61 = vmul.f32 -1.442695, %v6176_v29 }
 0x24f   :  { %v4994_v3 = vmul.f32 -1.442695, %v6177_v59  ;;  %v4995_v10 = vmul.f32 -1.442695, %v6225_v15 }
 0x250   :  { %6323 = vpow2.f32 %v4993_v61 }
 0x251   :  { %6325 = vpow2.f32 %v4994_v3 }
 0x252   :  { %6327 = vpow2.f32 %v4995_v10 }
 0x253   :  { %6329 = vtanh.f32 %v6224_v30 }
 0x25a   :  { %v6324_v26 = vpop.eup %6323 }
 0x25b   :  { %v6326_v39 = vpop.eup %6325  ;;  %v905_v16 = vadd.f32 1.0, %v6324_v26 }
 0x25c   :  { %v911_v18 = vadd.f32 1.0, %v6326_v39  ;;  %v6328_v38 = vpop.eup %6327 }
 0x25d   :  { %6331 = vrcp.f32 %v905_v16  ;;  %v6330_v1 = vpop.eup %6329  ;;  %v918_v61 = vadd.f32 1.0, %v6328_v38 }
 0x25e   :  { %6333 = vrcp.f32 %v911_v18 }
 0x25f   :  { %6335 = vrcp.f32 %v918_v61 }
 0x267   :  { %v6332_v36 = vpop.eup %6331 }
 0x268   :  { %v6334_v29 = vpop.eup %6333  ;;  %v922_v59 = vmul.f32 %v6332_v36, %v6330_v1 }
 0x269   :  { %v921_v3 = vmul.f32 %v6334_v29, %v7349_v7  ;;  %v6336_v46 = vpop.eup %6335 }
 0x26b   :  { %v7395_v60 = vadd.f32 %v922_v59, %v921_v3 }
 0x26d   :  { %6337 = vtanh.f32 %v7395_v60 }
 0x277   :  { %v6338_v15 = vpop.eup %6337 }
 0x278   :  { %v7398_v10 = vmul.f32 %v6338_v15, %v6336_v46 }
 0x27a   :  { %8591 = vst [vmem:[#allocation15_spill] sm:$0xff] %v7398_v10  ;;  %998 = vmatmul.mubr.f32.vlgmr.msra.gmra.mrb[4].mxu0 %v7398_v10  ;;  %1069 = vmatmul.mubr.f32.vlgmr.msra.gmra.mrb[20].mxu1 %v7398_v10 }
 0x27b   :  { %5297 = vmatpush1.bf16.msra.mxu0 %v6783_v6  ;;  %5329 = vmatpush1.bf16.msra.mxu1 %v7095_v62 }
 0x27c   :  { %5299 = vmatprep.subr.bf16.mxu0 %v6788_v9  ;;  %5331 = vmatprep.subr.bf16.mxu1 %v7098_v0 }
 0x27d   :  { %1174 = vmatprep.mubr.f32.mxu0 %v8590_v19  ;;  %1245 = vmatprep.mubr.f32.mxu1 %v8590_v19 }
 0x27f   :  { %5301 = vmatpush1.bf16.msra.mxu0 %v6825_v21  ;;  %5333 = vmatpush1.bf16.msra.mxu1 %v7118_v11 }
 0x280   :  { %5303 = vmatprep.subr.bf16.mxu0 %v6832_v23  ;;  %5335 = vmatprep.subr.bf16.mxu1 %v7121_v13 }
 0x283   :  { %5305 = vmatpush1.bf16.msra.mxu0 %v6869_v35  ;;  %5337 = vmatpush1.bf16.msra.mxu1 %v7142_v20 }
 0x284   :  { %5307 = vmatprep.subr.bf16.mxu0 %v6876_v37  ;;  %5339 = vmatprep.subr.bf16.mxu1 %v7145_v24 }
 0x287   :  { %5309 = vmatpush1.bf16.msra.mxu0 %v6913_v49  ;;  %5341 = vmatpush1.bf16.msra.mxu1 %v7164_v31 }
 0x288   :  { %5311 = vmatprep.subr.bf16.mxu0 %v6920_v51  ;;  %5343 = vmatprep.subr.bf16.mxu1 %v7167_v33 }
 0x28b   :  { %5313 = vmatpush1.bf16.msra.mxu0 %v6957_v2  ;;  %5345 = vmatpush1.bf16.msra.mxu1 %v7186_v40 }
 0x28c   :  { %5315 = vmatprep.subr.bf16.mxu0 %v6964_v4  ;;  %5347 = vmatprep.subr.bf16.mxu1 %v7189_v43 }
 0x28f   :  { %5317 = vmatpush1.bf16.msra.mxu0 %v7001_v22  ;;  %5349 = vmatpush1.bf16.msra.mxu1 %v7208_v54 }
 0x290   :  { %5319 = vmatprep.subr.bf16.mxu0 %v7008_v25  ;;  %5351 = vmatprep.subr.bf16.mxu1 %v7211_v55 }
 0x293   :  { %5321 = vmatpush1.bf16.msra.mxu0 %v7045_v41  ;;  %5353 = vmatpush1.bf16.msra.mxu1 %v7230_v5 }
 0x294   :  { %5323 = vmatprep.subr.bf16.mxu0 %v7052_v45  ;;  %5355 = vmatprep.subr.bf16.mxu1 %v7233_v8 }
 0x297   :  { %5325 = vmatpush1.bf16.msra.mxu0 %v7082_v58  ;;  %5357 = vmatpush1.bf16.msra.mxu1 %v7246_v17 }
 0x298   :  { %5359 = vmatprep.subr.bf16.mxu0 %v6746_v57  ;;  %5391 = vmatprep.subr.bf16.mxu1 %v7073_v53 }
 0x34d   :  { %v999_v1 = vpop.f32.mrb[4].mxu0  ;;  %v1070_v18 = vpop.f32.mrb[20].mxu1 }
 0x34e   :  { %v6178_v7 = vadd.f32 %v999_v1, %v7337_v50  ;;  %v1001_v16 = vpop.f32.mrb[5].mxu0  ;;  %v1072_v30 = vpop.f32.mrb[21].mxu1  ;;  %v6226_v59 = vadd.f32 %v1070_v18, %v7343_v27 }
 0x34f   :  { %v6179_v26 = vadd.f32 %v1001_v16, %v7333_v47  ;;  %v6227_v36 = vadd.f32 %v1072_v30, %v7345_v44 }
 0x350   :  { %v4996_v39 = vmul.f32 -1.442695, %v6178_v7 }
 0x351   :  { %v4997_v38 = vmul.f32 -1.442695, %v6179_v26  ;;  %v4998_v29 = vmul.f32 -1.442695, %v6227_v36 }
 0x352   :  { %6339 = vpow2.f32 %v4996_v39 }
 0x353   :  { %6341 = vpow2.f32 %v4997_v38 }
 0x354   :  { %6343 = vpow2.f32 %v4998_v29 }
 0x355   :  { %6345 = vtanh.f32 %v6226_v59 }
 0x35c   :  { %v6340_v61 = vpop.eup %6339 }
 0x35d   :  { %v6342_v3 = vpop.eup %6341  ;;  %v1082_v46 = vadd.f32 1.0, %v6340_v61 }
 0x35e   :  { %v1088_v15 = vadd.f32 1.0, %v6342_v3  ;;  %v6344_v1 = vpop.eup %6343 }
 0x35f   :  { %6347 = vrcp.f32 %v1082_v46  ;;  %v6346_v10 = vpop.eup %6345  ;;  %v1095_v39 = vadd.f32 1.0, %v6344_v1 }
 0x360   :  { %6349 = vrcp.f32 %v1088_v15 }
 0x361   :  { %6351 = vrcp.f32 %v1095_v39 }
 0x369   :  { %v6348_v16 = vpop.eup %6347 }
 0x36a   :  { %v6350_v7 = vpop.eup %6349  ;;  %v1099_v26 = vmul.f32 %v6348_v16, %v6346_v10 }
 0x36b   :  { %v1098_v38 = vmul.f32 %v6350_v7, %v7395_v60  ;;  %v6352_v18 = vpop.eup %6351 }
 0x36d   :  { %v7441_v30 = vadd.f32 %v1099_v26, %v1098_v38 }
 0x36f   :  { %6353 = vtanh.f32 %v7441_v30 }
 0x379   :  { %v6354_v36 = vpop.eup %6353 }
 0x37a   :  { %v7444_v29 = vmul.f32 %v6354_v36, %v6352_v18 }
 0x37c   :  { %8592 = vst [vmem:[#allocation16_spill] sm:$0xff] %v7444_v29  ;;  %1175 = vmatmul.mubr.f32.vlgmr.msra.gmra.mrb[6].mxu0 %v7444_v29  ;;  %1246 = vmatmul.mubr.f32.vlgmr.msra.gmra.mrb[22].mxu1 %v7444_v29 }
 0x37d   :  { %5361 = vmatpush1.bf16.msra.mxu0 %v6783_v6  ;;  %5393 = vmatpush1.bf16.msra.mxu1 %v7095_v62 }
 0x37e   :  { %5363 = vmatprep.subr.bf16.mxu0 %v6788_v9  ;;  %5395 = vmatprep.subr.bf16.mxu1 %v7098_v0 }
 0x37f   :  { %1351 = vmatprep.mubr.f32.mxu0 %v8590_v19  ;;  %1422 = vmatprep.mubr.f32.mxu1 %v8590_v19 }
 0x381   :  { %5365 = vmatpush1.bf16.msra.mxu0 %v6825_v21  ;;  %5397 = vmatpush1.bf16.msra.mxu1 %v7118_v11 }
 0x382   :  { %5367 = vmatprep.subr.bf16.mxu0 %v6832_v23  ;;  %5399 = vmatprep.subr.bf16.mxu1 %v7121_v13 }
 0x385   :  { %5369 = vmatpush1.bf16.msra.mxu0 %v6869_v35  ;;  %5401 = vmatpush1.bf16.msra.mxu1 %v7142_v20 }
 0x386   :  { %5371 = vmatprep.subr.bf16.mxu0 %v6876_v37  ;;  %5403 = vmatprep.subr.bf16.mxu1 %v7145_v24 }
 0x389   :  { %5373 = vmatpush1.bf16.msra.mxu0 %v6913_v49  ;;  %5405 = vmatpush1.bf16.msra.mxu1 %v7164_v31 }
 0x38a   :  { %5375 = vmatprep.subr.bf16.mxu0 %v6920_v51  ;;  %5407 = vmatprep.subr.bf16.mxu1 %v7167_v33 }
 0x38d   :  { %5377 = vmatpush1.bf16.msra.mxu0 %v6957_v2  ;;  %5409 = vmatpush1.bf16.msra.mxu1 %v7186_v40 }
 0x38e   :  { %5379 = vmatprep.subr.bf16.mxu0 %v6964_v4  ;;  %5411 = vmatprep.subr.bf16.mxu1 %v7189_v43 }
 0x391   :  { %5381 = vmatpush1.bf16.msra.mxu0 %v7001_v22  ;;  %5413 = vmatpush1.bf16.msra.mxu1 %v7208_v54 }
 0x392   :  { %5383 = vmatprep.subr.bf16.mxu0 %v7008_v25  ;;  %5415 = vmatprep.subr.bf16.mxu1 %v7211_v55 }
 0x395   :  { %5385 = vmatpush1.bf16.msra.mxu0 %v7045_v41  ;;  %5417 = vmatpush1.bf16.msra.mxu1 %v7230_v5 }
 0x396   :  { %5387 = vmatprep.subr.bf16.mxu0 %v7052_v45  ;;  %5419 = vmatprep.subr.bf16.mxu1 %v7233_v8 }
 0x399   :  { %5389 = vmatpush1.bf16.msra.mxu0 %v7082_v58  ;;  %5421 = vmatpush1.bf16.msra.mxu1 %v7246_v17 }
 0x39a   :  { %5423 = vmatprep.subr.bf16.mxu0 %v6746_v57  ;;  %5455 = vmatprep.subr.bf16.mxu1 %v7073_v53 }
 0x44f   :  { %v1176_v60 = vpop.f32.mrb[6].mxu0  ;;  %v1247_v10 = vpop.f32.mrb[22].mxu1 }
 0x450   :  { %v6180_v59 = vadd.f32 %v1176_v60, %v7337_v50  ;;  %v1178_v61 = vpop.f32.mrb[7].mxu0  ;;  %v1249_v3 = vpop.f32.mrb[23].mxu1  ;;  %v6228_v26 = vadd.f32 %v1247_v10, %v7343_v27 }
 0x451   :  { %v6181_v46 = vadd.f32 %v1178_v61, %v7333_v47  ;;  %v6229_v16 = vadd.f32 %v1249_v3, %v7345_v44 }
 0x452   :  { %v4999_v15 = vmul.f32 -1.442695, %v6180_v59 }
 0x453   :  { %v5000_v1 = vmul.f32 -1.442695, %v6181_v46  ;;  %v5001_v7 = vmul.f32 -1.442695, %v6229_v16 }
 0x454   :  { %6355 = vpow2.f32 %v4999_v15 }
 0x455   :  { %6357 = vpow2.f32 %v5000_v1 }
 0x456   :  { %6359 = vpow2.f32 %v5001_v7 }
 0x457   :  { %6361 = vtanh.f32 %v6228_v26 }
 0x45e   :  { %v6356_v39 = vpop.eup %6355 }
 0x45f   :  { %v6358_v38 = vpop.eup %6357  ;;  %v1259_v18 = vadd.f32 1.0, %v6356_v39 }
 0x460   :  { %v1265_v36 = vadd.f32 1.0, %v6358_v38  ;;  %v6360_v60 = vpop.eup %6359 }
 0x461   :  { %6363 = vrcp.f32 %v1259_v18  ;;  %v6362_v29 = vpop.eup %6361  ;;  %v1272_v15 = vadd.f32 1.0, %v6360_v60 }
 0x462   :  { %6365 = vrcp.f32 %v1265_v36 }
 0x463   :  { %6367 = vrcp.f32 %v1272_v15 }
 0x46b   :  { %v6364_v61 = vpop.eup %6363 }
 0x46c   :  { %v6366_v59 = vpop.eup %6365  ;;  %v1276_v46 = vmul.f32 %v6364_v61, %v6362_v29 }
 0x46d   :  { %v1275_v1 = vmul.f32 %v6366_v59, %v7441_v30  ;;  %v6368_v10 = vpop.eup %6367 }
 0x46f   :  { %v7487_v3 = vadd.f32 %v1276_v46, %v1275_v1 }
 0x471   :  { %6369 = vtanh.f32 %v7487_v3 }
 0x47b   :  { %v6370_v16 = vpop.eup %6369 }
 0x47c   :  { %v7490_v7 = vmul.f32 %v6370_v16, %v6368_v10 }
 0x47e   :  { %8593 = vst [vmem:[#allocation17_spill] sm:$0xff] %v7490_v7  ;;  %1352 = vmatmul.mubr.f32.vlgmr.msra.gmra.mrb[8].mxu0 %v7490_v7  ;;  %1423 = vmatmul.mubr.f32.vlgmr.msra.gmra.mrb[24].mxu1 %v7490_v7 }
 0x47f   :  { %5425 = vmatpush1.bf16.msra.mxu0 %v6783_v6  ;;  %5457 = vmatpush1.bf16.msra.mxu1 %v7095_v62 }
 0x480   :  { %5427 = vmatprep.subr.bf16.mxu0 %v6788_v9  ;;  %5459 = vmatprep.subr.bf16.mxu1 %v7098_v0 }
 0x481   :  { %1528 = vmatprep.mubr.f32.mxu0 %v8590_v19  ;;  %1599 = vmatprep.mubr.f32.mxu1 %v8590_v19 }
 0x483   :  { %5429 = vmatpush1.bf16.msra.mxu0 %v6825_v21  ;;  %5461 = vmatpush1.bf16.msra.mxu1 %v7118_v11 }
 0x484   :  { %5431 = vmatprep.subr.bf16.mxu0 %v6832_v23  ;;  %5463 = vmatprep.subr.bf16.mxu1 %v7121_v13 }
 0x487   :  { %5433 = vmatpush1.bf16.msra.mxu0 %v6869_v35  ;;  %5465 = vmatpush1.bf16.msra.mxu1 %v7142_v20 }
 0x488   :  { %5435 = vmatprep.subr.bf16.mxu0 %v6876_v37  ;;  %5467 = vmatprep.subr.bf16.mxu1 %v7145_v24 }
 0x48b   :  { %5437 = vmatpush1.bf16.msra.mxu0 %v6913_v49  ;;  %5469 = vmatpush1.bf16.msra.mxu1 %v7164_v31 }
 0x48c   :  { %5439 = vmatprep.subr.bf16.mxu0 %v6920_v51  ;;  %5471 = vmatprep.subr.bf16.mxu1 %v7167_v33 }
 0x48f   :  { %5441 = vmatpush1.bf16.msra.mxu0 %v6957_v2  ;;  %5473 = vmatpush1.bf16.msra.mxu1 %v7186_v40 }
 0x490   :  { %5443 = vmatprep.subr.bf16.mxu0 %v6964_v4  ;;  %5475 = vmatprep.subr.bf16.mxu1 %v7189_v43 }
 0x493   :  { %5445 = vmatpush1.bf16.msra.mxu0 %v7001_v22  ;;  %5477 = vmatpush1.bf16.msra.mxu1 %v7208_v54 }
 0x494   :  { %5447 = vmatprep.subr.bf16.mxu0 %v7008_v25  ;;  %5479 = vmatprep.subr.bf16.mxu1 %v7211_v55 }
 0x497   :  { %5449 = vmatpush1.bf16.msra.mxu0 %v7045_v41  ;;  %5481 = vmatpush1.bf16.msra.mxu1 %v7230_v5 }
 0x498   :  { %5451 = vmatprep.subr.bf16.mxu0 %v7052_v45  ;;  %5483 = vmatprep.subr.bf16.mxu1 %v7233_v8 }
 0x49b   :  { %5453 = vmatpush1.bf16.msra.mxu0 %v7082_v58  ;;  %5485 = vmatpush1.bf16.msra.mxu1 %v7246_v17 }
 0x49c   :  { %5487 = vmatprep.subr.bf16.mxu0 %v6746_v57  ;;  %5519 = vmatprep.subr.bf16.mxu1 %v7073_v53 }
 0x551   :  { %v1353_v30 = vpop.f32.mrb[8].mxu0  ;;  %v1424_v29 = vpop.f32.mrb[24].mxu1 }
 0x552   :  { %v6182_v26 = vadd.f32 %v1353_v30, %v7337_v50  ;;  %v1355_v39 = vpop.f32.mrb[9].mxu0  ;;  %v1426_v38 = vpop.f32.mrb[25].mxu1  ;;  %v6230_v46 = vadd.f32 %v1424_v29, %v7343_v27 }
 0x553   :  { %v6183_v18 = vadd.f32 %v1355_v39, %v7333_v47  ;;  %v6231_v61 = vadd.f32 %v1426_v38, %v7345_v44 }
 0x554   :  { %v5002_v36 = vmul.f32 -1.442695, %v6182_v26 }
 0x555   :  { %v5003_v60 = vmul.f32 -1.442695, %v6183_v18  ;;  %v5004_v59 = vmul.f32 -1.442695, %v6231_v61 }
 0x556   :  { %6371 = vpow2.f32 %v5002_v36 }
 0x557   :  { %6373 = vpow2.f32 %v5003_v60 }
 0x558   :  { %6375 = vpow2.f32 %v5004_v59 }
 0x559   :  { %6377 = vtanh.f32 %v6230_v46 }
 0x560   :  { %v6372_v15 = vpop.eup %6371 }
 0x561   :  { %v6374_v1 = vpop.eup %6373  ;;  %v1436_v10 = vadd.f32 1.0, %v6372_v15 }
 0x562   :  { %v1442_v16 = vadd.f32 1.0, %v6374_v1  ;;  %v6376_v30 = vpop.eup %6375 }
 0x563   :  { %6379 = vrcp.f32 %v1436_v10  ;;  %v6378_v7 = vpop.eup %6377  ;;  %v1449_v36 = vadd.f32 1.0, %v6376_v30 }
 0x564   :  { %6381 = vrcp.f32 %v1442_v16 }
 0x565   :  { %6383 = vrcp.f32 %v1449_v36 }
 0x56d   :  { %v6380_v39 = vpop.eup %6379 }
 0x56e   :  { %v6382_v26 = vpop.eup %6381  ;;  %v1453_v18 = vmul.f32 %v6380_v39, %v6378_v7 }
 0x56f   :  { %v1452_v60 = vmul.f32 %v6382_v26, %v7487_v3  ;;  %v6384_v29 = vpop.eup %6383 }
 0x571   :  { %v7533_v38 = vadd.f32 %v1453_v18, %v1452_v60 }
 0x573   :  { %6385 = vtanh.f32 %v7533_v38 }
 0x57d   :  { %v6386_v61 = vpop.eup %6385 }
 0x57e   :  { %v7536_v59 = vmul.f32 %v6386_v61, %v6384_v29 }
 0x580   :  { %8594 = vst [vmem:[#allocation18_spill] sm:$0xff] %v7536_v59  ;;  %1529 = vmatmul.mubr.f32.vlgmr.msra.gmra.mrb[10].mxu0 %v7536_v59  ;;  %1600 = vmatmul.mubr.f32.vlgmr.msra.gmra.mrb[26].mxu1 %v7536_v59 }
 0x581   :  { %5489 = vmatpush1.bf16.msra.mxu0 %v6783_v6  ;;  %5521 = vmatpush1.bf16.msra.mxu1 %v7095_v62 }
 0x582   :  { %5491 = vmatprep.subr.bf16.mxu0 %v6788_v9  ;;  %5523 = vmatprep.subr.bf16.mxu1 %v7098_v0 }
 0x583   :  { %1705 = vmatprep.mubr.f32.mxu0 %v8590_v19  ;;  %1776 = vmatprep.mubr.f32.mxu1 %v8590_v19 }
 0x585   :  { %5493 = vmatpush1.bf16.msra.mxu0 %v6825_v21  ;;  %5525 = vmatpush1.bf16.msra.mxu1 %v7118_v11 }
 0x586   :  { %5495 = vmatprep.subr.bf16.mxu0 %v6832_v23  ;;  %5527 = vmatprep.subr.bf16.mxu1 %v7121_v13 }
 0x589   :  { %5497 = vmatpush1.bf16.msra.mxu0 %v6869_v35  ;;  %5529 = vmatpush1.bf16.msra.mxu1 %v7142_v20 }
 0x58a   :  { %5499 = vmatprep.subr.bf16.mxu0 %v6876_v37  ;;  %5531 = vmatprep.subr.bf16.mxu1 %v7145_v24 }
 0x58d   :  { %5501 = vmatpush1.bf16.msra.mxu0 %v6913_v49  ;;  %5533 = vmatpush1.bf16.msra.mxu1 %v7164_v31 }
 0x58e   :  { %5503 = vmatprep.subr.bf16.mxu0 %v6920_v51  ;;  %5535 = vmatprep.subr.bf16.mxu1 %v7167_v33 }
 0x591   :  { %5505 = vmatpush1.bf16.msra.mxu0 %v6957_v2  ;;  %5537 = vmatpush1.bf16.msra.mxu1 %v7186_v40 }
 0x592   :  { %5507 = vmatprep.subr.bf16.mxu0 %v6964_v4  ;;  %5539 = vmatprep.subr.bf16.mxu1 %v7189_v43 }
 0x595   :  { %5509 = vmatpush1.bf16.msra.mxu0 %v7001_v22  ;;  %5541 = vmatpush1.bf16.msra.mxu1 %v7208_v54 }
 0x596   :  { %5511 = vmatprep.subr.bf16.mxu0 %v7008_v25  ;;  %5543 = vmatprep.subr.bf16.mxu1 %v7211_v55 }
 0x599   :  { %5513 = vmatpush1.bf16.msra.mxu0 %v7045_v41  ;;  %5545 = vmatpush1.bf16.msra.mxu1 %v7230_v5 }
 0x59a   :  { %5515 = vmatprep.subr.bf16.mxu0 %v7052_v45  ;;  %5547 = vmatprep.subr.bf16.mxu1 %v7233_v8 }
 0x59d   :  { %5517 = vmatpush1.bf16.msra.mxu0 %v7082_v58  ;;  %5549 = vmatpush1.bf16.msra.mxu1 %v7246_v17 }
 0x59e   :  { %5551 = vmatprep.subr.bf16.mxu0 %v6746_v57  ;;  %5583 = vmatprep.subr.bf16.mxu1 %v7073_v53 }
 0x653   :  { %v1530_v3 = vpop.f32.mrb[10].mxu0  ;;  %v1601_v7 = vpop.f32.mrb[26].mxu1 }
 0x654   :  { %v6184_v46 = vadd.f32 %v1530_v3, %v7337_v50  ;;  %v1532_v15 = vpop.f32.mrb[11].mxu0  ;;  %v1603_v1 = vpop.f32.mrb[27].mxu1  ;;  %v6232_v18 = vadd.f32 %v1601_v7, %v7343_v27 }
 0x655   :  { %v6185_v10 = vadd.f32 %v1532_v15, %v7333_v47  ;;  %v6233_v39 = vadd.f32 %v1603_v1, %v7345_v44 }
 0x656   :  { %v5005_v16 = vmul.f32 -1.442695, %v6184_v46 }
 0x657   :  { %v5006_v30 = vmul.f32 -1.442695, %v6185_v10  ;;  %v5007_v26 = vmul.f32 -1.442695, %v6233_v39 }
 0x658   :  { %6387 = vpow2.f32 %v5005_v16 }
 0x659   :  { %6389 = vpow2.f32 %v5006_v30 }
 0x65a   :  { %6391 = vpow2.f32 %v5007_v26 }
 0x65b   :  { %6393 = vtanh.f32 %v6232_v18 }
 0x662   :  { %v6388_v36 = vpop.eup %6387 }
 0x663   :  { %v6390_v60 = vpop.eup %6389  ;;  %v1613_v29 = vadd.f32 1.0, %v6388_v36 }
 0x664   :  { %v1619_v61 = vadd.f32 1.0, %v6390_v60  ;;  %v6392_v3 = vpop.eup %6391 }
 0x665   :  { %6395 = vrcp.f32 %v1613_v29  ;;  %v6394_v59 = vpop.eup %6393  ;;  %v1626_v16 = vadd.f32 1.0, %v6392_v3 }
 0x666   :  { %6397 = vrcp.f32 %v1619_v61 }
 0x667   :  { %6399 = vrcp.f32 %v1626_v16 }
 0x66f   :  { %v6396_v15 = vpop.eup %6395 }
 0x670   :  { %v6398_v46 = vpop.eup %6397  ;;  %v1630_v10 = vmul.f32 %v6396_v15, %v6394_v59 }
 0x671   :  { %v1629_v30 = vmul.f32 %v6398_v46, %v7533_v38  ;;  %v6400_v7 = vpop.eup %6399 }
 0x673   :  { %v7579_v1 = vadd.f32 %v1630_v10, %v1629_v30 }
 0x675   :  { %6401 = vtanh.f32 %v7579_v1 }
 0x67f   :  { %v6402_v39 = vpop.eup %6401 }
 0x680   :  { %v7582_v26 = vmul.f32 %v6402_v39, %v6400_v7 }
 0x682   :  { %8595 = vst [vmem:[#allocation19_spill] sm:$0xff] %v7582_v26  ;;  %1706 = vmatmul.mubr.f32.vlgmr.msra.gmra.mrb[12].mxu0 %v7582_v26  ;;  %1777 = vmatmul.mubr.f32.vlgmr.msra.gmra.mrb[28].mxu1 %v7582_v26 }
 0x683   :  { %5553 = vmatpush1.bf16.msra.mxu0 %v6783_v6  ;;  %5585 = vmatpush1.bf16.msra.mxu1 %v7095_v62 }
 0x684   :  { %5555 = vmatprep.subr.bf16.mxu0 %v6788_v9  ;;  %5587 = vmatprep.subr.bf16.mxu1 %v7098_v0 }
 0x685   :  { %1882 = vmatprep.mubr.f32.mxu0 %v8590_v19  ;;  %1953 = vmatprep.mubr.f32.mxu1 %v8590_v19 }
 0x687   :  { %5557 = vmatpush1.bf16.msra.mxu0 %v6825_v21  ;;  %5589 = vmatpush1.bf16.msra.mxu1 %v7118_v11 }
 0x688   :  { %5559 = vmatprep.subr.bf16.mxu0 %v6832_v23  ;;  %5591 = vmatprep.subr.bf16.mxu1 %v7121_v13 }
 0x68b   :  { %5561 = vmatpush1.bf16.msra.mxu0 %v6869_v35  ;;  %5593 = vmatpush1.bf16.msra.mxu1 %v7142_v20 }
 0x68c   :  { %5563 = vmatprep.subr.bf16.mxu0 %v6876_v37  ;;  %5595 = vmatprep.subr.bf16.mxu1 %v7145_v24 }
 0x68f   :  { %5565 = vmatpush1.bf16.msra.mxu0 %v6913_v49  ;;  %5597 = vmatpush1.bf16.msra.mxu1 %v7164_v31 }
 0x690   :  { %5567 = vmatprep.subr.bf16.mxu0 %v6920_v51  ;;  %5599 = vmatprep.subr.bf16.mxu1 %v7167_v33 }
 0x693   :  { %5569 = vmatpush1.bf16.msra.mxu0 %v6957_v2  ;;  %5601 = vmatpush1.bf16.msra.mxu1 %v7186_v40 }
 0x694   :  { %5571 = vmatprep.subr.bf16.mxu0 %v6964_v4  ;;  %5603 = vmatprep.subr.bf16.mxu1 %v7189_v43 }
 0x697   :  { %5573 = vmatpush1.bf16.msra.mxu0 %v7001_v22  ;;  %5605 = vmatpush1.bf16.msra.mxu1 %v7208_v54 }
 0x698   :  { %5575 = vmatprep.subr.bf16.mxu0 %v7008_v25  ;;  %5607 = vmatprep.subr.bf16.mxu1 %v7211_v55 }
 0x69b   :  { %5577 = vmatpush1.bf16.msra.mxu0 %v7045_v41  ;;  %5609 = vmatpush1.bf16.msra.mxu1 %v7230_v5 }
 0x69c   :  { %5579 = vmatprep.subr.bf16.mxu0 %v7052_v45  ;;  %5611 = vmatprep.subr.bf16.mxu1 %v7233_v8 }
 0x69f   :  { %5581 = vmatpush1.bf16.msra.mxu0 %v7082_v58  ;;  %5613 = vmatpush1.bf16.msra.mxu1 %v7246_v17 }
 0x6a0   :  { %5615 = vmatprep.subr.bf16.mxu0 %v6746_v57  ;;  %5647 = vmatprep.subr.bf16.mxu1 %v7073_v53 }
 0x755   :  { %v1707_v38 = vpop.f32.mrb[12].mxu0  ;;  %v1778_v59 = vpop.f32.mrb[28].mxu1 }
 0x756   :  { %v6186_v18 = vadd.f32 %v1707_v38, %v7337_v50  ;;  %v1709_v36 = vpop.f32.mrb[13].mxu0  ;;  %v1780_v60 = vpop.f32.mrb[29].mxu1  ;;  %v6234_v10 = vadd.f32 %v1778_v59, %v7343_v27 }
 0x757   :  { %v6187_v29 = vadd.f32 %v1709_v36, %v7333_v47  ;;  %v6235_v15 = vadd.f32 %v1780_v60, %v7345_v44 }
 0x758   :  { %v5008_v61 = vmul.f32 -1.442695, %v6186_v18 }
 0x759   :  { %v5009_v3 = vmul.f32 -1.442695, %v6187_v29  ;;  %v5010_v46 = vmul.f32 -1.442695, %v6235_v15 }
 0x75a   :  { %6403 = vpow2.f32 %v5008_v61 }
 0x75b   :  { %6405 = vpow2.f32 %v5009_v3 }
 0x75c   :  { %6407 = vpow2.f32 %v5010_v46 }
 0x75d   :  { %6409 = vtanh.f32 %v6234_v10 }
 0x764   :  { %v6404_v16 = vpop.eup %6403 }
 0x765   :  { %v6406_v30 = vpop.eup %6405  ;;  %v1790_v7 = vadd.f32 1.0, %v6404_v16 }
 0x766   :  { %v1796_v39 = vadd.f32 1.0, %v6406_v30  ;;  %v6408_v38 = vpop.eup %6407 }
 0x767   :  { %6411 = vrcp.f32 %v1790_v7  ;;  %v6410_v26 = vpop.eup %6409  ;;  %v1803_v61 = vadd.f32 1.0, %v6408_v38 }
 0x768   :  { %6413 = vrcp.f32 %v1796_v39 }
 0x769   :  { %6415 = vrcp.f32 %v1803_v61 }
 0x771   :  { %v6412_v36 = vpop.eup %6411 }
 0x772   :  { %v6414_v18 = vpop.eup %6413  ;;  %v1807_v29 = vmul.f32 %v6412_v36, %v6410_v26 }
 0x773   :  { %v1806_v3 = vmul.f32 %v6414_v18, %v7579_v1  ;;  %v6416_v59 = vpop.eup %6415 }
 0x775   :  { %v7625_v60 = vadd.f32 %v1807_v29, %v1806_v3 }
 0x777   :  { %6417 = vtanh.f32 %v7625_v60 }
 0x781   :  { %v6418_v15 = vpop.eup %6417 }
 0x782   :  { %v7628_v46 = vmul.f32 %v6418_v15, %v6416_v59 }
 0x784   :  { %8596 = vst [vmem:[#allocation20_spill] sm:$0xff] %v7628_v46  ;;  %1883 = vmatmul.mubr.f32.vlgmr.msra.gmra.mrb[14].mxu0 %v7628_v46  ;;  %1954 = vmatmul.mubr.f32.vlgmr.msra.gmra.mrb[30].mxu1 %v7628_v46 }
 0x785   :  { %5617 = vmatpush1.bf16.msra.mxu0 %v6783_v6  ;;  %5649 = vmatpush1.bf16.msra.mxu1 %v7095_v62 }
 0x786   :  { %5619 = vmatprep.subr.bf16.mxu0 %v6788_v9  ;;  %5651 = vmatprep.subr.bf16.mxu1 %v7098_v0 }
 0x787   :  { %2059 = vmatprep.mubr.f32.mxu0 %v8590_v19  ;;  %2130 = vmatprep.mubr.f32.mxu1 %v8590_v19 }
 0x789   :  { %5621 = vmatpush1.bf16.msra.mxu0 %v6825_v21  ;;  %5653 = vmatpush1.bf16.msra.mxu1 %v7118_v11 }
 0x78a   :  { %5623 = vmatprep.subr.bf16.mxu0 %v6832_v23  ;;  %5655 = vmatprep.subr.bf16.mxu1 %v7121_v13 }
 0x78d   :  { %5625 = vmatpush1.bf16.msra.mxu0 %v6869_v35  ;;  %5657 = vmatpush1.bf16.msra.mxu1 %v7142_v20 }
 0x78e   :  { %5627 = vmatprep.subr.bf16.mxu0 %v6876_v37  ;;  %5659 = vmatprep.subr.bf16.mxu1 %v7145_v24 }
 0x791   :  { %5629 = vmatpush1.bf16.msra.mxu0 %v6913_v49  ;;  %5661 = vmatpush1.bf16.msra.mxu1 %v7164_v31 }
 0x792   :  { %5631 = vmatprep.subr.bf16.mxu0 %v6920_v51  ;;  %5663 = vmatprep.subr.bf16.mxu1 %v7167_v33 }
 0x795   :  { %5633 = vmatpush1.bf16.msra.mxu0 %v6957_v2  ;;  %5665 = vmatpush1.bf16.msra.mxu1 %v7186_v40 }
 0x796   :  { %5635 = vmatprep.subr.bf16.mxu0 %v6964_v4  ;;  %5667 = vmatprep.subr.bf16.mxu1 %v7189_v43 }
 0x799   :  { %5637 = vmatpush1.bf16.msra.mxu0 %v7001_v22  ;;  %5669 = vmatpush1.bf16.msra.mxu1 %v7208_v54 }
 0x79a   :  { %5639 = vmatprep.subr.bf16.mxu0 %v7008_v25  ;;  %5671 = vmatprep.subr.bf16.mxu1 %v7211_v55 }
 0x79d   :  { %5641 = vmatpush1.bf16.msra.mxu0 %v7045_v41  ;;  %5673 = vmatpush1.bf16.msra.mxu1 %v7230_v5 }
 0x79e   :  { %5643 = vmatprep.subr.bf16.mxu0 %v7052_v45  ;;  %5675 = vmatprep.subr.bf16.mxu1 %v7233_v8 }
 0x7a1   :  { %5645 = vmatpush1.bf16.msra.mxu0 %v7082_v58  ;;  %5677 = vmatpush1.bf16.msra.mxu1 %v7246_v17 }
 0x7a2   :  { %5679 = vmatprep.subr.bf16.mxu0 %v6746_v57  ;;  %5711 = vmatprep.subr.bf16.mxu1 %v7073_v53 }
 0x857   :  { %v1884_v1 = vpop.f32.mrb[14].mxu0  ;;  %v1955_v26 = vpop.f32.mrb[30].mxu1 }
 0x858   :  { %v6188_v10 = vadd.f32 %v1884_v1, %v7337_v50  ;;  %v1886_v16 = vpop.f32.mrb[15].mxu0  ;;  %v1957_v30 = vpop.f32.mrb[31].mxu1  ;;  %v6236_v29 = vadd.f32 %v1955_v26, %v7343_v27 }
 0x859   :  { %v6189_v7 = vadd.f32 %v1886_v16, %v7333_v47  ;;  %v6237_v36 = vadd.f32 %v1957_v30, %v7345_v44 }
 0x85a   :  { %v5011_v39 = vmul.f32 -1.442695, %v6188_v10 }
 0x85b   :  { %v5012_v38 = vmul.f32 -1.442695, %v6189_v7  ;;  %v5013_v18 = vmul.f32 -1.442695, %v6237_v36 }
 0x85c   :  { %6419 = vpow2.f32 %v5011_v39 }
 0x85d   :  { %6421 = vpow2.f32 %v5012_v38 }
 0x85e   :  { %6423 = vpow2.f32 %v5013_v18 }
 0x85f   :  { %6425 = vtanh.f32 %v6236_v29 }
 0x866   :  { %v6420_v61 = vpop.eup %6419 }
 0x867   :  { %v6422_v3 = vpop.eup %6421  ;;  %v1967_v59 = vadd.f32 1.0, %v6420_v61 }
 0x868   :  { %v1973_v15 = vadd.f32 1.0, %v6422_v3  ;;  %v6424_v1 = vpop.eup %6423 }
 0x869   :  { %6427 = vrcp.f32 %v1967_v59  ;;  %v6426_v46 = vpop.eup %6425  ;;  %v1980_v39 = vadd.f32 1.0, %v6424_v1 }
 0x86a   :  { %6429 = vrcp.f32 %v1973_v15 }
 0x86b   :  { %6431 = vrcp.f32 %v1980_v39 }
 0x873   :  { %v6428_v16 = vpop.eup %6427 }
 0x874   :  { %v6430_v10 = vpop.eup %6429  ;;  %v1984_v7 = vmul.f32 %v6428_v16, %v6426_v46  ;;  %v243_v46 = vadd.f32 %v7293_v14, %v7333_v47 }
 0x875   :  { %v1983_v38 = vmul.f32 %v6430_v10, %v7625_v60  ;;  %v6432_v26 = vpop.eup %6431  ;;  %v241_v60 = vadd.f32 %v7291_v63, %v7337_v50 }
 0x877   :  { %v7671_v30 = vadd.f32 %v1984_v7, %v1983_v38 }
 0x879   :  { %6433 = vtanh.f32 %v7671_v30 }
 0x883   :  { %v6434_v36 = vpop.eup %6433 }
 0x884   :  { %v7674_v18 = vmul.f32 %v6434_v36, %v6432_v26 }
 0x886   :  { %2060 = vmatmul.mubr.f32.vlgmr.msra.gmra.mrb[16].mxu0 %v7674_v18  ;;  %2131 = vmatmul.mubr.f32.vlgmr.msra.gmra.mrb[32].mxu1 %v7674_v18 }
 0x887   :  { %5681 = vmatpush1.bf16.msra.mxu0 %v6783_v6  ;;  %5713 = vmatpush1.bf16.msra.mxu1 %v7095_v62 }
 0x888   :  { %5683 = vmatprep.subr.bf16.mxu0 %v6788_v9  ;;  %5715 = vmatprep.subr.bf16.mxu1 %v7098_v0 }
 0x889   :  { %2236 = vmatprep.mubr.f32.mxu0 %v8590_v19  ;;  %2307 = vmatprep.mubr.f32.mxu1 %v8590_v19 }
 0x88b   :  { %5685 = vmatpush1.bf16.msra.mxu0 %v6825_v21  ;;  %5717 = vmatpush1.bf16.msra.mxu1 %v7118_v11 }
 0x88c   :  { %5687 = vmatprep.subr.bf16.mxu0 %v6832_v23  ;;  %5719 = vmatprep.subr.bf16.mxu1 %v7121_v13 }
 0x88f   :  { %5689 = vmatpush1.bf16.msra.mxu0 %v6869_v35  ;;  %5721 = vmatpush1.bf16.msra.mxu1 %v7142_v20 }
 0x890   :  { %5691 = vmatprep.subr.bf16.mxu0 %v6876_v37  ;;  %5723 = vmatprep.subr.bf16.mxu1 %v7145_v24 }
 0x893   :  { %5693 = vmatpush1.bf16.msra.mxu0 %v6913_v49  ;;  %5725 = vmatpush1.bf16.msra.mxu1 %v7164_v31 }
 0x894   :  { %5695 = vmatprep.subr.bf16.mxu0 %v6920_v51  ;;  %5727 = vmatprep.subr.bf16.mxu1 %v7167_v33 }
 0x897   :  { %5697 = vmatpush1.bf16.msra.mxu0 %v6957_v2  ;;  %5729 = vmatpush1.bf16.msra.mxu1 %v7186_v40 }
 0x898   :  { %5699 = vmatprep.subr.bf16.mxu0 %v6964_v4  ;;  %5731 = vmatprep.subr.bf16.mxu1 %v7189_v43 }
 0x89b   :  { %5701 = vmatpush1.bf16.msra.mxu0 %v7001_v22  ;;  %5733 = vmatpush1.bf16.msra.mxu1 %v7208_v54 }
 0x89c   :  { %5703 = vmatprep.subr.bf16.mxu0 %v7008_v25  ;;  %5735 = vmatprep.subr.bf16.mxu1 %v7211_v55 }
 0x89f   :  { %5705 = vmatpush1.bf16.msra.mxu0 %v7045_v41  ;;  %5737 = vmatpush1.bf16.msra.mxu1 %v7230_v5 }
 0x8a0   :  { %5707 = vmatprep.subr.bf16.mxu0 %v7052_v45  ;;  %5739 = vmatprep.subr.bf16.mxu1 %v7233_v8 }
 0x8a3   :  { %5709 = vmatpush1.bf16.msra.mxu0 %v7082_v58  ;;  %5741 = vmatpush1.bf16.msra.mxu1 %v7246_v17 }
 0x8a4   :  { %5743 = vmatprep.subr.bf16.mxu0 %v6746_v57  ;;  %5775 = vmatprep.subr.bf16.mxu1 %v7073_v53 }
 0x959   :  { %v2061_v29 = vpop.f32.mrb[16].mxu0  ;;  %v2132_v61 = vpop.f32.mrb[32].mxu1 }
 0x95a   :  { %v2137_v3 = vadd.f32 %v2061_v29, %v241_v60  ;;  %v2063_v59 = vpop.f32.mrb[17].mxu0  ;;  %v2134_v15 = vpop.f32.mrb[33].mxu1  ;;  %v6238_v38 = vadd.f32 %v2132_v61, %v7343_v27 }
 0x95b   :  { %v2138_v1 = vadd.f32 %v2063_v59, %v243_v46  ;;  %v6239_v7 = vadd.f32 %v2134_v15, %v7345_v44 }
 0x95c   :  { %v5014_v16 = vmul.f32 -1.442695, %v2137_v3 }
 0x95d   :  { %v5015_v10 = vmul.f32 -1.442695, %v2138_v1  ;;  %v5016_v39 = vmul.f32 -1.442695, %v6239_v7 }
 0x95e   :  { %6435 = vpow2.f32 %v5014_v16 }
 0x95f   :  { %6437 = vpow2.f32 %v5015_v10 }
 0x960   :  { %6439 = vpow2.f32 %v5016_v39  ;;  %v249_v39 = vadd.f32 %v7297_v42, %v7333_v47 }
 0x961   :  { %6441 = vtanh.f32 %v6238_v38 }
 0x968   :  { %v6436_v26 = vpop.eup %6435 }
 0x969   :  { %v6438_v63 = vpop.eup %6437  ;;  %v2144_v36 = vadd.f32 1.0, %v6436_v26 }
 0x96a   :  { %v2150_v14 = vadd.f32 1.0, %v6438_v63  ;;  %v6440_v60 = vpop.eup %6439 }
 0x96b   :  { %6443 = vrcp.f32 %v2144_v36  ;;  %v6442_v29 = vpop.eup %6441  ;;  %v2157_v1 = vadd.f32 1.0, %v6440_v60 }
 0x96c   :  { %6445 = vrcp.f32 %v2150_v14 }
 0x96d   :  { %6447 = vrcp.f32 %v2157_v1 }
 0x975   :  { %v6444_v46 = vpop.eup %6443 }
 0x976   :  { %v6446_v3 = vpop.eup %6445  ;;  %v2161_v59 = vmul.f32 %v6444_v46, %v6442_v29 }
 0x977   :  { %v2160_v16 = vmul.f32 %v6446_v3, %v7671_v30  ;;  %v6448_v61 = vpop.eup %6447  ;;  %v247_v30 = vadd.f32 %v7295_v28, %v7337_v50 }
 0x979   :  { %v7719_v15 = vadd.f32 %v2161_v59, %v2160_v16 }
 0x97b   :  { %6449 = vtanh.f32 %v7719_v15 }
 0x985   :  { %v6450_v10 = vpop.eup %6449 }
 0x986   :  { %v7722_v7 = vmul.f32 %v6450_v10, %v6448_v61 }
 0x988   :  { %2237 = vmatmul.mubr.f32.vlgmr.msra.gmra.mrb[18].mxu0 %v7722_v7  ;;  %2308 = vmatmul.mubr.f32.vlgmr.msra.gmra.mrb[34].mxu1 %v7722_v7 }
 0x989   :  { %5745 = vmatpush1.bf16.msra.mxu0 %v6783_v6  ;;  %5777 = vmatpush1.bf16.msra.mxu1 %v7095_v62 }
 0x98a   :  { %5747 = vmatprep.subr.bf16.mxu0 %v6788_v9  ;;  %5779 = vmatprep.subr.bf16.mxu1 %v7098_v0 }
 0x98b   :  { %2413 = vmatprep.mubr.f32.mxu0 %v8590_v19  ;;  %2484 = vmatprep.mubr.f32.mxu1 %v8590_v19 }
 0x98d   :  { %5749 = vmatpush1.bf16.msra.mxu0 %v6825_v21  ;;  %5781 = vmatpush1.bf16.msra.mxu1 %v7118_v11 }
 0x98e   :  { %5751 = vmatprep.subr.bf16.mxu0 %v6832_v23  ;;  %5783 = vmatprep.subr.bf16.mxu1 %v7121_v13 }
 0x991   :  { %5753 = vmatpush1.bf16.msra.mxu0 %v6869_v35  ;;  %5785 = vmatpush1.bf16.msra.mxu1 %v7142_v20 }
 0x992   :  { %5755 = vmatprep.subr.bf16.mxu0 %v6876_v37  ;;  %5787 = vmatprep.subr.bf16.mxu1 %v7145_v24 }
 0x995   :  { %5757 = vmatpush1.bf16.msra.mxu0 %v6913_v49  ;;  %5789 = vmatpush1.bf16.msra.mxu1 %v7164_v31 }
 0x996   :  { %5759 = vmatprep.subr.bf16.mxu0 %v6920_v51  ;;  %5791 = vmatprep.subr.bf16.mxu1 %v7167_v33 }
 0x999   :  { %5761 = vmatpush1.bf16.msra.mxu0 %v6957_v2  ;;  %5793 = vmatpush1.bf16.msra.mxu1 %v7186_v40 }
 0x99a   :  { %5763 = vmatprep.subr.bf16.mxu0 %v6964_v4  ;;  %5795 = vmatprep.subr.bf16.mxu1 %v7189_v43 }
 0x99d   :  { %5765 = vmatpush1.bf16.msra.mxu0 %v7001_v22  ;;  %5797 = vmatpush1.bf16.msra.mxu1 %v7208_v54 }
 0x99e   :  { %5767 = vmatprep.subr.bf16.mxu0 %v7008_v25  ;;  %5799 = vmatprep.subr.bf16.mxu1 %v7211_v55 }
 0x9a1   :  { %5769 = vmatpush1.bf16.msra.mxu0 %v7045_v41  ;;  %5801 = vmatpush1.bf16.msra.mxu1 %v7230_v5 }
 0x9a2   :  { %5771 = vmatprep.subr.bf16.mxu0 %v7052_v45  ;;  %5803 = vmatprep.subr.bf16.mxu1 %v7233_v8 }
 0x9a5   :  { %5773 = vmatpush1.bf16.msra.mxu0 %v7082_v58  ;;  %5805 = vmatpush1.bf16.msra.mxu1 %v7246_v17 }
 0x9a6   :  { %5807 = vmatprep.subr.bf16.mxu0 %v6746_v57  ;;  %5839 = vmatprep.subr.bf16.mxu1 %v7073_v53 }
 0xa5b   :  { %v2238_v38 = vpop.f32.mrb[18].mxu0  ;;  %v2309_v26 = vpop.f32.mrb[34].mxu1 }
 0xa5c   :  { %v2314_v63 = vadd.f32 %v2238_v38, %v247_v30  ;;  %v2240_v36 = vpop.f32.mrb[19].mxu0  ;;  %v2311_v14 = vpop.f32.mrb[35].mxu1  ;;  %v6240_v1 = vadd.f32 %v2309_v26, %v7343_v27 }
 0xa5d   :  { %v2315_v60 = vadd.f32 %v2240_v36, %v249_v39  ;;  %v6241_v3 = vadd.f32 %v2311_v14, %v7345_v44 }
 0xa5e   :  { %v5017_v29 = vmul.f32 -1.442695, %v2314_v63 }
 0xa5f   :  { %v5018_v46 = vmul.f32 -1.442695, %v2315_v60  ;;  %v5019_v59 = vmul.f32 -1.442695, %v6241_v3  ;;  %v255_v3 = vadd.f32 %v7301_v12, %v7333_v47 }
 0xa60   :  { %6451 = vpow2.f32 %v5017_v29 }
 0xa61   :  { %6453 = vpow2.f32 %v5018_v46 }
 0xa62   :  { %6455 = vpow2.f32 %v5019_v59 }
 0xa63   :  { %6457 = vtanh.f32 %v6240_v1 }
 0xa6a   :  { %v6452_v16 = vpop.eup %6451 }
 0xa6b   :  { %v6454_v28 = vpop.eup %6453  ;;  %v2321_v61 = vadd.f32 1.0, %v6452_v16 }
 0xa6c   :  { %v2327_v42 = vadd.f32 1.0, %v6454_v28  ;;  %v6456_v10 = vpop.eup %6455 }
 0xa6d   :  { %6459 = vrcp.f32 %v2321_v61  ;;  %v6458_v30 = vpop.eup %6457  ;;  %v2334_v36 = vadd.f32 1.0, %v6456_v10 }
 0xa6e   :  { %6461 = vrcp.f32 %v2327_v42 }
 0xa6f   :  { %6463 = vrcp.f32 %v2334_v36 }
 0xa77   :  { %v6460_v39 = vpop.eup %6459 }
 0xa78   :  { %v6462_v38 = vpop.eup %6461  ;;  %v2338_v63 = vmul.f32 %v6460_v39, %v6458_v30 }
 0xa79   :  { %v2337_v60 = vmul.f32 %v6462_v38, %v7719_v15  ;;  %v6464_v26 = vpop.eup %6463  ;;  %v253_v15 = vadd.f32 %v7299_v56, %v7337_v50 }
 0xa7b   :  { %v7767_v14 = vadd.f32 %v2338_v63, %v2337_v60 }
 0xa7d   :  { %6465 = vtanh.f32 %v7767_v14 }
 0xa87   :  { %v6466_v29 = vpop.eup %6465 }
 0xa88   :  { %v7770_v46 = vmul.f32 %v6466_v29, %v6464_v26 }
 0xa8a   :  { %2414 = vmatmul.mubr.f32.vlgmr.msra.gmra.mrb[20].mxu0 %v7770_v46  ;;  %2485 = vmatmul.mubr.f32.vlgmr.msra.gmra.mrb[36].mxu1 %v7770_v46 }
 0xa8b   :  { %5809 = vmatpush1.bf16.msra.mxu0 %v6783_v6  ;;  %5841 = vmatpush1.bf16.msra.mxu1 %v7095_v62 }
 0xa8c   :  { %5811 = vmatprep.subr.bf16.mxu0 %v6788_v9  ;;  %5843 = vmatprep.subr.bf16.mxu1 %v7098_v0 }
 0xa8d   :  { %2590 = vmatprep.mubr.f32.mxu0 %v8590_v19  ;;  %2661 = vmatprep.mubr.f32.mxu1 %v8590_v19 }
 0xa8f   :  { %5813 = vmatpush1.bf16.msra.mxu0 %v6825_v21  ;;  %5845 = vmatpush1.bf16.msra.mxu1 %v7118_v11 }
 0xa90   :  { %5815 = vmatprep.subr.bf16.mxu0 %v6832_v23  ;;  %5847 = vmatprep.subr.bf16.mxu1 %v7121_v13 }
 0xa93   :  { %5817 = vmatpush1.bf16.msra.mxu0 %v6869_v35  ;;  %5849 = vmatpush1.bf16.msra.mxu1 %v7142_v20 }
 0xa94   :  { %5819 = vmatprep.subr.bf16.mxu0 %v6876_v37  ;;  %5851 = vmatprep.subr.bf16.mxu1 %v7145_v24 }
 0xa97   :  { %5821 = vmatpush1.bf16.msra.mxu0 %v6913_v49  ;;  %5853 = vmatpush1.bf16.msra.mxu1 %v7164_v31 }
 0xa98   :  { %5823 = vmatprep.subr.bf16.mxu0 %v6920_v51  ;;  %5855 = vmatprep.subr.bf16.mxu1 %v7167_v33 }
 0xa9b   :  { %5825 = vmatpush1.bf16.msra.mxu0 %v6957_v2  ;;  %5857 = vmatpush1.bf16.msra.mxu1 %v7186_v40 }
 0xa9c   :  { %5827 = vmatprep.subr.bf16.mxu0 %v6964_v4  ;;  %5859 = vmatprep.subr.bf16.mxu1 %v7189_v43 }
 0xa9f   :  { %5829 = vmatpush1.bf16.msra.mxu0 %v7001_v22  ;;  %5861 = vmatpush1.bf16.msra.mxu1 %v7208_v54 }
 0xaa0   :  { %5831 = vmatprep.subr.bf16.mxu0 %v7008_v25  ;;  %5863 = vmatprep.subr.bf16.mxu1 %v7211_v55 }
 0xaa3   :  { %5833 = vmatpush1.bf16.msra.mxu0 %v7045_v41  ;;  %5865 = vmatpush1.bf16.msra.mxu1 %v7230_v5 }
 0xaa4   :  { %5835 = vmatprep.subr.bf16.mxu0 %v7052_v45  ;;  %5867 = vmatprep.subr.bf16.mxu1 %v7233_v8 }
 0xaa7   :  { %5837 = vmatpush1.bf16.msra.mxu0 %v7082_v58  ;;  %5869 = vmatpush1.bf16.msra.mxu1 %v7246_v17 }
 0xaa8   :  { %5871 = vmatprep.subr.bf16.mxu0 %v6746_v57  ;;  %5903 = vmatprep.subr.bf16.mxu1 %v7073_v53 }
 0xb5d   :  { %v2415_v59 = vpop.f32.mrb[20].mxu0  ;;  %v2486_v1 = vpop.f32.mrb[36].mxu1 }
 0xb5e   :  { %v2491_v16 = vadd.f32 %v2415_v59, %v253_v15  ;;  %v2417_v28 = vpop.f32.mrb[21].mxu0  ;;  %v2488_v61 = vpop.f32.mrb[37].mxu1  ;;  %v6242_v63 = vadd.f32 %v2486_v1, %v7343_v27 }
 0xb5f   :  { %v2492_v42 = vadd.f32 %v2417_v28, %v255_v3  ;;  %v6243_v39 = vadd.f32 %v2488_v61, %v7345_v44 }
 0xb60   :  { %v5020_v10 = vmul.f32 -1.442695, %v2491_v16 }
 0xb61   :  { %v5021_v30 = vmul.f32 -1.442695, %v2492_v42  ;;  %v5022_v38 = vmul.f32 -1.442695, %v6243_v39 }
 0xb62   :  { %6467 = vpow2.f32 %v5020_v10 }
 0xb63   :  { %6469 = vpow2.f32 %v5021_v30  ;;  %v261_v30 = vadd.f32 %v7305_v34, %v7333_v47 }
 0xb64   :  { %6471 = vpow2.f32 %v5022_v38 }
 0xb65   :  { %6473 = vtanh.f32 %v6242_v63 }
 0xb6c   :  { %v6468_v36 = vpop.eup %6467 }
 0xb6d   :  { %v6470_v56 = vpop.eup %6469  ;;  %v2498_v60 = vadd.f32 1.0, %v6468_v36 }
 0xb6e   :  { %v2504_v12 = vadd.f32 1.0, %v6470_v56  ;;  %v6472_v26 = vpop.eup %6471 }
 0xb6f   :  { %6475 = vrcp.f32 %v2498_v60  ;;  %v6474_v29 = vpop.eup %6473  ;;  %v2511_v16 = vadd.f32 1.0, %v6472_v26 }
 0xb70   :  { %6477 = vrcp.f32 %v2504_v12 }
 0xb71   :  { %6479 = vrcp.f32 %v2511_v16 }
 0xb79   :  { %v6476_v15 = vpop.eup %6475 }
 0xb7a   :  { %v6478_v3 = vpop.eup %6477  ;;  %v2515_v59 = vmul.f32 %v6476_v15, %v6474_v29 }
 0xb7b   :  { %v2514_v28 = vmul.f32 %v6478_v3, %v7767_v14  ;;  %v6480_v1 = vpop.eup %6479  ;;  %v259_v14 = vadd.f32 %v7303_v32, %v7337_v50 }
 0xb7d   :  { %v7815_v61 = vadd.f32 %v2515_v59, %v2514_v28 }
 0xb7f   :  { %6481 = vtanh.f32 %v7815_v61 }
 0xb89   :  { %v6482_v42 = vpop.eup %6481 }
 0xb8a   :  { %v7818_v10 = vmul.f32 %v6482_v42, %v6480_v1 }
 0xb8c   :  { %2591 = vmatmul.mubr.f32.vlgmr.msra.gmra.mrb[22].mxu0 %v7818_v10  ;;  %2662 = vmatmul.mubr.f32.vlgmr.msra.gmra.mrb[38].mxu1 %v7818_v10 }
 0xb8d   :  { %5873 = vmatpush1.bf16.msra.mxu0 %v6783_v6  ;;  %5905 = vmatpush1.bf16.msra.mxu1 %v7095_v62 }
 0xb8e   :  { %5875 = vmatprep.subr.bf16.mxu0 %v6788_v9  ;;  %5907 = vmatprep.subr.bf16.mxu1 %v7098_v0 }
 0xb8f   :  { %2767 = vmatprep.mubr.f32.mxu0 %v8590_v19  ;;  %2838 = vmatprep.mubr.f32.mxu1 %v8590_v19 }
 0xb91   :  { %5877 = vmatpush1.bf16.msra.mxu0 %v6825_v21  ;;  %5909 = vmatpush1.bf16.msra.mxu1 %v7118_v11 }
 0xb92   :  { %5879 = vmatprep.subr.bf16.mxu0 %v6832_v23  ;;  %5911 = vmatprep.subr.bf16.mxu1 %v7121_v13 }
 0xb95   :  { %5881 = vmatpush1.bf16.msra.mxu0 %v6869_v35  ;;  %5913 = vmatpush1.bf16.msra.mxu1 %v7142_v20 }
 0xb96   :  { %5883 = vmatprep.subr.bf16.mxu0 %v6876_v37  ;;  %5915 = vmatprep.subr.bf16.mxu1 %v7145_v24 }
 0xb99   :  { %5885 = vmatpush1.bf16.msra.mxu0 %v6913_v49  ;;  %5917 = vmatpush1.bf16.msra.mxu1 %v7164_v31 }
 0xb9a   :  { %5887 = vmatprep.subr.bf16.mxu0 %v6920_v51  ;;  %5919 = vmatprep.subr.bf16.mxu1 %v7167_v33 }
 0xb9d   :  { %5889 = vmatpush1.bf16.msra.mxu0 %v6957_v2  ;;  %5921 = vmatpush1.bf16.msra.mxu1 %v7186_v40 }
 0xb9e   :  { %5891 = vmatprep.subr.bf16.mxu0 %v6964_v4  ;;  %5923 = vmatprep.subr.bf16.mxu1 %v7189_v43 }
 0xba1   :  { %5893 = vmatpush1.bf16.msra.mxu0 %v7001_v22  ;;  %5925 = vmatpush1.bf16.msra.mxu1 %v7208_v54 }
 0xba2   :  { %5895 = vmatprep.subr.bf16.mxu0 %v7008_v25  ;;  %5927 = vmatprep.subr.bf16.mxu1 %v7211_v55 }
 0xba5   :  { %5897 = vmatpush1.bf16.msra.mxu0 %v7045_v41  ;;  %5929 = vmatpush1.bf16.msra.mxu1 %v7230_v5 }
 0xba6   :  { %5899 = vmatprep.subr.bf16.mxu0 %v7052_v45  ;;  %5931 = vmatprep.subr.bf16.mxu1 %v7233_v8 }
 0xba9   :  { %5901 = vmatpush1.bf16.msra.mxu0 %v7082_v58  ;;  %5933 = vmatpush1.bf16.msra.mxu1 %v7246_v17 }
 0xbaa   :  { %5935 = vmatprep.subr.bf16.mxu0 %v6746_v57  ;;  %5967 = vmatprep.subr.bf16.mxu1 %v7073_v53 }
 0xc5f   :  { %v2592_v39 = vpop.f32.mrb[22].mxu0  ;;  %v2663_v38 = vpop.f32.mrb[38].mxu1 }
 0xc60   :  { %v2668_v63 = vadd.f32 %v2592_v39, %v259_v14  ;;  %v2594_v36 = vpop.f32.mrb[23].mxu0  ;;  %v2665_v56 = vpop.f32.mrb[39].mxu1  ;;  %v6244_v3 = vadd.f32 %v2663_v38, %v7343_v27 }
 0xc61   :  { %v2669_v60 = vadd.f32 %v2594_v36, %v261_v30  ;;  %v6245_v29 = vadd.f32 %v2665_v56, %v7345_v44 }
 0xc62   :  { %v5023_v12 = vmul.f32 -1.442695, %v2668_v63 }
 0xc63   :  { %v5024_v26 = vmul.f32 -1.442695, %v2669_v60  ;;  %v5025_v15 = vmul.f32 -1.442695, %v6245_v29 }
 0xc64   :  { %6483 = vpow2.f32 %v5023_v12  ;;  %v267_v12 = vadd.f32 %v7309_v52, %v7333_v47 }
 0xc65   :  { %6485 = vpow2.f32 %v5024_v26 }
 0xc66   :  { %6487 = vpow2.f32 %v5025_v15 }
 0xc67   :  { %6489 = vtanh.f32 %v6244_v3 }
 0xc6e   :  { %v6484_v59 = vpop.eup %6483 }
 0xc6f   :  { %v6486_v32 = vpop.eup %6485  ;;  %v2675_v16 = vadd.f32 1.0, %v6484_v59 }
 0xc70   :  { %v2681_v34 = vadd.f32 1.0, %v6486_v32  ;;  %v6488_v28 = vpop.eup %6487 }
 0xc71   :  { %6491 = vrcp.f32 %v2675_v16  ;;  %v6490_v1 = vpop.eup %6489  ;;  %v2688_v39 = vadd.f32 1.0, %v6488_v28 }
 0xc72   :  { %6493 = vrcp.f32 %v2681_v34 }
 0xc73   :  { %6495 = vrcp.f32 %v2688_v39 }
 0xc7b   :  { %v6492_v42 = vpop.eup %6491 }
 0xc7c   :  { %v6494_v14 = vpop.eup %6493  ;;  %v2692_v30 = vmul.f32 %v6492_v42, %v6490_v1 }
 0xc7d   :  { %v2691_v63 = vmul.f32 %v6494_v14, %v7815_v61  ;;  %v6496_v38 = vpop.eup %6495  ;;  %v265_v61 = vadd.f32 %v7307_v48, %v7337_v50 }
 0xc7f   :  { %v7863_v36 = vadd.f32 %v2692_v30, %v2691_v63 }
 0xc81   :  { %6497 = vtanh.f32 %v7863_v36 }
 0xc8b   :  { %v6498_v56 = vpop.eup %6497 }
 0xc8c   :  { %v7866_v60 = vmul.f32 %v6498_v56, %v6496_v38 }
 0xc8e   :  { %2768 = vmatmul.mubr.f32.vlgmr.msra.gmra.mrb[24].mxu0 %v7866_v60  ;;  %2839 = vmatmul.mubr.f32.vlgmr.msra.gmra.mrb[40].mxu1 %v7866_v60 }
 0xc8f   :  { %5937 = vmatpush1.bf16.msra.mxu0 %v6783_v6  ;;  %5969 = vmatpush1.bf16.msra.mxu1 %v7095_v62 }
 0xc90   :  { %5939 = vmatprep.subr.bf16.mxu0 %v6788_v9  ;;  %5971 = vmatprep.subr.bf16.mxu1 %v7098_v0 }
 0xc91   :  { %2944 = vmatprep.mubr.f32.mxu0 %v8590_v19  ;;  %3015 = vmatprep.mubr.f32.mxu1 %v8590_v19 }
 0xc93   :  { %5941 = vmatpush1.bf16.msra.mxu0 %v6825_v21  ;;  %5973 = vmatpush1.bf16.msra.mxu1 %v7118_v11 }
 0xc94   :  { %5943 = vmatprep.subr.bf16.mxu0 %v6832_v23  ;;  %5975 = vmatprep.subr.bf16.mxu1 %v7121_v13 }
 0xc97   :  { %5945 = vmatpush1.bf16.msra.mxu0 %v6869_v35  ;;  %5977 = vmatpush1.bf16.msra.mxu1 %v7142_v20 }
 0xc98   :  { %5947 = vmatprep.subr.bf16.mxu0 %v6876_v37  ;;  %5979 = vmatprep.subr.bf16.mxu1 %v7145_v24 }
 0xc9b   :  { %5949 = vmatpush1.bf16.msra.mxu0 %v6913_v49  ;;  %5981 = vmatpush1.bf16.msra.mxu1 %v7164_v31 }
 0xc9c   :  { %5951 = vmatprep.subr.bf16.mxu0 %v6920_v51  ;;  %5983 = vmatprep.subr.bf16.mxu1 %v7167_v33 }
 0xc9f   :  { %5953 = vmatpush1.bf16.msra.mxu0 %v6957_v2  ;;  %5985 = vmatpush1.bf16.msra.mxu1 %v7186_v40 }
 0xca0   :  { %5955 = vmatprep.subr.bf16.mxu0 %v6964_v4  ;;  %5987 = vmatprep.subr.bf16.mxu1 %v7189_v43 }
 0xca3   :  { %5957 = vmatpush1.bf16.msra.mxu0 %v7001_v22  ;;  %5989 = vmatpush1.bf16.msra.mxu1 %v7208_v54 }
 0xca4   :  { %5959 = vmatprep.subr.bf16.mxu0 %v7008_v25  ;;  %5991 = vmatprep.subr.bf16.mxu1 %v7211_v55 }
 0xca7   :  { %5961 = vmatpush1.bf16.msra.mxu0 %v7045_v41  ;;  %5993 = vmatpush1.bf16.msra.mxu1 %v7230_v5 }
 0xca8   :  { %5963 = vmatprep.subr.bf16.mxu0 %v7052_v45  ;;  %5995 = vmatprep.subr.bf16.mxu1 %v7233_v8 }
 0xcab   :  { %5965 = vmatpush1.bf16.msra.mxu0 %v7082_v58  ;;  %5997 = vmatpush1.bf16.msra.mxu1 %v7246_v17 }
 0xcac   :  { %5999 = vmatprep.subr.bf16.mxu0 %v6746_v57  ;;  %6031 = vmatprep.subr.bf16.mxu1 %v7073_v53 }
 0xd61   :  { %v2769_v26 = vpop.f32.mrb[24].mxu0  ;;  %v2840_v29 = vpop.f32.mrb[40].mxu1 }
 0xd62   :  { %v2845_v15 = vadd.f32 %v2769_v26, %v265_v61  ;;  %v2771_v3 = vpop.f32.mrb[25].mxu0  ;;  %v2842_v59 = vpop.f32.mrb[41].mxu1  ;;  %v6246_v42 = vadd.f32 %v2840_v29, %v7343_v27 }
 0xd63   :  { %v2846_v32 = vadd.f32 %v2771_v3, %v267_v12  ;;  %v6247_v28 = vadd.f32 %v2842_v59, %v7345_v44 }
 0xd64   :  { %v5026_v16 = vmul.f32 -1.442695, %v2845_v15 }
 0xd65   :  { %v5027_v34 = vmul.f32 -1.442695, %v2846_v32  ;;  %v5028_v1 = vmul.f32 -1.442695, %v6247_v28 }
 0xd66   :  { %6499 = vpow2.f32 %v5026_v16  ;;  %v8598_v16 = vld [vmem:[#allocation8_spill] sm:$0xff] }
 0xd67   :  { %6501 = vpow2.f32 %v5027_v34  ;;  %v273_v34 = vadd.f32 %v8598_v16, %v7333_v47 }
 0xd68   :  { %6503 = vpow2.f32 %v5028_v1 }
 0xd69   :  { %6505 = vtanh.f32 %v6246_v42 }
 0xd70   :  { %v6500_v14 = vpop.eup %6499 }
 0xd71   :  { %v6502_v48 = vpop.eup %6501  ;;  %v2852_v30 = vadd.f32 1.0, %v6500_v14 }
 0xd72   :  { %v2858_v52 = vadd.f32 1.0, %v6502_v48  ;;  %v6504_v39 = vpop.eup %6503 }
 0xd73   :  { %6507 = vrcp.f32 %v2852_v30  ;;  %v6506_v63 = vpop.eup %6505  ;;  %v2865_v12 = vadd.f32 1.0, %v6504_v39 }
 0xd74   :  { %6509 = vrcp.f32 %v2858_v52 }
 0xd75   :  { %6511 = vrcp.f32 %v2865_v12 }
 0xd7d   :  { %v6508_v38 = vpop.eup %6507 }
 0xd7e   :  { %v6510_v56 = vpop.eup %6509  ;;  %v2869_v61 = vmul.f32 %v6508_v38, %v6506_v63 }
 0xd7f   :  { %v2868_v26 = vmul.f32 %v6510_v56, %v7863_v36  ;;  %v6512_v29 = vpop.eup %6511  ;;  %v8597_v36 = vld [vmem:[#allocation7_spill] sm:$0xff] }
 0xd80   :  { %v271_v32 = vadd.f32 %v8597_v36, %v7337_v50 }
 0xd81   :  { %v7911_v15 = vadd.f32 %v2869_v61, %v2868_v26 }
 0xd83   :  { %6513 = vtanh.f32 %v7911_v15 }
 0xd8d   :  { %v6514_v3 = vpop.eup %6513 }
 0xd8e   :  { %v7914_v59 = vmul.f32 %v6514_v3, %v6512_v29 }
 0xd90   :  { %2945 = vmatmul.mubr.f32.vlgmr.msra.gmra.mrb[26].mxu0 %v7914_v59  ;;  %3016 = vmatmul.mubr.f32.vlgmr.msra.gmra.mrb[42].mxu1 %v7914_v59 }
 0xd91   :  { %6001 = vmatpush1.bf16.msra.mxu0 %v6783_v6  ;;  %6033 = vmatpush1.bf16.msra.mxu1 %v7095_v62 }
 0xd92   :  { %6003 = vmatprep.subr.bf16.mxu0 %v6788_v9  ;;  %6035 = vmatprep.subr.bf16.mxu1 %v7098_v0 }
 0xd93   :  { %3121 = vmatprep.mubr.f32.mxu0 %v8590_v19  ;;  %3192 = vmatprep.mubr.f32.mxu1 %v8590_v19 }
 0xd95   :  { %6005 = vmatpush1.bf16.msra.mxu0 %v6825_v21  ;;  %6037 = vmatpush1.bf16.msra.mxu1 %v7118_v11 }
 0xd96   :  { %6007 = vmatprep.subr.bf16.mxu0 %v6832_v23  ;;  %6039 = vmatprep.subr.bf16.mxu1 %v7121_v13 }
 0xd99   :  { %6009 = vmatpush1.bf16.msra.mxu0 %v6869_v35  ;;  %6041 = vmatpush1.bf16.msra.mxu1 %v7142_v20 }
 0xd9a   :  { %6011 = vmatprep.subr.bf16.mxu0 %v6876_v37  ;;  %6043 = vmatprep.subr.bf16.mxu1 %v7145_v24 }
 0xd9d   :  { %6013 = vmatpush1.bf16.msra.mxu0 %v6913_v49  ;;  %6045 = vmatpush1.bf16.msra.mxu1 %v7164_v31 }
 0xd9e   :  { %6015 = vmatprep.subr.bf16.mxu0 %v6920_v51  ;;  %6047 = vmatprep.subr.bf16.mxu1 %v7167_v33 }
 0xda1   :  { %6017 = vmatpush1.bf16.msra.mxu0 %v6957_v2  ;;  %6049 = vmatpush1.bf16.msra.mxu1 %v7186_v40 }
 0xda2   :  { %6019 = vmatprep.subr.bf16.mxu0 %v6964_v4  ;;  %6051 = vmatprep.subr.bf16.mxu1 %v7189_v43 }
 0xda5   :  { %6021 = vmatpush1.bf16.msra.mxu0 %v7001_v22  ;;  %6053 = vmatpush1.bf16.msra.mxu1 %v7208_v54 }
 0xda6   :  { %6023 = vmatprep.subr.bf16.mxu0 %v7008_v25  ;;  %6055 = vmatprep.subr.bf16.mxu1 %v7211_v55 }
 0xda9   :  { %6025 = vmatpush1.bf16.msra.mxu0 %v7045_v41  ;;  %6057 = vmatpush1.bf16.msra.mxu1 %v7230_v5 }
 0xdaa   :  { %6027 = vmatprep.subr.bf16.mxu0 %v7052_v45  ;;  %6059 = vmatprep.subr.bf16.mxu1 %v7233_v8 }
 0xdad   :  { %6029 = vmatpush1.bf16.msra.mxu0 %v7082_v58  ;;  %6061 = vmatpush1.bf16.msra.mxu1 %v7246_v17 }
 0xdae   :  { %6063 = vmatprep.subr.bf16.mxu0 %v6746_v57  ;;  %6095 = vmatprep.subr.bf16.mxu1 %v7073_v53 }
 0xe63   :  { %v2946_v28 = vpop.f32.mrb[26].mxu0  ;;  %v3017_v1 = vpop.f32.mrb[42].mxu1 }
 0xe64   :  { %v3022_v42 = vadd.f32 %v2946_v28, %v271_v32  ;;  %v2948_v14 = vpop.f32.mrb[27].mxu0  ;;  %v3019_v48 = vpop.f32.mrb[43].mxu1  ;;  %v6248_v53 = vadd.f32 %v3017_v1, %v7343_v27 }
 0xe65   :  { %v3023_v30 = vadd.f32 %v2948_v14, %v273_v34  ;;  %v6249_v57 = vadd.f32 %v3019_v48, %v7345_v44  ;;  %v3424_v48 = vld [vmem:[%s8565_s4 + $0x10] sm:$0xff] }
 0xe66   :  { %v5029_v52 = vmul.f32 -1.442695, %v3022_v42 }
 0xe67   :  { %v5030_v39 = vmul.f32 -1.442695, %v3023_v30  ;;  %v5031_v63 = vmul.f32 -1.442695, %v6249_v57  ;;  %v3427_v30 = vld [vmem:[%s8565_s4 + $0x28] sm:$0xff] }
 0xe68   :  { %6515 = vpow2.f32 %v5029_v52  ;;  %v3429_v52 = vld [vmem:[%s8565_s4 + $0x38] sm:$0xff] }
 0xe69   :  { %6517 = vpow2.f32 %v5030_v39 }
 0xe6a   :  { %6519 = vpow2.f32 %v5031_v63 }
 0xe6b   :  { %6521 = vtanh.f32 %v6248_v53 }
 0xe72   :  { %v6516_v38 = vpop.eup %6515 }
 0xe73   :  { %v6518_v56 = vpop.eup %6517  ;;  %v3029_v61 = vadd.f32 1.0, %v6516_v38  ;;  %v6130_v38 = vpack.c.bf16 %v3429_v52, %v3427_v30  ;;  %v8606_v30 = vld [vmem:[#allocation19_spill] sm:$0xff]  ;;  %v8607_v52 = vld [vmem:[#allocation20_spill] sm:$0xff] }
 0xe74   :  { %v3035_v12 = vadd.f32 1.0, %v6518_v56  ;;  %v6520_v26 = vpop.eup %6519  ;;  %v3426_v56 = vld [vmem:[%s8565_s4 + $0x20] sm:$0xff] }
 0xe75   :  { %6523 = vrcp.f32 %v3029_v61  ;;  %v6522_v29 = vpop.eup %6521  ;;  %v3042_v16 = vadd.f32 1.0, %v6520_v26  ;;  %v3428_v61 = vld [vmem:[%s8565_s4 + $0x30] sm:$0xff]  ;;  %v3433_v26 = vld [vmem:[%s8565_s4 + $0x58] sm:$0xff] }
 0xe76   :  { %6525 = vrcp.f32 %v3035_v12  ;;  %v3431_v12 = vld [vmem:[%s8565_s4 + $0x48] sm:$0xff] }
 0xe77   :  { %6527 = vrcp.f32 %v3042_v16  ;;  %v3435_v16 = vld [vmem:[%s8565_s4 + $0x68] sm:$0xff] }
 0xe7f   :  { %v6524_v3 = vpop.eup %6523 }
 0xe80   :  { %v6526_v36 = vpop.eup %6525  ;;  %v3046_v32 = vmul.f32 %v6524_v3, %v6522_v29  ;;  %v6132_v29 = vpack.c.bf16 %v3428_v61, %v3426_v56  ;;  %v6134_v3 = vpack.c.bf16 %v3433_v26, %v3431_v12 }
 0xe81   :  { %v3045_v34 = vmul.f32 %v6526_v36, %v7911_v15  ;;  %v6528_v1 = vpop.eup %6527  ;;  %v3422_v15 = vld [vmem:[%s8565_s4] sm:$0xff] }
 0xe82   :  { %v6128_v63 = vpack.c.bf16 %v3424_v48, %v3422_v15  ;;  %v3430_v36 = vld [vmem:[%s8565_s4 + $0x40] sm:$0xff]  ;;  %v8604_v15 = vld [vmem:[#allocation17_spill] sm:$0xff]  ;;  %v8605_v48 = vld [vmem:[#allocation18_spill] sm:$0xff] }
 0xe83   :  { %v7959_v28 = vadd.f32 %v3046_v32, %v3045_v34  ;;  %v3432_v32 = vld [vmem:[%s8565_s4 + $0x50] sm:$0xff]  ;;  %v3437_v34 = vld [vmem:[%s8565_s4 + $0x78] sm:$0xff] }
 0xe85   :  { %6529 = vtanh.f32 %v7959_v28 }
 0xe8f   :  { %v6530_v42 = vpop.eup %6529 }
 0xe90   :  { %v7962_v14 = vmul.f32 %v6530_v42, %v6528_v1  ;;  %v6138_v1 = vpack.c.bf16 %v3437_v34, %v3435_v16  ;;  %v3434_v42 = vld [vmem:[%s8565_s4 + $0x60] sm:$0xff] }
 0xe92   :  { %3122 = vmatmul.mubr.f32.vlgmr.msra.gmra.mrb[28].mxu0 %v7962_v14  ;;  %3193 = vmatmul.mubr.f32.vlgmr.msra.gmra.mrb[44].mxu1 %v7962_v14 }
 0xe93   :  { %6065 = vmatpush1.bf16.msra.mxu0 %v6783_v6  ;;  %6097 = vmatpush1.bf16.msra.mxu1 %v7095_v62  ;;  %v3423_v6 = vld [vmem:[%s8565_s4 + $0x8] sm:$0xff] }
 0xe94   :  { %6067 = vmatprep.subr.bf16.mxu0 %v6788_v9  ;;  %6099 = vmatprep.subr.bf16.mxu1 %v7098_v0  ;;  %v3425_v9 = vld [vmem:[%s8565_s4 + $0x18] sm:$0xff] }
 0xe95   :  { %3298 = vmatprep.mubr.f32.mxu0 %v8590_v19  ;;  %3369 = vmatprep.mubr.f32.mxu1 %v8590_v19 }
 0xe97   :  { %6069 = vmatpush1.bf16.msra.mxu0 %v6825_v21  ;;  %6101 = vmatpush1.bf16.msra.mxu1 %v7118_v11  ;;  %v6126_v21 = vpack.c.bf16 %v3425_v9, %v3423_v6  ;;  %v3436_v6 = vld [vmem:[%s8565_s4 + $0x70] sm:$0xff]  ;;  %v3439_v9 = vld [vmem:[%s8565_s4 + $0x88] sm:$0xff] }
 0xe98   :  { %6071 = vmatprep.subr.bf16.mxu0 %v6832_v23  ;;  %6103 = vmatprep.subr.bf16.mxu1 %v7121_v13  ;;  %v8599_v23 = vld [vmem:[#allocation9_spill] sm:$0xff] }
 0xe9b   :  { %6073 = vmatpush1.bf16.msra.mxu0 %v6869_v35  ;;  %6105 = vmatpush1.bf16.msra.mxu1 %v7142_v20  ;;  %v277_v35 = vadd.f32 %v8599_v23, %v7337_v50  ;;  %v6140_v23 = vpack.c.bf16 %v3436_v6, %v3434_v42 }
 0xe9c   :  { %6075 = vmatprep.subr.bf16.mxu0 %v6876_v37  ;;  %6107 = vmatprep.subr.bf16.mxu1 %v7145_v24  ;;  %v8600_v37 = vld [vmem:[#allocation10_spill] sm:$0xff] }
 0xe9f   :  { %6077 = vmatpush1.bf16.msra.mxu0 %v6913_v49  ;;  %6109 = vmatpush1.bf16.msra.mxu1 %v7164_v31  ;;  %v279_v49 = vadd.f32 %v8600_v37, %v7333_v47  ;;  %v3438_v37 = vld [vmem:[%s8565_s4 + $0x80] sm:$0xff] }
 0xea0   :  { %6079 = vmatprep.subr.bf16.mxu0 %v6920_v51  ;;  %6111 = vmatprep.subr.bf16.mxu1 %v7167_v33 }
 0xea3   :  { %6081 = vmatpush1.bf16.msra.mxu0 %v6957_v2  ;;  %6113 = vmatpush1.bf16.msra.mxu1 %v7186_v40 }
 0xea4   :  { %6083 = vmatprep.subr.bf16.mxu0 %v6964_v4  ;;  %6115 = vmatprep.subr.bf16.mxu1 %v7189_v43 }
 0xea7   :  { %6085 = vmatpush1.bf16.msra.mxu0 %v7001_v22  ;;  %6117 = vmatpush1.bf16.msra.mxu1 %v7208_v54 }
 0xea8   :  { %6087 = vmatprep.subr.bf16.mxu0 %v7008_v25  ;;  %6119 = vmatprep.subr.bf16.mxu1 %v7211_v55 }
 0xeab   :  { %6089 = vmatpush1.bf16.msra.mxu0 %v7045_v41  ;;  %6121 = vmatpush1.bf16.msra.mxu1 %v7230_v5 }
 0xeac   :  { %6091 = vmatprep.subr.bf16.mxu0 %v7052_v45  ;;  %6123 = vmatprep.subr.bf16.mxu1 %v7233_v8 }
 0xeaf   :  { %6093 = vmatpush1.bf16.msra.mxu0 %v7082_v58  ;;  %6125 = vmatpush1.bf16.msra.mxu1 %v7246_v17 }
 0xeb0   :  { %6127 = vmatprep.subr.bf16.mxu0 %v6126_v21  ;;  %v3441_v21 = vld [vmem:[%s8565_s4 + $0x98] sm:$0xff] }
 0xf65   :  { %v3123_v51 = vpop.f32.mrb[28].mxu0  ;;  %v3194_v2 = vpop.f32.mrb[44].mxu1 }
 0xf66   :  { %v3199_v4 = vadd.f32 %v3123_v51, %v277_v35  ;;  %v3125_v22 = vpop.f32.mrb[29].mxu0  ;;  %v3196_v25 = vpop.f32.mrb[45].mxu1  ;;  %v6250_v11 = vadd.f32 %v3194_v2, %v7343_v27  ;;  %v6142_v35 = vpack.c.bf16 %v3441_v21, %v3439_v9  ;;  %v3443_v51 = vld [vmem:[%s8565_s4 + $0xa8] sm:$0xff]  ;;  %v3445_v2 = vld [vmem:[%s8565_s4 + $0xb8] sm:$0xff] }
 0xf67   :  { %v3200_v41 = vadd.f32 %v3125_v22, %v279_v49  ;;  %v6251_v62 = vadd.f32 %v3196_v25, %v7345_v44  ;;  %v3440_v49 = vld [vmem:[%s8565_s4 + $0x90] sm:$0xff]  ;;  %v6146_v22 = vpack.c.bf16 %v3445_v2, %v3443_v51  ;;  %v3442_v25 = vld [vmem:[%s8565_s4 + $0xa0] sm:$0xff] }
 0xf68   :  { %v5032_v45 = vmul.f32 -1.442695, %v3199_v4  ;;  %v6144_v4 = vpack.c.bf16 %v3440_v49, %v3438_v37 }
 0xf69   :  { %v5033_v58 = vmul.f32 -1.442695, %v3200_v41  ;;  %v5034_v0 = vmul.f32 -1.442695, %v6251_v62  ;;  %v3444_v41 = vld [vmem:[%s8565_s4 + $0xb0] sm:$0xff] }
 0xf6a   :  { %6531 = vpow2.f32 %v5032_v45  ;;  %v3447_v45 = vld [vmem:[%s8565_s4 + $0xc8] sm:$0xff]  ;;  %v6148_v62 = vpack.c.bf16 %v3444_v41, %v3442_v25 }
 0xf6b   :  { %6533 = vpow2.f32 %v5033_v58  ;;  %v3449_v58 = vld [vmem:[%s8565_s4 + $0xd8] sm:$0xff] }
 0xf6c   :  { %6535 = vpow2.f32 %v5034_v0  ;;  %v6150_v0 = vpack.c.bf16 %v3449_v58, %v3447_v45 }
 0xf6d   :  { %6537 = vtanh.f32 %v6250_v11  ;;  %v3446_v11 = vld [vmem:[%s8565_s4 + $0xc0] sm:$0xff] }
 0xf74   :  { %v6532_v13 = vpop.eup %6531 }
 0xf75   :  { %v6534_v20 = vpop.eup %6533  ;;  %v3206_v24 = vadd.f32 1.0, %v6532_v13  ;;  %v3448_v13 = vld [vmem:[%s8565_s4 + $0xd0] sm:$0xff] }
 0xf76   :  { %v3212_v31 = vadd.f32 1.0, %v6534_v20  ;;  %v6536_v33 = vpop.eup %6535  ;;  %v3451_v20 = vld [vmem:[%s8565_s4 + $0xe8] sm:$0xff] }
 0xf77   :  { %6539 = vrcp.f32 %v3206_v24  ;;  %v6538_v40 = vpop.eup %6537  ;;  %v3219_v5 = vadd.f32 1.0, %v6536_v33  ;;  %v3453_v24 = vld [vmem:[%s8565_s4 + $0xf8] sm:$0xff] }
 0xf78   :  { %6541 = vrcp.f32 %v3212_v31  ;;  %v6152_v31 = vpack.c.bf16 %v3448_v13, %v3446_v11  ;;  %v6154_v33 = vpack.c.bf16 %v3453_v24, %v3451_v20  ;;  %v8613_v13 = vlaneseq }
 0xf79   :  { %6543 = vrcp.f32 %v3219_v5  ;;  %v8602_v5 = vld [vmem:[#allocation15_spill] sm:$0xff] }
 0xf7a   :  { %vm8167_vm0 = vcmp.lt.s32.totalorder %v8613_v13, 256 }
 0xf81   :  { %v6540_v43 = vpop.eup %6539 }
 0xf82   :  { %v6542_v54 = vpop.eup %6541  ;;  %v3223_v55 = vmul.f32 %v6540_v43, %v6538_v40  ;;  %v3450_v40 = vld [vmem:[%s8565_s4 + $0xe0] sm:$0xff]  ;;  %v3452_v43 = vld [vmem:[%s8565_s4 + $0xf0] sm:$0xff] }
 0xf83   :  { %v3222_v8 = vmul.f32 %v6542_v54, %v7959_v28  ;;  %v6544_v39 = vpop.eup %6543  ;;  %v6136_v28 = vpack.c.bf16 %v3432_v32, %v3430_v36  ;;  %v6156_v54 = vpack.c.bf16 %v3452_v43, %v3450_v40  ;;  %v3454_v36 = vld [vmem:[%s8566_s5] sm:$0x3]  ;;  %s6589_s5 = smov [#allocation4]  }
 0xf84   :  { %s4979_s24 = sshll.u32 %s6589_s5, 4  ;;  %s4980_s24 = int_to_ptr.vmem [resolvable:$true] %s4979_s24 }
 0xf85   :  { %v8011_v17 = vadd.f32 %v3223_v55, %v3222_v8  ;;  %v8601_v55 = vld [vmem:[#allocation14_spill] sm:$0xff]  ;;  %v8603_v8 = vld [vmem:[#allocation16_spill] sm:$0xff]  ;;  %s6563_s25 = scalar_lea.vmem %s4980_s24, 4096  ;;  %p6568_p1 = scmp.lt.s32.totalorder %s4980_s24, %s4980_s24 }
 0xf86   :  { %p6564_p0 = scmp.ne.s32.totalorder %s4980_s24, %s6563_s25  ;;  %p6569_p2 = scmp.lt.s32.totalorder %s6563_s25, %s6563_s25 }
 0xf87   :  { %6545 = vtanh.f32 %v8011_v17 }
 0xf88   :  { %p6570_p3 = por %p6569_p2, %p6568_p1 }
 0xf8a   :  { %p6571_p4 = pnand %p6570_p3, %p6564_p0 }
 0xf91   :  { %v6546_v57 = vpop.eup %6545 }
 0xf92   :  { %v8026_v53 = vmul.f32 %v6546_v57, %v6544_v39 }
 0xf94   :  { %3299 = vmatmul.mubr.f32.vlgmr.msra.gmra.mrb[30].mxu0 %v8026_v53  ;;  %3370 = vmatmul.mubr.f32.vlgmr.msra.gmra.mrb[46].mxu1 %v8026_v53 }
 0xf95   :  { %6129 = vmatpush1.bf16.msra.mxu0 %v6128_v63  ;;  %3530 = vmatprep.mubr.f32.mxu0 %v8590_v19 }
 0xf96   :  { %6131 = vmatprep.subr.bf16.mxu0 %v6130_v38 }
 0xf99   :  { %6133 = vmatpush1.bf16.msra.mxu0 %v6132_v29  ;;  %v6588_v29 = vmov 1966171168  }
 0xf9a   :  { %6135 = vmatprep.subr.bf16.mxu0 %v6134_v3  ;;  %v3632_v3 = vunpack.c.l.s4 %v6588_v29 }
 0xf9c   :  { %v3633_v42 = vunpack.c.0.s8 %v3632_v3 }
 0xf9d   :  { %6137 = vmatpush1.bf16.msra.mxu0 %v6136_v28 }
 0xf9e   :  { %6139 = vmatprep.subr.bf16.mxu0 %v6138_v1 }
 0xfa1   :  { %6141 = vmatpush1.bf16.msra.mxu0 %v6140_v23 }
 0xfa2   :  { %6143 = vmatprep.subr.bf16.mxu0 %v6142_v35 }
 0xfa5   :  { %6145 = vmatpush1.bf16.msra.mxu0 %v6144_v4 }
 0xfa6   :  { %6147 = vmatprep.subr.bf16.mxu0 %v6146_v22 }
 0xfa9   :  { %6149 = vmatpush1.bf16.msra.mxu0 %v6148_v62 }
 0xfaa   :  { %6151 = vmatprep.subr.bf16.mxu0 %v6150_v0 }
 0xfad   :  { %6153 = vmatpush1.bf16.msra.mxu0 %v6152_v31 }
 0xfae   :  { %6155 = vmatprep.subr.bf16.mxu0 %v6154_v33 }
 0xfb1   :  { %6157 = vmatpush1.bf16.msra.mxu0 %v6156_v54 }
 0xfb4   :  { %3531 = vmatmul.mubr.f32.vlgmr.msra.gmra.mrb[32].mxu0 %v8601_v55 }
 0xfb5   :  { %3536 = vmatprep.mubr.f32.mxu0 %v8590_v19 }
 0xfb8   :  { %3537 = vmatmul.mubr.f32.gmra.mrb[34].mxu0 %v8602_v5 }
 0xfb9   :  { %3542 = vmatprep.mubr.f32.mxu0 %v8590_v19 }
 0xfbc   :  { %3543 = vmatmul.mubr.f32.gmra.mrb[36].mxu0 %v8603_v8 }
 0xfbd   :  { %3548 = vmatprep.mubr.f32.mxu0 %v8590_v19 }
 0xfc0   :  { %3549 = vmatmul.mubr.f32.gmra.mrb[38].mxu0 %v8604_v15 }
 0xfc1   :  { %3554 = vmatprep.mubr.f32.mxu0 %v8590_v19 }
 0xfc4   :  { %3555 = vmatmul.mubr.f32.gmra.mrb[40].mxu0 %v8605_v48 }
 0xfc5   :  { %3560 = vmatprep.mubr.f32.mxu0 %v8590_v19 }
 0xfc8   :  { %3561 = vmatmul.mubr.f32.gmra.mrb[42].mxu0 %v8606_v30 }
 0xfc9   :  { %3566 = vmatprep.mubr.f32.mxu0 %v8590_v19 }
 0xfcc   :  { %3567 = vmatmul.mubr.f32.gmra.mrb[44].mxu0 %v8607_v52 }
 0xfcd   :  { %3572 = vmatprep.mubr.f32.mxu0 %v8590_v19 }
 0xfd0   :  { %3573 = vmatmul.mubr.f32.gmra.mrb[46].mxu0 %v7674_v18  ;;  %v8608_v18 = vld [vmem:[#allocation11_spill] sm:$0xff] }
 0xfd1   :  { %3578 = vmatprep.mubr.f32.mxu0 %v8590_v19 }
 0xfd4   :  { %3579 = vmatmul.mubr.f32.gmra.mrb[48].mxu0 %v7722_v7  ;;  %v283_v7 = vadd.f32 %v8608_v18, %v7337_v50 }
 0xfd5   :  { %3584 = vmatprep.mubr.f32.mxu0 %v8590_v19 }
 0xfd8   :  { %3585 = vmatmul.mubr.f32.gmra.mrb[50].mxu0 %v7770_v46  ;;  %v8609_v46 = vld [vmem:[#allocation12_spill] sm:$0xff] }
 0xfd9   :  { %3590 = vmatprep.mubr.f32.mxu0 %v8590_v19 }
 0xfdc   :  { %3591 = vmatmul.mubr.f32.gmra.mrb[52].mxu0 %v7818_v10  ;;  %v285_v10 = vadd.f32 %v8609_v46, %v7333_v47 }
 0xfdd   :  { %3596 = vmatprep.mubr.f32.mxu0 %v8590_v19 }
 0xfe0   :  { %3597 = vmatmul.mubr.f32.gmra.mrb[54].mxu0 %v7866_v60 }
 0xfe1   :  { %3602 = vmatprep.mubr.f32.mxu0 %v8590_v19 }
 0xfe4   :  { %3603 = vmatmul.mubr.f32.gmra.mrb[56].mxu0 %v7914_v59 }
 0xfe5   :  { %3608 = vmatprep.mubr.f32.mxu0 %v8590_v19 }
 0xfe8   :  { %3609 = vmatmul.mubr.f32.gmra.mrb[58].mxu0 %v7962_v14 }
 0xfe9   :  { %3614 = vmatprep.mubr.f32.mxu0 %v8590_v19 }
 0xfec   :  { %3615 = vmatmul.mubr.f32.gmra.mrb[60].mxu0 %v8026_v53 }
 0xfed   :  { %3620 = vmatprep.mubr.f32.mxu0 %v8590_v19 }
0x1067   :  { %v3300_v60 = vpop.f32.mrb[30].mxu0  ;;  %v3371_v39 = vpop.f32.mrb[46].mxu1 }
0x1068   :  { %v3376_v57 = vadd.f32 %v3300_v60, %v283_v7  ;;  %v3302_v59 = vpop.f32.mrb[31].mxu0  ;;  %v3373_v63 = vpop.f32.mrb[47].mxu1  ;;  %v6252_v53 = vadd.f32 %v3371_v39, %v7343_v27 }
0x1069   :  { %v3377_v38 = vadd.f32 %v3302_v59, %v285_v10  ;;  %v6253_v19 = vadd.f32 %v3373_v63, %v7345_v44  ;;  %v8610_v44 = vld [vmem:[#allocation13_spill] sm:$0xff] }
0x106a   :  { %v5035_v56 = vmul.f32 -1.442695, %v3376_v57  ;;  %v8611_v28 = vsub.s32 0, %v8610_v44  ;;  %v8612_v9 = vsub.s32 1, %v8610_v44  ;;  %v8159_v2 = vsub.s32 %v3633_v42, %v8610_v44 }
0x106b   :  { %v5036_v14 = vmul.f32 -1.442695, %v3377_v38  ;;  %v5037_v47 = vmul.f32 -1.442695, %v6253_v19 }
0x106c   :  { %6547 = vpow2.f32 %v5035_v56  ;;  %v8150_v1 = vrot.slane %v3454_v36, %v8611_v28  ;;  %v8155_v21 = vrot.slane %v3454_v36, %v8612_v9 }
0x106d   :  { %6549 = vpow2.f32 %v5036_v14 }
0x106e   :  { %6551 = vtanh.f32 %v6252_v53 }
0x1076   :  { %v6548_v61 = vpop.eup %6547 }
0x1077   :  { %v6550_v12 = vpop.eup %6549  ;;  %v3383_v50 = vadd.f32 1.0, %v6548_v61 }
0x1078   :  { %v3389_v26 = vadd.f32 1.0, %v6550_v12  ;;  %v6552_v32 = vpop.eup %6551 }
0x1079   :  { %6553 = vrcp.f32 %v3383_v50 }
0x107a   :  { %6555 = vrcp.f32 %v3389_v26 }
0x107b   :  { %6557 = vpow2.f32 %v5037_v47 }
0x1083   :  { %v6554_v16 = vpop.eup %6553 }
0x1084   :  { %v6556_v27 = vpop.eup %6555  ;;  %v3400_v34 = vmul.f32 %v6554_v16, %v6552_v32 }
0x1085   :  { %v3399_v6 = vmul.f32 %v6556_v27, %v8011_v17  ;;  %v6558_v23 = vpop.eup %6557 }
0x1086   :  { %v3396_v4 = vadd.f32 1.0, %v6558_v23 }
0x1087   :  { %v3532_v35 = vpop.f32.mrb[32].mxu0  ;;  %v3401_v37 = vadd.f32 %v3400_v34, %v3399_v6 }
0x1088   :  { %v3533_v49 = vadd.f32 %v3532_v35, %v8150_v1  ;;  %v3534_v51 = vpop.f32.mrb[33].mxu0 }
0x1089   :  { %v3535_v22 = vadd.f32 %v3534_v51, %v8155_v21  ;;  %6559 = vtanh.f32 %v3401_v37 }
0x108a   :  { %6561 = vrcp.f32 %v3396_v4 }
0x108b   :  { %v3629_v25 = vcombine.low %v3533_v49, %v3535_v22  ;;  %v3630_v41 = vcombine.high %v3533_v49, %v3535_v22  ;;  %v3538_v45 = vpop.f32.mrb[34].mxu0 }
0x108c   :  { %v3539_v17 = vadd.f32 %v3538_v45, %v8150_v1  ;;  %v3540_v58 = vpop.f32.mrb[35].mxu0 }
0x108d   :  { %v3637_v62 = vrot.slane %v3629_v25, %v8159_v2  ;;  %v3644_v0 = vrot.slane %v3630_v41, %v8159_v2  ;;  %v3541_v11 = vadd.f32 %v3540_v58, %v8155_v21 }
0x108f   :  { %v3645_v24 = vcombine.high %v3637_v62, %v3637_v62  ;;  %v3646_v31 = vcombine.high %v3644_v0, %v3644_v0  ;;  %v3653_v33 = vrot.slane %v3637_v62, %v8159_v2  ;;  %v3660_v40 = vrot.slane %v3644_v0, %v8159_v2  ;;  %v3544_v43 = vpop.f32.mrb[36].mxu0 }
0x1090   :  { %v3716_v54 = vcombine.low %v3539_v17, %v3541_v11  ;;  %v3717_v55 = vcombine.high %v3539_v17, %v3541_v11  ;;  %v3545_v5 = vadd.f32 %v3544_v43, %v8150_v1  ;;  %v3546_v8 = vpop.f32.mrb[37].mxu0 }
0x1091   :  { %v3667_v15 = vrot.slane %v3645_v24, %v8159_v2  ;;  %v3674_v48 = vrot.slane %v3646_v31, %v8159_v2  ;;  %v3675_v30 = vcombine.high %v3653_v33, %v3653_v33  ;;  %v3676_v52 = vcombine.high %v3660_v40, %v3660_v40  ;;  %3691 = vst.msk [vmem:[#allocation4] ss:$8 sm:$0x3] %vm8167_vm0, %v3653_v33 }
0x1092   :  { %3703 = vst.msk [vmem:[#allocation4 + $0x80] ss:$8 sm:$0x3] %vm8167_vm0, %v3660_v40  ;;  %v3724_v18 = vrot.slane %v3716_v54, %v8159_v2  ;;  %v3731_v7 = vrot.slane %v3717_v55, %v8159_v2  ;;  %v3547_v46 = vadd.f32 %v3546_v8, %v8155_v21 }
0x1093   :  { %v3677_v10 = vcombine.high %v3667_v15, %v3667_v15  ;;  %v3678_v60 = vcombine.high %v3674_v48, %v3674_v48  ;;  %3694 = vst.msk [vmem:[#allocation4 + $0x20] ss:$8 sm:$0x3] %vm8167_vm0, %v3667_v15  ;;  %3697 = vst.msk [vmem:[#allocation4 + $0x40] ss:$8 sm:$0x3] %vm8167_vm0, %v3675_v30  ;;  %v6560_v14 = vpop.eup %6559 }
0x1094   :  { %3706 = vst.msk [vmem:[#allocation4 + $0xa0] ss:$8 sm:$0x3] %vm8167_vm0, %v3674_v48  ;;  %3709 = vst.msk [vmem:[#allocation4 + $0xc0] ss:$8 sm:$0x3] %vm8167_vm0, %v3676_v52  ;;  %v3732_v57 = vcombine.high %v3724_v18, %v3724_v18  ;;  %v3733_v59 = vcombine.high %v3731_v7, %v3731_v7  ;;  %v3740_v63 = vrot.slane %v3724_v18, %v8159_v2  ;;  %v6562_v3 = vpop.eup %6561 }
0x1095   :  { %v3550_v39 = vpop.f32.mrb[38].mxu0  ;;  %v3747_v38 = vrot.slane %v3731_v7, %v8159_v2  ;;  %3700 = vst.msk [vmem:[#allocation4 + $0x60] ss:$8 sm:$0x3] %vm8167_vm0, %v3677_v10  ;;  %v3800_v53 = vcombine.low %v3545_v5, %v3547_v46  ;;  %v3801_v19 = vcombine.high %v3545_v5, %v3547_v46  ;;  %v3403_v6 = vmul.f32 %v6562_v3, %v6560_v14 }
0x1096   :  { %v3552_v56 = vpop.f32.mrb[39].mxu0  ;;  %3712 = vst.msk [vmem:[#allocation4 + $0xe0] ss:$8 sm:$0x3] %vm8167_vm0, %v3678_v60  ;;  %v3551_v61 = vadd.f32 %v3550_v39, %v8150_v1  ;;  %v3754_v50 = vrot.slane %v3732_v57, %v8159_v2  ;;  %v3761_v26 = vrot.slane %v3733_v59, %v8159_v2  ;;  %v3762_v47 = vcombine.high %v3740_v63, %v3740_v63 }
0x1097   :  { %v3553_v12 = vadd.f32 %v3552_v56, %v8155_v21  ;;  %v3763_v29 = vcombine.high %v3747_v38, %v3747_v38  ;;  %3775 = vst.msk [vmem:[#allocation4 + $0x1] ss:$8 sm:$0x3] %vm8167_vm0, %v3740_v63  ;;  %3787 = vst.msk [vmem:[#allocation4 + $0x81] ss:$8 sm:$0x3] %vm8167_vm0, %v3747_v38  ;;  %v3808_v36 = vrot.slane %v3800_v53, %v8159_v2  ;;  %3621 = vmatmul.mubr.f32.gmra.mrb[62].mxu0 %v3403_v6 }
0x1098   :  { %v3815_v32 = vrot.slane %v3801_v19, %v8159_v2  ;;  %v3556_v34 = vpop.f32.mrb[40].mxu0  ;;  %v3764_v44 = vcombine.high %v3754_v50, %v3754_v50  ;;  %v3765_v28 = vcombine.high %v3761_v26, %v3761_v26  ;;  %3778 = vst.msk [vmem:[#allocation4 + $0x21] ss:$8 sm:$0x3] %vm8167_vm0, %v3754_v50 }
0x1099   :  { %v3884_v16 = vcombine.low %v3551_v61, %v3553_v12  ;;  %v3885_v27 = vcombine.high %v3551_v61, %v3553_v12  ;;  %3781 = vst.msk [vmem:[#allocation4 + $0x41] ss:$8 sm:$0x3] %vm8167_vm0, %v3762_v47  ;;  %3790 = vst.msk [vmem:[#allocation4 + $0xa1] ss:$8 sm:$0x3] %vm8167_vm0, %v3761_v26  ;;  %v3557_v42 = vadd.f32 %v3556_v34, %v8150_v1 }
0x109a   :  { %3793 = vst.msk [vmem:[#allocation4 + $0xc1] ss:$8 sm:$0x3] %vm8167_vm0, %v3763_v29  ;;  %v3558_v9 = vpop.f32.mrb[41].mxu0  ;;  %v3816_v23 = vcombine.high %v3808_v36, %v3808_v36  ;;  %v3817_v35 = vcombine.high %v3815_v32, %v3815_v32  ;;  %v3824_v37 = vrot.slane %v3808_v36, %v8159_v2  ;;  %v3831_v49 = vrot.slane %v3815_v32, %v8159_v2 }
0x109b   :  { %3784 = vst.msk [vmem:[#allocation4 + $0x61] ss:$8 sm:$0x3] %vm8167_vm0, %v3764_v44  ;;  %3796 = vst.msk [vmem:[#allocation4 + $0xe1] ss:$8 sm:$0x3] %vm8167_vm0, %v3765_v28  ;;  %v3892_v51 = vrot.slane %v3884_v16, %v8159_v2  ;;  %v3899_v4 = vrot.slane %v3885_v27, %v8159_v2  ;;  %v3559_v22 = vadd.f32 %v3558_v9, %v8155_v21 }
0x109c   :  { %v3838_v25 = vrot.slane %v3816_v23, %v8159_v2  ;;  %v3845_v41 = vrot.slane %v3817_v35, %v8159_v2  ;;  %v3846_v45 = vcombine.high %v3824_v37, %v3824_v37  ;;  %v3847_v17 = vcombine.high %v3831_v49, %v3831_v49  ;;  %3859 = vst.msk [vmem:[#allocation4 + $0x2] ss:$8 sm:$0x3] %vm8167_vm0, %v3824_v37  ;;  %v3562_v58 = vpop.f32.mrb[42].mxu0 }
0x109d   :  { %3871 = vst.msk [vmem:[#allocation4 + $0x82] ss:$8 sm:$0x3] %vm8167_vm0, %v3831_v49  ;;  %v3900_v62 = vcombine.high %v3892_v51, %v3892_v51  ;;  %v3901_v0 = vcombine.high %v3899_v4, %v3899_v4  ;;  %v3908_v11 = vrot.slane %v3892_v51, %v8159_v2  ;;  %v3915_v13 = vrot.slane %v3899_v4, %v8159_v2  ;;  %v3564_v24 = vpop.f32.mrb[43].mxu0 }
0x109e   :  { %v3848_v31 = vcombine.high %v3838_v25, %v3838_v25  ;;  %v3849_v33 = vcombine.high %v3845_v41, %v3845_v41  ;;  %3862 = vst.msk [vmem:[#allocation4 + $0x22] ss:$8 sm:$0x3] %vm8167_vm0, %v3838_v25  ;;  %3865 = vst.msk [vmem:[#allocation4 + $0x42] ss:$8 sm:$0x3] %vm8167_vm0, %v3846_v45  ;;  %v3968_v40 = vcombine.low %v3557_v42, %v3559_v22 }
0x109f   :  { %3874 = vst.msk [vmem:[#allocation4 + $0xa2] ss:$8 sm:$0x3] %vm8167_vm0, %v3845_v41  ;;  %3877 = vst.msk [vmem:[#allocation4 + $0xc2] ss:$8 sm:$0x3] %vm8167_vm0, %v3847_v17  ;;  %v3969_v43 = vcombine.high %v3557_v42, %v3559_v22  ;;  %v3922_v54 = vrot.slane %v3900_v62, %v8159_v2  ;;  %v3929_v55 = vrot.slane %v3901_v0, %v8159_v2 }
0x10a0   :  { %v3930_v5 = vcombine.high %v3908_v11, %v3908_v11  ;;  %v3931_v8 = vcombine.high %v3915_v13, %v3915_v13  ;;  %3943 = vst.msk [vmem:[#allocation4 + $0x3] ss:$8 sm:$0x3] %vm8167_vm0, %v3908_v11  ;;  %3955 = vst.msk [vmem:[#allocation4 + $0x83] ss:$8 sm:$0x3] %vm8167_vm0, %v3915_v13  ;;  %v3976_v15 = vrot.slane %v3968_v40, %v8159_v2 }
0x10a1   :  { %3868 = vst.msk [vmem:[#allocation4 + $0x62] ss:$8 sm:$0x3] %vm8167_vm0, %v3848_v31  ;;  %3880 = vst.msk [vmem:[#allocation4 + $0xe2] ss:$8 sm:$0x3] %vm8167_vm0, %v3849_v33  ;;  %v3983_v48 = vrot.slane %v3969_v43, %v8159_v2  ;;  %v3563_v30 = vadd.f32 %v3562_v58, %v8150_v1  ;;  %v3565_v52 = vadd.f32 %v3564_v24, %v8155_v21 }
0x10a2   :  { %v3568_v18 = vpop.f32.mrb[44].mxu0  ;;  %v3932_v7 = vcombine.high %v3922_v54, %v3922_v54  ;;  %v3933_v46 = vcombine.high %v3929_v55, %v3929_v55  ;;  %3946 = vst.msk [vmem:[#allocation4 + $0x23] ss:$8 sm:$0x3] %vm8167_vm0, %v3922_v54  ;;  %v3984_v39 = vcombine.high %v3976_v15, %v3976_v15  ;;  %v3992_v59 = vrot.slane %v3976_v15, %v8159_v2 }
0x10a3   :  { %3949 = vst.msk [vmem:[#allocation4 + $0x43] ss:$8 sm:$0x3] %vm8167_vm0, %v3930_v5  ;;  %3958 = vst.msk [vmem:[#allocation4 + $0xa3] ss:$8 sm:$0x3] %vm8167_vm0, %v3929_v55  ;;  %v3569_v10 = vadd.f32 %v3568_v18, %v8150_v1  ;;  %v3985_v57 = vcombine.high %v3983_v48, %v3983_v48  ;;  %v3999_v63 = vrot.slane %v3983_v48, %v8159_v2 }
0x10a4   :  { %3961 = vst.msk [vmem:[#allocation4 + $0xc3] ss:$8 sm:$0x3] %vm8167_vm0, %v3931_v8  ;;  %v3570_v60 = vpop.f32.mrb[45].mxu0  ;;  %v4052_v38 = vcombine.low %v3563_v30, %v3565_v52  ;;  %v4053_v56 = vcombine.high %v3563_v30, %v3565_v52  ;;  %v4006_v53 = vrot.slane %v3984_v39, %v8159_v2  ;;  %v4014_v61 = vcombine.high %v3992_v59, %v3992_v59 }
0x10a5   :  { %3952 = vst.msk [vmem:[#allocation4 + $0x63] ss:$8 sm:$0x3] %vm8167_vm0, %v3932_v7  ;;  %3964 = vst.msk [vmem:[#allocation4 + $0xe3] ss:$8 sm:$0x3] %vm8167_vm0, %v3933_v46  ;;  %v3571_v14 = vadd.f32 %v3570_v60, %v8155_v21  ;;  %v4013_v19 = vrot.slane %v3985_v57, %v8159_v2  ;;  %v4015_v12 = vcombine.high %v3999_v63, %v3999_v63 }
0x10a6   :  { %4027 = vst.msk [vmem:[#allocation4 + $0x4] ss:$8 sm:$0x3] %vm8167_vm0, %v3992_v59  ;;  %4039 = vst.msk [vmem:[#allocation4 + $0x84] ss:$8 sm:$0x3] %vm8167_vm0, %v3999_v63  ;;  %v4060_v26 = vrot.slane %v4052_v38, %v8159_v2  ;;  %v4067_v47 = vrot.slane %v4053_v56, %v8159_v2  ;;  %v4016_v32 = vcombine.high %v4006_v53, %v4006_v53 }
0x10a7   :  { %v3574_v50 = vpop.f32.mrb[46].mxu0  ;;  %v4136_v29 = vcombine.low %v3569_v10, %v3571_v14  ;;  %v4137_v3 = vcombine.high %v3569_v10, %v3571_v14  ;;  %v4017_v16 = vcombine.high %v4013_v19, %v4013_v19  ;;  %4030 = vst.msk [vmem:[#allocation4 + $0x24] ss:$8 sm:$0x3] %vm8167_vm0, %v4006_v53 }
0x10a8   :  { %v3576_v36 = vpop.f32.mrb[47].mxu0  ;;  %4033 = vst.msk [vmem:[#allocation4 + $0x44] ss:$8 sm:$0x3] %vm8167_vm0, %v4014_v61  ;;  %v3575_v27 = vadd.f32 %v3574_v50, %v8150_v1  ;;  %v4068_v44 = vcombine.high %v4060_v26, %v4060_v26  ;;  %v4069_v28 = vcombine.high %v4067_v47, %v4067_v47  ;;  %v4076_v42 = vrot.slane %v4060_v26, %v8159_v2 }
0x10a9   :  { %4042 = vst.msk [vmem:[#allocation4 + $0xa4] ss:$8 sm:$0x3] %vm8167_vm0, %v4013_v19  ;;  %4045 = vst.msk [vmem:[#allocation4 + $0xc4] ss:$8 sm:$0x3] %vm8167_vm0, %v4015_v12  ;;  %v3577_v34 = vadd.f32 %v3576_v36, %v8155_v21  ;;  %v4083_v6 = vrot.slane %v4067_v47, %v8159_v2  ;;  %v4144_v9 = vrot.slane %v4136_v29, %v8159_v2 }
0x10aa   :  { %4036 = vst.msk [vmem:[#allocation4 + $0x64] ss:$8 sm:$0x3] %vm8167_vm0, %v4016_v32  ;;  %4048 = vst.msk [vmem:[#allocation4 + $0xe4] ss:$8 sm:$0x3] %vm8167_vm0, %v4017_v16  ;;  %v4151_v23 = vrot.slane %v4137_v3, %v8159_v2  ;;  %v4090_v51 = vrot.slane %v4068_v44, %v8159_v2  ;;  %v4097_v4 = vrot.slane %v4069_v28, %v8159_v2 }
0x10ab   :  { %v4220_v35 = vcombine.low %v3575_v27, %v3577_v34  ;;  %v4221_v37 = vcombine.high %v3575_v27, %v3577_v34  ;;  %v3580_v49 = vpop.f32.mrb[48].mxu0  ;;  %v4098_v22 = vcombine.high %v4076_v42, %v4076_v42  ;;  %v4099_v25 = vcombine.high %v4083_v6, %v4083_v6  ;;  %4111 = vst.msk [vmem:[#allocation4 + $0x5] ss:$8 sm:$0x3] %vm8167_vm0, %v4076_v42 }
0x10ac   :  { %4123 = vst.msk [vmem:[#allocation4 + $0x85] ss:$8 sm:$0x3] %vm8167_vm0, %v4083_v6  ;;  %v3582_v41 = vpop.f32.mrb[49].mxu0  ;;  %v4152_v45 = vcombine.high %v4144_v9, %v4144_v9  ;;  %v4153_v17 = vcombine.high %v4151_v23, %v4151_v23  ;;  %v4160_v58 = vrot.slane %v4144_v9, %v8159_v2  ;;  %v4167_v62 = vrot.slane %v4151_v23, %v8159_v2 }
0x10ad   :  { %v4100_v0 = vcombine.high %v4090_v51, %v4090_v51  ;;  %v4101_v11 = vcombine.high %v4097_v4, %v4097_v4  ;;  %4114 = vst.msk [vmem:[#allocation4 + $0x25] ss:$8 sm:$0x3] %vm8167_vm0, %v4090_v51  ;;  %4117 = vst.msk [vmem:[#allocation4 + $0x45] ss:$8 sm:$0x3] %vm8167_vm0, %v4098_v22  ;;  %v4228_v13 = vrot.slane %v4220_v35, %v8159_v2 }
0x10ae   :  { %4126 = vst.msk [vmem:[#allocation4 + $0xa5] ss:$8 sm:$0x3] %vm8167_vm0, %v4097_v4  ;;  %4129 = vst.msk [vmem:[#allocation4 + $0xc5] ss:$8 sm:$0x3] %vm8167_vm0, %v4099_v25  ;;  %v4235_v24 = vrot.slane %v4221_v37, %v8159_v2  ;;  %v4174_v31 = vrot.slane %v4152_v45, %v8159_v2  ;;  %v4181_v33 = vrot.slane %v4153_v17, %v8159_v2 }
0x10af   :  { %v4182_v40 = vcombine.high %v4160_v58, %v4160_v58  ;;  %v4183_v43 = vcombine.high %v4167_v62, %v4167_v62  ;;  %4195 = vst.msk [vmem:[#allocation4 + $0x6] ss:$8 sm:$0x3] %vm8167_vm0, %v4160_v58  ;;  %4207 = vst.msk [vmem:[#allocation4 + $0x86] ss:$8 sm:$0x3] %vm8167_vm0, %v4167_v62  ;;  %v4236_v55 = vcombine.high %v4228_v13, %v4228_v13 }
0x10b0   :  { %v3586_v54 = vpop.f32.mrb[50].mxu0  ;;  %4120 = vst.msk [vmem:[#allocation4 + $0x65] ss:$8 sm:$0x3] %vm8167_vm0, %v4100_v0  ;;  %v4237_v5 = vcombine.high %v4235_v24, %v4235_v24  ;;  %v4244_v8 = vrot.slane %v4228_v13, %v8159_v2  ;;  %v4251_v15 = vrot.slane %v4235_v24, %v8159_v2  ;;  %v4184_v30 = vcombine.high %v4174_v31, %v4174_v31 }
0x10b1   :  { %4132 = vst.msk [vmem:[#allocation4 + $0xe5] ss:$8 sm:$0x3] %vm8167_vm0, %v4101_v11  ;;  %v3588_v48 = vpop.f32.mrb[51].mxu0  ;;  %v4185_v52 = vcombine.high %v4181_v33, %v4181_v33  ;;  %v3581_v18 = vadd.f32 %v3580_v49, %v8150_v1  ;;  %v3583_v7 = vadd.f32 %v3582_v41, %v8155_v21  ;;  %v4258_v46 = vrot.slane %v4236_v55, %v8159_v2 }
0x10b2   :  { %4198 = vst.msk [vmem:[#allocation4 + $0x26] ss:$8 sm:$0x3] %vm8167_vm0, %v4174_v31  ;;  %4201 = vst.msk [vmem:[#allocation4 + $0x46] ss:$8 sm:$0x3] %vm8167_vm0, %v4182_v40  ;;  %v4265_v10 = vrot.slane %v4237_v5, %v8159_v2  ;;  %v4266_v60 = vcombine.high %v4244_v8, %v4244_v8  ;;  %v4267_v39 = vcombine.high %v4251_v15, %v4251_v15 }
0x10b3   :  { %4210 = vst.msk [vmem:[#allocation4 + $0xa6] ss:$8 sm:$0x3] %vm8167_vm0, %v4181_v33  ;;  %4213 = vst.msk [vmem:[#allocation4 + $0xc6] ss:$8 sm:$0x3] %vm8167_vm0, %v4183_v43  ;;  %v4304_v57 = vcombine.low %v3581_v18, %v3583_v7  ;;  %v4305_v59 = vcombine.high %v3581_v18, %v3583_v7  ;;  %v3587_v63 = vadd.f32 %v3586_v54, %v8150_v1 }
0x10b4   :  { %4279 = vst.msk [vmem:[#allocation4 + $0x7] ss:$8 sm:$0x3] %vm8167_vm0, %v4244_v8  ;;  %4291 = vst.msk [vmem:[#allocation4 + $0x87] ss:$8 sm:$0x3] %vm8167_vm0, %v4251_v15  ;;  %v3589_v38 = vadd.f32 %v3588_v48, %v8155_v21  ;;  %v4268_v14 = vcombine.high %v4258_v46, %v4258_v46  ;;  %v4269_v53 = vcombine.high %v4265_v10, %v4265_v10 }
0x10b5   :  { %4204 = vst.msk [vmem:[#allocation4 + $0x66] ss:$8 sm:$0x3] %vm8167_vm0, %v4184_v30  ;;  %4216 = vst.msk [vmem:[#allocation4 + $0xe6] ss:$8 sm:$0x3] %vm8167_vm0, %v4185_v52  ;;  %v4312_v12 = vrot.slane %v4304_v57, %v8159_v2  ;;  %v4319_v50 = vrot.slane %v4305_v59, %v8159_v2 }
0x10b6   :  { %v3592_v56 = vpop.f32.mrb[52].mxu0  ;;  %4282 = vst.msk [vmem:[#allocation4 + $0x27] ss:$8 sm:$0x3] %vm8167_vm0, %v4258_v46  ;;  %v4388_v26 = vcombine.low %v3587_v63, %v3589_v38  ;;  %v4389_v47 = vcombine.high %v3587_v63, %v3589_v38 }
0x10b7   :  { %4285 = vst.msk [vmem:[#allocation4 + $0x47] ss:$8 sm:$0x3] %vm8167_vm0, %v4266_v60  ;;  %4294 = vst.msk [vmem:[#allocation4 + $0xa7] ss:$8 sm:$0x3] %vm8167_vm0, %v4265_v10  ;;  %v3593_v19 = vadd.f32 %v3592_v56, %v8150_v1  ;;  %v4320_v3 = vcombine.high %v4312_v12, %v4312_v12  ;;  %v4321_v36 = vcombine.high %v4319_v50, %v4319_v50 }
0x10b8   :  { %4297 = vst.msk [vmem:[#allocation4 + $0xc7] ss:$8 sm:$0x3] %vm8167_vm0, %v4267_v39  ;;  %v3594_v61 = vpop.f32.mrb[53].mxu0  ;;  %v4328_v32 = vrot.slane %v4312_v12, %v8159_v2  ;;  %v4335_v16 = vrot.slane %v4319_v50, %v8159_v2  ;;  %v4396_v34 = vrot.slane %v4388_v26, %v8159_v2  ;;  %v4403_v44 = vrot.slane %v4389_v47, %v8159_v2 }
0x10b9   :  { %4288 = vst.msk [vmem:[#allocation4 + $0x67] ss:$8 sm:$0x3] %vm8167_vm0, %v4268_v14  ;;  %4300 = vst.msk [vmem:[#allocation4 + $0xe7] ss:$8 sm:$0x3] %vm8167_vm0, %v4269_v53  ;;  %v3595_v29 = vadd.f32 %v3594_v61, %v8155_v21  ;;  %v4342_v9 = vrot.slane %v4320_v3, %v8159_v2  ;;  %v4349_v23 = vrot.slane %v4321_v36, %v8159_v2 }
0x10ba   :  { %v3598_v27 = vpop.f32.mrb[54].mxu0  ;;  %v4350_v35 = vcombine.high %v4328_v32, %v4328_v32  ;;  %v4351_v37 = vcombine.high %v4335_v16, %v4335_v16  ;;  %4363 = vst.msk [vmem:[#allocation4 + $0x10] ss:$8 sm:$0x3] %vm8167_vm0, %v4328_v32  ;;  %v4404_v49 = vcombine.high %v4396_v34, %v4396_v34  ;;  %v4405_v51 = vcombine.high %v4403_v44, %v4403_v44 }
0x10bb   :  { %v4472_v28 = vcombine.low %v3593_v19, %v3595_v29  ;;  %v4473_v42 = vcombine.high %v3593_v19, %v3595_v29  ;;  %v3600_v6 = vpop.f32.mrb[55].mxu0  ;;  %4375 = vst.msk [vmem:[#allocation4 + $0x90] ss:$8 sm:$0x3] %vm8167_vm0, %v4335_v16  ;;  %v4412_v4 = vrot.slane %v4396_v34, %v8159_v2  ;;  %v4419_v22 = vrot.slane %v4403_v44, %v8159_v2 }
0x10bc   :  { %v4352_v25 = vcombine.high %v4342_v9, %v4342_v9  ;;  %v4353_v41 = vcombine.high %v4349_v23, %v4349_v23  ;;  %4366 = vst.msk [vmem:[#allocation4 + $0x30] ss:$8 sm:$0x3] %vm8167_vm0, %v4342_v9  ;;  %4369 = vst.msk [vmem:[#allocation4 + $0x50] ss:$8 sm:$0x3] %vm8167_vm0, %v4350_v35  ;;  %v4426_v62 = vrot.slane %v4404_v49, %v8159_v2 }
0x10bd   :  { %4378 = vst.msk [vmem:[#allocation4 + $0xb0] ss:$8 sm:$0x3] %vm8167_vm0, %v4349_v23  ;;  %4381 = vst.msk [vmem:[#allocation4 + $0xd0] ss:$8 sm:$0x3] %vm8167_vm0, %v4351_v37  ;;  %v4480_v45 = vrot.slane %v4472_v28, %v8159_v2  ;;  %v4487_v17 = vrot.slane %v4473_v42, %v8159_v2  ;;  %v4433_v0 = vrot.slane %v4405_v51, %v8159_v2 }
0x10be   :  { %v3604_v58 = vpop.f32.mrb[56].mxu0  ;;  %v4434_v11 = vcombine.high %v4412_v4, %v4412_v4  ;;  %v4435_v13 = vcombine.high %v4419_v22, %v4419_v22  ;;  %4447 = vst.msk [vmem:[#allocation4 + $0x11] ss:$8 sm:$0x3] %vm8167_vm0, %v4412_v4  ;;  %v4436_v54 = vcombine.high %v4426_v62, %v4426_v62  ;;  %v3599_v5 = vadd.f32 %v3598_v27, %v8150_v1 }
0x10bf   :  { %4459 = vst.msk [vmem:[#allocation4 + $0x91] ss:$8 sm:$0x3] %vm8167_vm0, %v4419_v22  ;;  %v3606_v24 = vpop.f32.mrb[57].mxu0  ;;  %v4488_v31 = vcombine.high %v4480_v45, %v4480_v45  ;;  %v4489_v33 = vcombine.high %v4487_v17, %v4487_v17  ;;  %v4496_v40 = vrot.slane %v4480_v45, %v8159_v2  ;;  %v4503_v43 = vrot.slane %v4487_v17, %v8159_v2 }
0x10c0   :  { %4372 = vst.msk [vmem:[#allocation4 + $0x70] ss:$8 sm:$0x3] %vm8167_vm0, %v4352_v25  ;;  %4384 = vst.msk [vmem:[#allocation4 + $0xf0] ss:$8 sm:$0x3] %vm8167_vm0, %v4353_v41  ;;  %v4437_v55 = vcombine.high %v4433_v0, %v4433_v0  ;;  %v3601_v8 = vadd.f32 %v3600_v6, %v8155_v21  ;;  %v3605_v10 = vadd.f32 %v3604_v58, %v8150_v1 }
0x10c1   :  { %4450 = vst.msk [vmem:[#allocation4 + $0x31] ss:$8 sm:$0x3] %vm8167_vm0, %v4426_v62  ;;  %4453 = vst.msk [vmem:[#allocation4 + $0x51] ss:$8 sm:$0x3] %vm8167_vm0, %v4434_v11  ;;  %v4510_v15 = vrot.slane %v4488_v31, %v8159_v2  ;;  %v4517_v48 = vrot.slane %v4489_v33, %v8159_v2  ;;  %v4518_v30 = vcombine.high %v4496_v40, %v4496_v40 }
0x10c2   :  { %4462 = vst.msk [vmem:[#allocation4 + $0xb1] ss:$8 sm:$0x3] %vm8167_vm0, %v4433_v0  ;;  %4465 = vst.msk [vmem:[#allocation4 + $0xd1] ss:$8 sm:$0x3] %vm8167_vm0, %v4435_v13  ;;  %v4519_v52 = vcombine.high %v4503_v43, %v4503_v43  ;;  %v4556_v7 = vcombine.low %v3599_v5, %v3601_v8  ;;  %v4557_v46 = vcombine.high %v3599_v5, %v3601_v8 }
0x10c3   :  { %4531 = vst.msk [vmem:[#allocation4 + $0x12] ss:$8 sm:$0x3] %vm8167_vm0, %v4496_v40  ;;  %4543 = vst.msk [vmem:[#allocation4 + $0x92] ss:$8 sm:$0x3] %vm8167_vm0, %v4503_v43  ;;  %v3607_v60 = vadd.f32 %v3606_v24, %v8155_v21  ;;  %v4520_v57 = vcombine.high %v4510_v15, %v4510_v15  ;;  %v4521_v59 = vcombine.high %v4517_v48, %v4517_v48 }
0x10c4   :  { %v3610_v18 = vpop.f32.mrb[58].mxu0  ;;  %4456 = vst.msk [vmem:[#allocation4 + $0x71] ss:$8 sm:$0x3] %vm8167_vm0, %v4436_v54  ;;  %v4564_v56 = vrot.slane %v4556_v7, %v8159_v2  ;;  %v4571_v14 = vrot.slane %v4557_v46, %v8159_v2 }
0x10c5   :  { %4468 = vst.msk [vmem:[#allocation4 + $0xf1] ss:$8 sm:$0x3] %vm8167_vm0, %v4437_v55  ;;  %v3612_v39 = vpop.f32.mrb[59].mxu0  ;;  %v3611_v63 = vadd.f32 %v3610_v18, %v8150_v1  ;;  %v4640_v53 = vcombine.low %v3605_v10, %v3607_v60  ;;  %v4641_v19 = vcombine.high %v3605_v10, %v3607_v60 }
0x10c6   :  { %4534 = vst.msk [vmem:[#allocation4 + $0x32] ss:$8 sm:$0x3] %vm8167_vm0, %v4510_v15  ;;  %4537 = vst.msk [vmem:[#allocation4 + $0x52] ss:$8 sm:$0x3] %vm8167_vm0, %v4518_v30  ;;  %v3613_v38 = vadd.f32 %v3612_v39, %v8155_v21  ;;  %v4572_v26 = vcombine.high %v4564_v56, %v4564_v56  ;;  %v4573_v47 = vcombine.high %v4571_v14, %v4571_v14 }
0x10c7   :  { %4546 = vst.msk [vmem:[#allocation4 + $0xb2] ss:$8 sm:$0x3] %vm8167_vm0, %v4517_v48  ;;  %4549 = vst.msk [vmem:[#allocation4 + $0xd2] ss:$8 sm:$0x3] %vm8167_vm0, %v4519_v52  ;;  %v4580_v29 = vrot.slane %v4564_v56, %v8159_v2  ;;  %v4587_v3 = vrot.slane %v4571_v14, %v8159_v2  ;;  %v4648_v32 = vrot.slane %v4640_v53, %v8159_v2 }
0x10c8   :  { %4540 = vst.msk [vmem:[#allocation4 + $0x72] ss:$8 sm:$0x3] %vm8167_vm0, %v4520_v57  ;;  %4552 = vst.msk [vmem:[#allocation4 + $0xf2] ss:$8 sm:$0x3] %vm8167_vm0, %v4521_v59  ;;  %v4724_v61 = vcombine.low %v3611_v63, %v3613_v38  ;;  %v4725_v12 = vcombine.high %v3611_v63, %v3613_v38  ;;  %v4655_v16 = vrot.slane %v4641_v19, %v8159_v2 }
0x10c9   :  { %v3616_v50 = vpop.f32.mrb[60].mxu0  ;;  %v4594_v44 = vrot.slane %v4572_v26, %v8159_v2  ;;  %v4601_v28 = vrot.slane %v4573_v47, %v8159_v2  ;;  %v4602_v42 = vcombine.high %v4580_v29, %v4580_v29  ;;  %v4603_v6 = vcombine.high %v4587_v3, %v4587_v3  ;;  %4615 = vst.msk [vmem:[#allocation4 + $0x13] ss:$8 sm:$0x3] %vm8167_vm0, %v4580_v29 }
0x10ca   :  { %v3618_v36 = vpop.f32.mrb[61].mxu0  ;;  %v4732_v27 = vrot.slane %v4724_v61, %v8159_v2  ;;  %v4739_v34 = vrot.slane %v4725_v12, %v8159_v2  ;;  %4627 = vst.msk [vmem:[#allocation4 + $0x93] ss:$8 sm:$0x3] %vm8167_vm0, %v4587_v3  ;;  %v4656_v9 = vcombine.high %v4648_v32, %v4648_v32  ;;  %v4657_v23 = vcombine.high %v4655_v16, %v4655_v16 }
0x10cb   :  { %v4664_v35 = vrot.slane %v4648_v32, %v8159_v2  ;;  %v4671_v37 = vrot.slane %v4655_v16, %v8159_v2  ;;  %v4604_v49 = vcombine.high %v4594_v44, %v4594_v44  ;;  %v4605_v51 = vcombine.high %v4601_v28, %v4601_v28  ;;  %4618 = vst.msk [vmem:[#allocation4 + $0x33] ss:$8 sm:$0x3] %vm8167_vm0, %v4594_v44 }
0x10cc   :  { %4621 = vst.msk [vmem:[#allocation4 + $0x53] ss:$8 sm:$0x3] %vm8167_vm0, %v4602_v42  ;;  %4630 = vst.msk [vmem:[#allocation4 + $0xb3] ss:$8 sm:$0x3] %vm8167_vm0, %v4601_v28  ;;  %v4740_v4 = vcombine.high %v4732_v27, %v4732_v27  ;;  %v4741_v22 = vcombine.high %v4739_v34, %v4739_v34  ;;  %v4678_v25 = vrot.slane %v4656_v9, %v8159_v2 }
0x10cd   :  { %4633 = vst.msk [vmem:[#allocation4 + $0xd3] ss:$8 sm:$0x3] %vm8167_vm0, %v4603_v6  ;;  %v4685_v41 = vrot.slane %v4657_v23, %v8159_v2  ;;  %v4686_v45 = vcombine.high %v4664_v35, %v4664_v35  ;;  %v4687_v17 = vcombine.high %v4671_v37, %v4671_v37  ;;  %4699 = vst.msk [vmem:[#allocation4 + $0x14] ss:$8 sm:$0x3] %vm8167_vm0, %v4664_v35 }
0x10ce   :  { %4711 = vst.msk [vmem:[#allocation4 + $0x94] ss:$8 sm:$0x3] %vm8167_vm0, %v4671_v37  ;;  %4624 = vst.msk [vmem:[#allocation4 + $0x73] ss:$8 sm:$0x3] %vm8167_vm0, %v4604_v49  ;;  %v4748_v58 = vrot.slane %v4732_v27, %v8159_v2  ;;  %v4755_v62 = vrot.slane %v4739_v34, %v8159_v2  ;;  %v4762_v0 = vrot.slane %v4740_v4, %v8159_v2 }
0x10cf   :  { %4636 = vst.msk [vmem:[#allocation4 + $0xf3] ss:$8 sm:$0x3] %vm8167_vm0, %v4605_v51  ;;  %v4769_v11 = vrot.slane %v4741_v22, %v8159_v2  ;;  %v4688_v13 = vcombine.high %v4678_v25, %v4678_v25  ;;  %v4689_v24 = vcombine.high %v4685_v41, %v4685_v41  ;;  %4702 = vst.msk [vmem:[#allocation4 + $0x34] ss:$8 sm:$0x3] %vm8167_vm0, %v4678_v25 }
0x10d0   :  { %4705 = vst.msk [vmem:[#allocation4 + $0x54] ss:$8 sm:$0x3] %vm8167_vm0, %v4686_v45  ;;  %4714 = vst.msk [vmem:[#allocation4 + $0xb4] ss:$8 sm:$0x3] %vm8167_vm0, %v4685_v41  ;;  %v3617_v31 = vadd.f32 %v3616_v50, %v8150_v1  ;;  %v3619_v33 = vadd.f32 %v3618_v36, %v8155_v21  ;;  %v4770_v40 = vcombine.high %v4748_v58, %v4748_v58 }
0x10d1   :  { %4717 = vst.msk [vmem:[#allocation4 + $0xd4] ss:$8 sm:$0x3] %vm8167_vm0, %v4687_v17  ;;  %v4771_v43 = vcombine.high %v4755_v62, %v4755_v62  ;;  %v4772_v54 = vcombine.high %v4762_v0, %v4762_v0  ;;  %v4773_v55 = vcombine.high %v4769_v11, %v4769_v11  ;;  %4783 = vst.msk [vmem:[#allocation4 + $0x15] ss:$8 sm:$0x3] %vm8167_vm0, %v4748_v58 }
0x10d2   :  { %4786 = vst.msk [vmem:[#allocation4 + $0x35] ss:$8 sm:$0x3] %vm8167_vm0, %v4762_v0  ;;  %4795 = vst.msk [vmem:[#allocation4 + $0x95] ss:$8 sm:$0x3] %vm8167_vm0, %v4755_v62  ;;  %v4808_v5 = vcombine.low %v3617_v31, %v3619_v33  ;;  %v4809_v8 = vcombine.high %v3617_v31, %v3619_v33 }
0x10d3   :  { %4798 = vst.msk [vmem:[#allocation4 + $0xb5] ss:$8 sm:$0x3] %vm8167_vm0, %v4769_v11  ;;  %4708 = vst.msk [vmem:[#allocation4 + $0x74] ss:$8 sm:$0x3] %vm8167_vm0, %v4688_v13 }
0x10d4   :  { %4720 = vst.msk [vmem:[#allocation4 + $0xf4] ss:$8 sm:$0x3] %vm8167_vm0, %v4689_v24  ;;  %4789 = vst.msk [vmem:[#allocation4 + $0x55] ss:$8 sm:$0x3] %vm8167_vm0, %v4770_v40  ;;  %v4816_v15 = vrot.slane %v4808_v5, %v8159_v2  ;;  %v4823_v48 = vrot.slane %v4809_v8, %v8159_v2 }
0x10d5   :  { %4792 = vst.msk [vmem:[#allocation4 + $0x75] ss:$8 sm:$0x3] %vm8167_vm0, %v4772_v54  ;;  %4801 = vst.msk [vmem:[#allocation4 + $0xd5] ss:$8 sm:$0x3] %vm8167_vm0, %v4771_v43 }
0x10d6   :  { %4804 = vst.msk [vmem:[#allocation4 + $0xf5] ss:$8 sm:$0x3] %vm8167_vm0, %v4773_v55  ;;  %v4824_v30 = vcombine.high %v4816_v15, %v4816_v15  ;;  %v4825_v52 = vcombine.high %v4823_v48, %v4823_v48  ;;  %v4832_v18 = vrot.slane %v4816_v15, %v8159_v2  ;;  %v4839_v7 = vrot.slane %v4823_v48, %v8159_v2 }
0x10d8   :  { %v4846_v46 = vrot.slane %v4824_v30, %v8159_v2  ;;  %v4853_v10 = vrot.slane %v4825_v52, %v8159_v2  ;;  %v4854_v60 = vcombine.high %v4832_v18, %v4832_v18  ;;  %v4855_v39 = vcombine.high %v4839_v7, %v4839_v7  ;;  %4867 = vst.msk [vmem:[#allocation4 + $0x16] ss:$8 sm:$0x3] %vm8167_vm0, %v4832_v18 }
0x10d9   :  { %4879 = vst.msk [vmem:[#allocation4 + $0x96] ss:$8 sm:$0x3] %vm8167_vm0, %v4839_v7 }
0x10da   :  { %v4856_v57 = vcombine.high %v4846_v46, %v4846_v46  ;;  %v4857_v59 = vcombine.high %v4853_v10, %v4853_v10  ;;  %4870 = vst.msk [vmem:[#allocation4 + $0x36] ss:$8 sm:$0x3] %vm8167_vm0, %v4846_v46  ;;  %4873 = vst.msk [vmem:[#allocation4 + $0x56] ss:$8 sm:$0x3] %vm8167_vm0, %v4854_v60 }
0x10db   :  { %4882 = vst.msk [vmem:[#allocation4 + $0xb6] ss:$8 sm:$0x3] %vm8167_vm0, %v4853_v10  ;;  %4885 = vst.msk [vmem:[#allocation4 + $0xd6] ss:$8 sm:$0x3] %vm8167_vm0, %v4855_v39 }
0x10dc   :  { %4876 = vst.msk [vmem:[#allocation4 + $0x76] ss:$8 sm:$0x3] %vm8167_vm0, %v4856_v57  ;;  %4888 = vst.msk [vmem:[#allocation4 + $0xf6] ss:$8 sm:$0x3] %vm8167_vm0, %v4857_v59 }
0x116a   :  { %v3622_v63 = vpop.f32.mrb[62].mxu0 }
0x116b   :  { %v3623_v38 = vadd.f32 %v3622_v63, %v8150_v1  ;;  %v3624_v56 = vpop.f32.mrb[63].mxu0 }
0x116c   :  { %v3625_v14 = vadd.f32 %v3624_v56, %v8155_v21 }
0x116e   :  { %v4892_v53 = vcombine.low %v3623_v38, %v3625_v14  ;;  %v4893_v19 = vcombine.high %v3623_v38, %v3625_v14 }
0x1170   :  { %v4900_v61 = vrot.slane %v4892_v53, %v8159_v2  ;;  %v4907_v12 = vrot.slane %v4893_v19, %v8159_v2 }
0x1172   :  { %v4908_v50 = vcombine.high %v4900_v61, %v4900_v61  ;;  %v4909_v26 = vcombine.high %v4907_v12, %v4907_v12  ;;  %v4916_v47 = vrot.slane %v4900_v61, %v8159_v2  ;;  %v4923_v29 = vrot.slane %v4907_v12, %v8159_v2 }
0x1174   :  { %v4930_v3 = vrot.slane %v4908_v50, %v8159_v2  ;;  %v4937_v1 = vrot.slane %v4909_v26, %v8159_v2  ;;  %v4938_v36 = vcombine.high %v4916_v47, %v4916_v47  ;;  %v4939_v21 = vcombine.high %v4923_v29, %v4923_v29  ;;  %4951 = vst.msk [vmem:[#allocation4 + $0x17] ss:$8 sm:$0x3] %vm8167_vm0, %v4916_v47 }
0x1175   :  { %4963 = vst.msk [vmem:[#allocation4 + $0x97] ss:$8 sm:$0x3] %vm8167_vm0, %v4923_v29 }
0x1176   :  { %v4940_v32 = vcombine.high %v4930_v3, %v4930_v3  ;;  %v4941_v16 = vcombine.high %v4937_v1, %v4937_v1  ;;  %4954 = vst.msk [vmem:[#allocation4 + $0x37] ss:$8 sm:$0x3] %vm8167_vm0, %v4930_v3  ;;  %4957 = vst.msk [vmem:[#allocation4 + $0x57] ss:$8 sm:$0x3] %vm8167_vm0, %v4938_v36 }
0x1177   :  { %4966 = vst.msk [vmem:[#allocation4 + $0xb7] ss:$8 sm:$0x3] %vm8167_vm0, %v4937_v1  ;;  %4969 = vst.msk [vmem:[#allocation4 + $0xd7] ss:$8 sm:$0x3] %vm8167_vm0, %v4939_v21 }
0x1178   :  { %4960 = vst.msk [vmem:[#allocation4 + $0x77] ss:$8 sm:$0x3] %vm8167_vm0, %v4940_v32  ;;  %4972 = vst.msk [vmem:[#allocation4 + $0xf7] ss:$8 sm:$0x3] %vm8167_vm0, %v4941_v16 }
0x1179   :  { %6574 = shalt.err (!%p6571_p4)
}
0x117a   :  { %s6575_s27 = scalar_lea.hbm %s8567_s6, 4096 }
0x117b   :  { %p6576_p5 = scmp.ne.s32.totalorder %s8567_s6, %s6575_s27  ;;  %p6579_p6 = scmp.lt.u32.totalorder %s6575_s27, %s8567_s6 }
0x117d   :  { %p6581_p7 = pnand %p6579_p6, %p6576_p5 }
0x117f   :  { %6584 = shalt.err (!%p6581_p7)
}
0x1180   :  { %s6590_s8 = smov 256   ;;  %s6591_s9 = smov 16  }
0x1181   :  { %4985 = dma.vmem_to_hbm [thread:$0]  %s4980_s24, 4096, %s8567_s6, [#allocation5], %s6590_s8, %s6590_s8, %s6591_s9  }
0x1182   :  { %6585 = dma.done.wait [#allocation5], 4096  }
0x1183   :  { %6586 = vsyncadd [#allocation5], 4294963200 }
0x1184   :  { %4989 = vsyncpa [#allocation5], 1 }

</bundles_post_ra>
